<compile_context>
chip_gen: v6e
topology: v6e:2x2x1
jax: 0.10.0
libtpu: 0.0.40
codegen_flags: <defaults>
</compile_context>

<pallas_src>
import functools

import jax
import jax.numpy as jnp
from jax import lax
from jax.experimental import pallas as pl
from jax.experimental.pallas import tpu as pltpu

BN_EPS = 1e-5
LEAKY_SLOPE = 0.01
SCORE_LANES = 128   # lane-dense score output slab (avoids masked 1-lane stores)


# ----------------------------- in-kernel helpers -----------------------------

def _bf16(x):
    return x.astype(jnp.bfloat16)


def _bn_train(x):
    # BatchNorm1d, training mode, identity affine; two-pass mean/var for precision.
    mean = jnp.mean(x, axis=0, keepdims=True)
    xc = x - mean
    var = jnp.mean(xc * xc, axis=0, keepdims=True)
    return xc * lax.rsqrt(var + BN_EPS)


def _sigmoid(x):
    # Single EUP push (tanh), no approx reciprocal: this feeds the top-k ranking.
    return 0.5 * jnp.tanh(0.5 * x) + 0.5


def _softmax_exact(x, axis):
    m = jnp.max(x, axis=axis, keepdims=True)
    e = jnp.exp(x - m)
    return e / jnp.sum(e, axis=axis, keepdims=True)


def _softmax_fast(x, axis):
    # approx reciprocal rides the EUP; only used off the ranking path (CNN1 block).
    m = jnp.max(x, axis=axis, keepdims=True)
    e = jnp.exp(x - m)
    return e * pl.reciprocal(jnp.sum(e, axis=axis, keepdims=True), approx=True)


def _leaky_relu(x):
    return jnp.where(x >= 0, x, LEAKY_SLOPE * x)


def _gcn_core(g, h, wt, b):
    """BN -> linear -> D^-1/2 (A+I) D^-1/2 aggregation -> LeakyReLU.

    `wt` is the pre-transposed weight, already bf16.  With
    dinv = rsqrt(rowsum(A)+1):  D^-1/2(A+I)D^-1/2 @ hp
        == dinv * (A @ (dinv*hp)) + (dinv*dinv) * hp   (no eye / dense gn).
    """
    h_bn = _bn_train(h)
    hp = jnp.dot(_bf16(h_bn), wt, preferred_element_type=jnp.float32) + b
    # TODO(synk): zero-degree nodes produce inf here, matching the PyTorch reference.
    d = jnp.sum(g, axis=1, keepdims=True) + 1.0
    dinv = lax.rsqrt(d)
    agg = jnp.dot(_bf16(g), _bf16(dinv * hp), preferred_element_type=jnp.float32)
    return _leaky_relu(dinv * agg + (dinv * dinv) * hp)


def _pool_and_mask(g, h_gcn, wp, bp, sigma1):
    """Pool scoring on the GCN output + score-weighted feats + 2-hop mask."""
    h_bn = _bn_train(h_gcn)
    d = jnp.sum(g, axis=1, keepdims=True)                               # [n, 1]
    gh = jnp.dot(_bf16(g), _bf16(h_bn), preferred_element_type=jnp.float32)
    dgh = gh / d                                                        # D^-1 A h, exact div
    z1 = jnp.sum(jnp.abs(h_bn - dgh), axis=1, keepdims=True)            # [n, 1]
    p_local = _sigmoid(z1 + d)
    # width-1 projections stay on the VPU as lane reductions (MXU would be 1/128 useful)
    z3 = jnp.sum(dgh * wp, axis=1, keepdims=True) + bp
    pg = _softmax_exact(z3, axis=0)                                     # softmax over nodes
    pt = _sigmoid(p_local + pg)
    pf = _sigmoid(jnp.sum(h_bn * wp, axis=1, keepdims=True) + bp)
    scores = sigma1 * pt + (1.0 - sigma1) * pf                          # [n, 1]
    h_att = scores * h_bn
    ug = (g != 0).astype(jnp.bfloat16)
    ug2 = jnp.dot(ug, ug, preferred_element_type=jnp.float32)           # 0/1 sums: bf16 exact
    return scores, h_att, (ug2 != 0).astype(jnp.float32)


def _finish_pool(idx_s_ref, idx_v_ref, ug2p_ref, hattp_ref, a_hat_ref):
    """Dense tail of top_k_graph, fused into the consumer kernel.

    a_hat = ug2_prev[idx, :] via SMEM-indexed dynamic row loads;
    new_h = a_hat @ h_att_prev;  g_new = a_hat[:, idx] via a tiny one-hot matmul
    (lane gather), then column-normalized exactly like torch's norm_g
    (g[i, j] / rowsum_j(g)).
    """
    kk, np_ = a_hat_ref.shape
    for j in range(kk):                        # static unroll (kk is small & static)
        a_hat_ref[pl.ds(j, 1), :] = ug2p_ref[pl.ds(idx_s_ref[0, j], 1), :]
    a_bf = _bf16(a_hat_ref[...])               # 0/1 entries: bf16 exact
    new_h = jnp.dot(a_bf, _bf16(hattp_ref[...]), preferred_element_type=jnp.float32)
    onehot = (lax.broadcasted_iota(jnp.int32, (np_, kk), 0)
              == idx_v_ref[...]).astype(jnp.bfloat16)                   # [np, kk]
    g_sel = jnp.dot(a_bf, onehot, preferred_element_type=jnp.float32)   # [kk, kk]
    # Row-sums emitted directly in lane orientation (NT matvec) -> no transpose.
    deg = lax.dot_general(jnp.ones((1, kk), jnp.bfloat16), _bf16(g_sel),
                          (((1,), (1,)), ((), ())),
                          preferred_element_type=jnp.float32)           # [1, kk]
    return g_sel / deg, new_h


# --------------------------------- kernels -----------------------------------

def _down_first_kernel(g_ref, h_ref, wt_ref, b_ref, wp_ref, bp_ref, sig_ref,
                       hgcn_ref, scores_ref, hatt_ref, ug2_ref):
    """First down level: GCN -> Pool scoring -> weighted feats -> 2-hop mask."""
    g = g_ref[...]
    h_gcn = _gcn_core(g, h_ref[...], wt_ref[...], b_ref[...])
    hgcn_ref[...] = h_gcn
    scores, h_att, ug2 = _pool_and_mask(g, h_gcn, wp_ref[...],
                                        bp_ref[0, 0], sig_ref[0, 0])
    hatt_ref[...] = h_att
    ug2_ref[...] = ug2
    scores_ref[...] = jnp.broadcast_to(scores, scores_ref.shape)   # lane-dense slab


def _down_fused_kernel(idx_s_ref, idx_v_ref, ug2p_ref, hattp_ref,
                       wt_ref, b_ref, wp_ref, bp_ref, sig_ref,
                       g_out_ref, hgcn_ref, scores_ref, hatt_ref, ug2_ref,
                       a_hat_ref):
    """Down level i>=1: previous pool tail -> GCN -> Pool scoring -> 2-hop mask."""
    g, new_h = _finish_pool(idx_s_ref, idx_v_ref, ug2p_ref, hattp_ref, a_hat_ref)
    g_out_ref[...] = g
    h_gcn = _gcn_core(g, new_h, wt_ref[...], b_ref[...])
    hgcn_ref[...] = h_gcn
    scores, h_att, ug2 = _pool_and_mask(g, h_gcn, wp_ref[...],
                                        bp_ref[0, 0], sig_ref[0, 0])
    hatt_ref[...] = h_att
    ug2_ref[...] = ug2
    scores_ref[...] = jnp.broadcast_to(scores, scores_ref.shape)


def _bottom_fused_kernel(idx_s_ref, idx_v_ref, ug2p_ref, hattp_ref, wt_ref, b_ref,
                         o_ref, a_hat_ref):
    """Bottom of the U-Net: last pool tail -> GCN."""
    g, new_h = _finish_pool(idx_s_ref, idx_v_ref, ug2p_ref, hattp_ref, a_hat_ref)
    o_ref[...] = _gcn_core(g, new_h, wt_ref[...], b_ref[...])


def _up_kernel(idx_s_ref, g_ref, hs_ref, ph_ref, wct_ref, bc_ref, wut_ref, bu_ref,
               o_ref, newh_ref):
    """Fused up level: SMEM-indexed unpool scatter -> CNN1 cross block -> up GCN."""
    kk = hs_ref.shape[0]

    # --- Unpool: new_h[idx[j]] = h_small[j] via dynamic row stores (no one-hot MXU pass)
    newh_ref[...] = jnp.zeros_like(newh_ref)
    for j in range(kk):                        # static unroll (kk small & static)
        newh_ref[pl.ds(idx_s_ref[0, j], 1), :] = hs_ref[pl.ds(j, 1), :]

    # --- CNN1 cross block ---
    h_bn = _bn_train(newh_ref[...])
    p_bn = _bn_train(ph_ref[...])
    wct = wct_ref[...]
    bc = bc_ref[...]
    h2 = jnp.dot(_bf16(h_bn), wct, preferred_element_type=jnp.float32) + bc   # [n, D]
    h3 = jnp.dot(_bf16(p_bn), wct, preferred_element_type=jnp.float32) + bc   # [n, D]
    # h1 == h2^T, so sim = h2 @ h2^T; contract feature dims of both (no transpose)
    sim = lax.dot_general(_bf16(h2), _bf16(h2), (((1,), (1,)), ((), ())),
                          preferred_element_type=jnp.float32)                  # [n, n]
    sim = _softmax_fast(sim, axis=1)
    sim = jnp.dot(_bf16(sim), _bf16(h3), preferred_element_type=jnp.float32)   # [n, D]
    sim = _softmax_fast(sim, axis=1)
    cross = sim * h3 + h2 + h3

    # --- up GCN ---
    o_ref[...] = _gcn_core(g_ref[...], cross, wut_ref[...], bu_ref[...])


# --------------------------------- wrappers -----------------------------------

_VMEM = functools.partial(pl.BlockSpec, memory_space=pltpu.MemorySpace.VMEM)
_SMEM = functools.partial(pl.BlockSpec, memory_space=pltpu.MemorySpace.SMEM)


def down_level_first(g, h, Wt, b, Wp, bp, sigma1):
    n, d = h.shape
    hgcn, scores2d, hatt, ug2 = pl.pallas_call(
        _down_first_kernel,
        out_shape=(
            jax.ShapeDtypeStruct((n, d), jnp.float32),            # GCN output (down_outs)
            jax.ShapeDtypeStruct((n, SCORE_LANES), jnp.float32),   # lane-dense scores
            jax.ShapeDtypeStruct((n, d), jnp.float32),             # score-weighted feats
            jax.ShapeDtypeStruct((n, n), jnp.float32),             # 2-hop connectivity
        ),
        in_specs=[_VMEM()] * 5 + [_SMEM(), _SMEM()],
        out_specs=(_VMEM(),) * 4,
    )(g, h, Wt, b, Wp, bp, sigma1)
    return hgcn, scores2d[:, 0], hatt, ug2


def down_level_fused(idx, ug2_prev, hatt_prev, Wt, b, Wp, bp, sigma1):
    np_ = ug2_prev.shape[0]
    d = hatt_prev.shape[1]
    kk = idx.shape[0]
    idx2 = idx.reshape(1, kk).astype(jnp.int32)
    g_new, hgcn, scores2d, hatt, ug2 = pl.pallas_call(
        _down_fused_kernel,
        out_shape=(
            jax.ShapeDtypeStruct((kk, kk), jnp.float32),           # pooled adjacency (adj_ms)
            jax.ShapeDtypeStruct((kk, d), jnp.float32),
            jax.ShapeDtypeStruct((kk, SCORE_LANES), jnp.float32),
            jax.ShapeDtypeStruct((kk, d), jnp.float32),
            jax.ShapeDtypeStruct((kk, kk), jnp.float32),
        ),
        in_specs=[_SMEM(), _VMEM(), _VMEM(), _VMEM(), _VMEM(), _VMEM(), _VMEM(),
                  _SMEM(), _SMEM()],
        out_specs=(_VMEM(),) * 5,
        scratch_shapes=[pltpu.VMEM((kk, np_), jnp.float32)],
    )(idx2, idx2, ug2_prev, hatt_prev, Wt, b, Wp, bp, sigma1)
    return g_new, hgcn, scores2d[:, 0], hatt, ug2


def bottom_fused(idx, ug2_prev, hatt_prev, Wt, b):
    np_ = ug2_prev.shape[0]
    d = hatt_prev.shape[1]
    kk = idx.shape[0]
    idx2 = idx.reshape(1, kk).astype(jnp.int32)
    return pl.pallas_call(
        _bottom_fused_kernel,
        out_shape=jax.ShapeDtypeStruct((kk, d), jnp.float32),
        in_specs=[_SMEM(), _VMEM(), _VMEM(), _VMEM(), _VMEM(), _VMEM()],
        out_specs=_VMEM(),
        scratch_shapes=[pltpu.VMEM((kk, np_), jnp.float32)],
    )(idx2, idx2, ug2_prev, hatt_prev, Wt, b)


def up_level(g, h_small, pre_h, idx, Wct, bc, Wut, bu):
    n = g.shape[0]
    d = h_small.shape[1]
    kk = h_small.shape[0]
    idx2 = idx.reshape(1, kk).astype(jnp.int32)
    return pl.pallas_call(
        _up_kernel,
        out_shape=jax.ShapeDtypeStruct((n, d), jnp.float32),
        in_specs=[_SMEM()] + [_VMEM()] * 7,
        out_specs=_VMEM(),
        scratch_shapes=[pltpu.VMEM((n, d), jnp.float32)],
    )(idx2, g, h_small, pre_h, Wct, bc, Wut, bu)


# ------------------------------ GraphUnet forward ------------------------------

def graph_unet_forward(params, ks, g, h):
    # TODO(synk): lax.top_k stays in XLA (no Pallas sort on TPU); everything else
    # of top_k_graph (ug2 gather, a_hat@h_att, g_new gather + norm_g) is fused
    # into the next pallas_call via SMEM-resident indices.
    l_n = len(ks)
    adj_ms, indices_list, down_outs, hs = [], [], [], []
    org_h = h
    num_nodes = g.shape[0]

    hgcn, scores, hatt, ug2 = down_level_first(
        g, h, params["down_Wt"][0], params["down_b"][0],
        params["pool_W"][0], params["pool_b"][0], params["sigma1"][0])
    adj_ms.append(g)
    down_outs.append(hgcn)
    kk = max(2, int(ks[0] * num_nodes))
    _, idx = lax.top_k(scores, kk)
    indices_list.append(idx)
    num_nodes = kk

    for i in range(1, l_n):
        g_i, hgcn, scores, hatt, ug2 = down_level_fused(
            idx, ug2, hatt,
            params["down_Wt"][i], params["down_b"][i],
            params["pool_W"][i], params["pool_b"][i], params["sigma1"][i])
        adj_ms.append(g_i)
        down_outs.append(hgcn)
        kk = max(2, int(ks[i] * num_nodes))
        _, idx = lax.top_k(scores, kk)
        indices_list.append(idx)
        num_nodes = kk

    h = bottom_fused(idx, ug2, hatt, params["bottom_Wt"], params["bottom_b"])

    for i in range(l_n):
        up_idx = l_n - i - 1
        h = up_level(adj_ms[up_idx], h, down_outs[up_idx], indices_list[up_idx],
                     params["cnn_Wt"][i], params["cnn_b"][i],
                     params["up_Wt"][i], params["up_b"][i])

    h = h + org_h
    return h, hs, adj_ms[0]


# ----------------------------------- main --------------------------------------

def init_params(key, dim, l_n):
    # Weights are stored pre-transposed (W.T) and pre-cast to bf16 so the kernels
    # consume them directly as MXU operands with f32 accumulation; biases stay f32.
    def nrm(k, shape, scale=0.1):
        return (scale * jax.random.normal(k, shape)).astype(jnp.float32)

    keys = jax.random.split(key, 2 + 8 * l_n)
    it = iter(keys)
    params = {
        "bottom_Wt": nrm(next(it), (dim, dim)).T.astype(jnp.bfloat16),
        "bottom_b": nrm(next(it), (dim,)).reshape(1, dim),
        "down_Wt": [], "down_b": [],
        "up_Wt": [], "up_b": [],
        "pool_W": [], "pool_b": [],
        "cnn_Wt": [], "cnn_b": [],
        "sigma1": [],
    }
    for _ in range(l_n):
        params["down_Wt"].append(nrm(next(it), (dim, dim)).T.astype(jnp.bfloat16))
        params["down_b"].append(nrm(next(it), (dim,)).reshape(1, dim))
        params["up_Wt"].append(nrm(next(it), (dim, dim)).T.astype(jnp.bfloat16))
        params["up_b"].append(nrm(next(it), (dim,)).reshape(1, dim))
        params["pool_W"].append(nrm(next(it), (1, dim)))
        params["pool_b"].append(nrm(next(it), (1,)).reshape(1, 1))
        params["cnn_Wt"].append(nrm(next(it), (dim, dim)).T.astype(jnp.bfloat16))
        params["cnn_b"].append(nrm(next(it), (dim,)).reshape(1, dim))
        params["sigma1"].append(jnp.full((1, 1), 0.2, dtype=jnp.float32))
    return params


if __name__ == "__main__":
    N, DIM = 16, 32
    ks = (0.8, 0.5)          # pooled sizes: 16 -> 12 -> 6

    key = jax.random.PRNGKey(0)
    kg, kh, kp = jax.random.split(key, 3)

    # dense positive symmetric adjacency keeps all degree normalizations finite
    g = jax.random.uniform(kg, (N, N), dtype=jnp.float32, minval=0.05, maxval=1.0)
    g = 0.5 * (g + g.T)
    h = jax.random.normal(kh, (N, DIM), dtype=jnp.float32)

    params = init_params(kp, DIM, len(ks))

    fwd = jax.jit(graph_unet_forward, static_argnums=(1,))
    out_h, hs, out_g = fwd(params, ks, g, h)
    out_h = jax.block_until_ready(out_h)
    out_g = jax.block_until_ready(out_g)

    assert out_h.shape == (N, DIM) and out_g.shape == (N, N)
    assert bool(jnp.all(jnp.isfinite(out_h)))
    print("KERNEL_OK")
</pallas_src>

<mosaic_0001>
module attributes {stable_mosaic.version = 11 : i64} {
  func.func @_down_first_kernel(%arg0: memref<16x16xf32, #tpu.memory_space<vmem>>, %arg1: memref<16x32xf32, #tpu.memory_space<vmem>>, %arg2: memref<32x32xbf16, #tpu.memory_space<vmem>>, %arg3: memref<1x32xf32, #tpu.memory_space<vmem>>, %arg4: memref<1x32xf32, #tpu.memory_space<vmem>>, %arg5: memref<1x1xf32, #tpu.memory_space<smem>>, %arg6: memref<1x1xf32, #tpu.memory_space<smem>>, %arg7: memref<16x32xf32, #tpu.memory_space<vmem>>, %arg8: memref<16x128xf32, #tpu.memory_space<vmem>>, %arg9: memref<16x32xf32, #tpu.memory_space<vmem>>, %arg10: memref<16x16xf32, #tpu.memory_space<vmem>>) attributes {dimension_semantics = [], scalar_prefetch = 0 : i64, scratch_operands = 0 : i64, tpu.core_type = #tpu.core_type<tc>} {
    %c0 = arith.constant 0 : index
    %c0_0 = arith.constant 0 : index
    %0 = vector.load %arg0[%c0, %c0_0] : memref<16x16xf32, #tpu.memory_space<vmem>>, vector<16x16xf32>
    %c0_1 = arith.constant 0 : index
    %c0_2 = arith.constant 0 : index
    %1 = vector.load %arg1[%c0_1, %c0_2] : memref<16x32xf32, #tpu.memory_space<vmem>>, vector<16x32xf32>
    %c0_3 = arith.constant 0 : index
    %c0_4 = arith.constant 0 : index
    %2 = vector.load %arg2[%c0_3, %c0_4] : memref<32x32xbf16, #tpu.memory_space<vmem>>, vector<32x32xbf16>
    %c0_5 = arith.constant 0 : index
    %c0_6 = arith.constant 0 : index
    %3 = vector.load %arg3[%c0_5, %c0_6] : memref<1x32xf32, #tpu.memory_space<vmem>>, vector<1x32xf32>
    %cst = arith.constant dense<0.000000e+00> : vector<32xf32>
    %4 = vector.multi_reduction <add>, %1, %cst [0] : vector<16x32xf32> to vector<32xf32>
    %5 = vector.shape_cast %4 : vector<32xf32> to vector<1x32xf32>
    %cst_7 = arith.constant 1.600000e+01 : f32
    %6 = vector.broadcast %cst_7 : f32 to vector<1x32xf32>
    %7 = arith.divf %5, %6 : vector<1x32xf32>
    %8 = vector.broadcast %7 : vector<1x32xf32> to vector<16x32xf32>
    %9 = arith.subf %1, %8 : vector<16x32xf32>
    %10 = arith.mulf %9, %9 : vector<16x32xf32>
    %cst_8 = arith.constant dense<0.000000e+00> : vector<32xf32>
    %11 = vector.multi_reduction <add>, %10, %cst_8 [0] : vector<16x32xf32> to vector<32xf32>
    %12 = vector.shape_cast %11 : vector<32xf32> to vector<1x32xf32>
    %cst_9 = arith.constant 1.600000e+01 : f32
    %13 = vector.broadcast %cst_9 : f32 to vector<1x32xf32>
    %14 = arith.divf %12, %13 : vector<1x32xf32>
    %cst_10 = arith.constant 9.99999974E-6 : f32
    %15 = vector.broadcast %cst_10 : f32 to vector<1x32xf32>
    %16 = arith.addf %14, %15 : vector<1x32xf32>
    %17 = math.rsqrt %16 : vector<1x32xf32>
    %18 = vector.broadcast %17 : vector<1x32xf32> to vector<16x32xf32>
    %19 = arith.mulf %9, %18 : vector<16x32xf32>
    %20 = arith.truncf %19 : vector<16x32xf32> to vector<16x32xbf16>
    %cst_11 = arith.constant dense<0.000000e+00> : vector<16x32xf32>
    %21 = tpu.matmul %20, %2, %cst_11 {dimension_numbers = #tpu.dot_dimension_numbers<[1], [0], [0], [1], [0, 0, 1, 1], [], []>} : vector<16x32xbf16>, vector<32x32xbf16>, vector<16x32xf32> -> vector<16x32xf32>
    %22 = vector.broadcast %3 : vector<1x32xf32> to vector<16x32xf32>
    %23 = arith.addf %21, %22 : vector<16x32xf32>
    %cst_12 = arith.constant dense<0.000000e+00> : vector<16xf32>
    %24 = vector.multi_reduction <add>, %0, %cst_12 [1] : vector<16x16xf32> to vector<16xf32>
    %25 = vector.shape_cast %24 : vector<16xf32> to vector<16x1xf32>
    %cst_13 = arith.constant 1.000000e+00 : f32
    %26 = vector.broadcast %cst_13 : f32 to vector<16x1xf32>
    %27 = arith.addf %25, %26 : vector<16x1xf32>
    %28 = math.rsqrt %27 : vector<16x1xf32>
    %29 = arith.truncf %0 : vector<16x16xf32> to vector<16x16xbf16>
    %30 = vector.broadcast %28 : vector<16x1xf32> to vector<16x32xf32>
    %31 = arith.mulf %30, %23 : vector<16x32xf32>
    %32 = arith.truncf %31 : vector<16x32xf32> to vector<16x32xbf16>
    %cst_14 = arith.constant dense<0.000000e+00> : vector<16x32xf32>
    %33 = tpu.matmul %29, %32, %cst_14 {dimension_numbers = #tpu.dot_dimension_numbers<[1], [0], [0], [1], [0, 0, 1, 1], [], []>} : vector<16x16xbf16>, vector<16x32xbf16>, vector<16x32xf32> -> vector<16x32xf32>
    %34 = vector.broadcast %28 : vector<16x1xf32> to vector<16x32xf32>
    %35 = arith.mulf %34, %33 : vector<16x32xf32>
    %36 = arith.mulf %28, %28 : vector<16x1xf32>
    %37 = vector.broadcast %36 : vector<16x1xf32> to vector<16x32xf32>
    %38 = arith.mulf %37, %23 : vector<16x32xf32>
    %39 = arith.addf %35, %38 : vector<16x32xf32>
    %cst_15 = arith.constant 0.000000e+00 : f32
    %40 = vector.broadcast %cst_15 : f32 to vector<16x32xf32>
    %41 = arith.cmpf oge, %39, %40 : vector<16x32xf32>
    %cst_16 = arith.constant 0.00999999977 : f32
    %42 = vector.broadcast %cst_16 : f32 to vector<16x32xf32>
    %43 = arith.mulf %42, %39 : vector<16x32xf32>
    %44 = arith.select %41, %39, %43 : vector<16x32xi1>, vector<16x32xf32>
    %c0_17 = arith.constant 0 : index
    %c0_18 = arith.constant 0 : index
    %45 = vector.load %arg7[%c0_17, %c0_18] : memref<16x32xf32, #tpu.memory_space<vmem>>, vector<16x32xf32>
    tpu.vector_store %arg7[%c0_17, %c0_18], %44 {strides = array<i32>} : memref<16x32xf32, #tpu.memory_space<vmem>>, vector<16x32xf32>,
    %c0_19 = arith.constant 0 : index
    %c0_20 = arith.constant 0 : index
    %46 = vector.load %arg4[%c0_19, %c0_20] : memref<1x32xf32, #tpu.memory_space<vmem>>, vector<1x32xf32>
    %c0_21 = arith.constant 0 : index
    %c0_22 = arith.constant 0 : index
    %47 = memref.load %arg5[%c0_21, %c0_22] : memref<1x1xf32, #tpu.memory_space<smem>>
    %c0_23 = arith.constant 0 : index
    %c0_24 = arith.constant 0 : index
    %48 = memref.load %arg6[%c0_23, %c0_24] : memref<1x1xf32, #tpu.memory_space<smem>>
    %cst_25 = arith.constant dense<0.000000e+00> : vector<32xf32>
    %49 = vector.multi_reduction <add>, %44, %cst_25 [0] : vector<16x32xf32> to vector<32xf32>
    %50 = vector.shape_cast %49 : vector<32xf32> to vector<1x32xf32>
    %cst_26 = arith.constant 1.600000e+01 : f32
    %51 = vector.broadcast %cst_26 : f32 to vector<1x32xf32>
    %52 = arith.divf %50, %51 : vector<1x32xf32>
    %53 = vector.broadcast %52 : vector<1x32xf32> to vector<16x32xf32>
    %54 = arith.subf %44, %53 : vector<16x32xf32>
    %55 = arith.mulf %54, %54 : vector<16x32xf32>
    %cst_27 = arith.constant dense<0.000000e+00> : vector<32xf32>
    %56 = vector.multi_reduction <add>, %55, %cst_27 [0] : vector<16x32xf32> to vector<32xf32>
    %57 = vector.shape_cast %56 : vector<32xf32> to vector<1x32xf32>
    %cst_28 = arith.constant 1.600000e+01 : f32
    %58 = vector.broadcast %cst_28 : f32 to vector<1x32xf32>
    %59 = arith.divf %57, %58 : vector<1x32xf32>
    %cst_29 = arith.constant 9.99999974E-6 : f32
    %60 = vector.broadcast %cst_29 : f32 to vector<1x32xf32>
    %61 = arith.addf %59, %60 : vector<1x32xf32>
    %62 = math.rsqrt %61 : vector<1x32xf32>
    %63 = vector.broadcast %62 : vector<1x32xf32> to vector<16x32xf32>
    %64 = arith.mulf %54, %63 : vector<16x32xf32>
    %cst_30 = arith.constant dense<0.000000e+00> : vector<16xf32>
    %65 = vector.multi_reduction <add>, %0, %cst_30 [1] : vector<16x16xf32> to vector<16xf32>
    %66 = vector.shape_cast %65 : vector<16xf32> to vector<16x1xf32>
    %67 = arith.truncf %0 : vector<16x16xf32> to vector<16x16xbf16>
    %68 = arith.truncf %64 : vector<16x32xf32> to vector<16x32xbf16>
    %cst_31 = arith.constant dense<0.000000e+00> : vector<16x32xf32>
    %69 = tpu.matmul %67, %68, %cst_31 {dimension_numbers = #tpu.dot_dimension_numbers<[1], [0], [0], [1], [0, 0, 1, 1], [], []>} : vector<16x16xbf16>, vector<16x32xbf16>, vector<16x32xf32> -> vector<16x32xf32>
    %70 = vector.broadcast %66 : vector<16x1xf32> to vector<16x32xf32>
    %71 = arith.divf %69, %70 : vector<16x32xf32>
    %72 = arith.subf %64, %71 : vector<16x32xf32>
    %73 = math.absf %72 : vector<16x32xf32>
    %cst_32 = arith.constant dense<0.000000e+00> : vector<16xf32>
    %74 = vector.multi_reduction <add>, %73, %cst_32 [1] : vector<16x32xf32> to vector<16xf32>
    %75 = vector.shape_cast %74 : vector<16xf32> to vector<16x1xf32>
    %76 = arith.addf %75, %66 : vector<16x1xf32>
    %cst_33 = arith.constant 5.000000e-01 : f32
    %77 = vector.broadcast %cst_33 : f32 to vector<16x1xf32>
    %78 = arith.mulf %77, %76 : vector<16x1xf32>
    %79 = math.tanh %78 : vector<16x1xf32>
    %cst_34 = arith.constant 5.000000e-01 : f32
    %80 = vector.broadcast %cst_34 : f32 to vector<16x1xf32>
    %81 = arith.mulf %80, %79 : vector<16x1xf32>
    %cst_35 = arith.constant 5.000000e-01 : f32
    %82 = vector.broadcast %cst_35 : f32 to vector<16x1xf32>
    %83 = arith.addf %81, %82 : vector<16x1xf32>
    %84 = vector.broadcast %46 : vector<1x32xf32> to vector<16x32xf32>
    %85 = arith.mulf %71, %84 : vector<16x32xf32>
    %cst_36 = arith.constant dense<0.000000e+00> : vector<16xf32>
    %86 = vector.multi_reduction <add>, %85, %cst_36 [1] : vector<16x32xf32> to vector<16xf32>
    %87 = vector.shape_cast %86 : vector<16xf32> to vector<16x1xf32>
    %88 = vector.broadcast %47 : f32 to vector<16x1xf32>
    %89 = arith.addf %87, %88 : vector<16x1xf32>
    %cst_37 = arith.constant dense<0xFF800000> : vector<1xf32>
    %90 = vector.multi_reduction <maximumf>, %89, %cst_37 [0] : vector<16x1xf32> to vector<1xf32>
    %91 = vector.shape_cast %90 : vector<1xf32> to vector<1x1xf32>
    %92 = vector.broadcast %91 : vector<1x1xf32> to vector<16x1xf32>
    %93 = arith.subf %89, %92 : vector<16x1xf32>
    %94 = math.exp %93 : vector<16x1xf32>
    %cst_38 = arith.constant dense<0.000000e+00> : vector<1xf32>
    %95 = vector.multi_reduction <add>, %94, %cst_38 [0] : vector<16x1xf32> to vector<1xf32>
    %96 = vector.shape_cast %95 : vector<1xf32> to vector<1x1xf32>
    %97 = vector.broadcast %96 : vector<1x1xf32> to vector<16x1xf32>
    %98 = arith.divf %94, %97 : vector<16x1xf32>
    %99 = arith.addf %83, %98 : vector<16x1xf32>
    %cst_39 = arith.constant 5.000000e-01 : f32
    %100 = vector.broadcast %cst_39 : f32 to vector<16x1xf32>
    %101 = arith.mulf %100, %99 : vector<16x1xf32>
    %102 = math.tanh %101 : vector<16x1xf32>
    %cst_40 = arith.constant 5.000000e-01 : f32
    %103 = vector.broadcast %cst_40 : f32 to vector<16x1xf32>
    %104 = arith.mulf %103, %102 : vector<16x1xf32>
    %cst_41 = arith.constant 5.000000e-01 : f32
    %105 = vector.broadcast %cst_41 : f32 to vector<16x1xf32>
    %106 = arith.addf %104, %105 : vector<16x1xf32>
    %107 = vector.broadcast %46 : vector<1x32xf32> to vector<16x32xf32>
    %108 = arith.mulf %64, %107 : vector<16x32xf32>
    %cst_42 = arith.constant dense<0.000000e+00> : vector<16xf32>
    %109 = vector.multi_reduction <add>, %108, %cst_42 [1] : vector<16x32xf32> to vector<16xf32>
    %110 = vector.shape_cast %109 : vector<16xf32> to vector<16x1xf32>
    %111 = vector.broadcast %47 : f32 to vector<16x1xf32>
    %112 = arith.addf %110, %111 : vector<16x1xf32>
    %cst_43 = arith.constant 5.000000e-01 : f32
    %113 = vector.broadcast %cst_43 : f32 to vector<16x1xf32>
    %114 = arith.mulf %113, %112 : vector<16x1xf32>
    %115 = math.tanh %114 : vector<16x1xf32>
    %cst_44 = arith.constant 5.000000e-01 : f32
    %116 = vector.broadcast %cst_44 : f32 to vector<16x1xf32>
    %117 = arith.mulf %116, %115 : vector<16x1xf32>
    %cst_45 = arith.constant 5.000000e-01 : f32
    %118 = vector.broadcast %cst_45 : f32 to vector<16x1xf32>
    %119 = arith.addf %117, %118 : vector<16x1xf32>
    %120 = vector.broadcast %48 : f32 to vector<16x1xf32>
    %121 = arith.mulf %120, %106 : vector<16x1xf32>
    %cst_46 = arith.constant 1.000000e+00 : f32
    %122 = arith.subf %cst_46, %48 : f32
    %123 = vector.broadcast %122 : f32 to vector<16x1xf32>
    %124 = arith.mulf %123, %119 : vector<16x1xf32>
    %125 = arith.addf %121, %124 : vector<16x1xf32>
    %126 = vector.broadcast %125 : vector<16x1xf32> to vector<16x32xf32>
    %127 = arith.mulf %126, %64 : vector<16x32xf32>
    %cst_47 = arith.constant 0.000000e+00 : f32
    %128 = vector.broadcast %cst_47 : f32 to vector<16x16xf32>
    %129 = arith.cmpf one, %0, %128 : vector<16x16xf32>
    %130 = arith.extui %129 : vector<16x16xi1> to vector<16x16xi32>
    %131 = arith.sitofp %130 : vector<16x16xi32> to vector<16x16xf32>
    %132 = arith.truncf %131 : vector<16x16xf32> to vector<16x16xbf16>
    %cst_48 = arith.constant dense<0.000000e+00> : vector<16x16xf32>
    %133 = tpu.matmul %132, %132, %cst_48 {dimension_numbers = #tpu.dot_dimension_numbers<[1], [0], [0], [1], [0, 0, 1, 1], [], []>} : vector<16x16xbf16>, vector<16x16xbf16>, vector<16x16xf32> -> vector<16x16xf32>
    %cst_49 = arith.constant 0.000000e+00 : f32
    %134 = vector.broadcast %cst_49 : f32 to vector<16x16xf32>
    %135 = arith.cmpf one, %133, %134 : vector<16x16xf32>
    %136 = arith.extui %135 : vector<16x16xi1> to vector<16x16xi32>
    %137 = arith.sitofp %136 : vector<16x16xi32> to vector<16x16xf32>
    %c0_50 = arith.constant 0 : index
    %c0_51 = arith.constant 0 : index
    %138 = vector.load %arg9[%c0_50, %c0_51] : memref<16x32xf32, #tpu.memory_space<vmem>>, vector<16x32xf32>
    tpu.vector_store %arg9[%c0_50, %c0_51], %127 {strides = array<i32>} : memref<16x32xf32, #tpu.memory_space<vmem>>, vector<16x32xf32>,
    %c0_52 = arith.constant 0 : index
    %c0_53 = arith.constant 0 : index
    %139 = vector.load %arg10[%c0_52, %c0_53] : memref<16x16xf32, #tpu.memory_space<vmem>>, vector<16x16xf32>
    tpu.vector_store %arg10[%c0_52, %c0_53], %137 {strides = array<i32>} : memref<16x16xf32, #tpu.memory_space<vmem>>, vector<16x16xf32>,
    %140 = vector.shape_cast %125 : vector<16x1xf32> to vector<16x1xf32>
    %141 = vector.broadcast %140 : vector<16x1xf32> to vector<16x128xf32>
    %c0_54 = arith.constant 0 : index
    %c0_55 = arith.constant 0 : index
    %142 = vector.load %arg8[%c0_54, %c0_55] : memref<16x128xf32, #tpu.memory_space<vmem>>, vector<16x128xf32>
    tpu.vector_store %arg8[%c0_54, %c0_55], %141 {strides = array<i32>} : memref<16x128xf32, #tpu.memory_space<vmem>>, vector<16x128xf32>,
    return
  }
}

module attributes {stable_mosaic.version = 11 : i64} {
  func.func @_down_fused_kernel(%arg0: memref<1x12xi32, #tpu.memory_space<smem>>, %arg1: memref<1x12xi32, #tpu.memory_space<vmem>>, %arg2: memref<16x16xf32, #tpu.memory_space<vmem>>, %arg3: memref<16x32xf32, #tpu.memory_space<vmem>>, %arg4: memref<32x32xbf16, #tpu.memory_space<vmem>>, %arg5: memref<1x32xf32, #tpu.memory_space<vmem>>, %arg6: memref<1x32xf32, #tpu.memory_space<vmem>>, %arg7: memref<1x1xf32, #tpu.memory_space<smem>>, %arg8: memref<1x1xf32, #tpu.memory_space<smem>>, %arg9: memref<12x12xf32, #tpu.memory_space<vmem>>, %arg10: memref<12x32xf32, #tpu.memory_space<vmem>>, %arg11: memref<12x128xf32, #tpu.memory_space<vmem>>, %arg12: memref<12x32xf32, #tpu.memory_space<vmem>>, %arg13: memref<12x12xf32, #tpu.memory_space<vmem>>, %arg14: memref<12x16xf32, #tpu.memory_space<vmem>>) attributes {dimension_semantics = [], scalar_prefetch = 0 : i64, scratch_operands = 1 : i64, tpu.core_type = #tpu.core_type<tc>} {
    %c0 = arith.constant 0 : index
    %c0_0 = arith.constant 0 : index
    %0 = memref.load %arg0[%c0, %c0_0] : memref<1x12xi32, #tpu.memory_space<smem>>
    %1 = arith.index_cast %0 : i32 to index
    %c0_1 = arith.constant 0 : index
    %2 = vector.load %arg2[%1, %c0_1] : memref<16x16xf32, #tpu.memory_space<vmem>>, vector<1x16xf32>
    %c0_2 = arith.constant 0 : index
    %c0_3 = arith.constant 0 : index
    %3 = vector.load %arg14[%c0_2, %c0_3] : memref<12x16xf32, #tpu.memory_space<vmem>>, vector<1x16xf32>
    tpu.vector_store %arg14[%c0_2, %c0_3], %2 {strides = array<i32>} : memref<12x16xf32, #tpu.memory_space<vmem>>, vector<1x16xf32>,
    %c0_4 = arith.constant 0 : index
    %c1 = arith.constant 1 : index
    %4 = memref.load %arg0[%c0_4, %c1] : memref<1x12xi32, #tpu.memory_space<smem>>
    %5 = arith.index_cast %4 : i32 to index
    %c0_5 = arith.constant 0 : index
    %6 = vector.load %arg2[%5, %c0_5] : memref<16x16xf32, #tpu.memory_space<vmem>>, vector<1x16xf32>
    %c1_6 = arith.constant 1 : index
    %c0_7 = arith.constant 0 : index
    %7 = vector.load %arg14[%c1_6, %c0_7] : memref<12x16xf32, #tpu.memory_space<vmem>>, vector<1x16xf32>
    tpu.vector_store %arg14[%c1_6, %c0_7], %6 {strides = array<i32>} : memref<12x16xf32, #tpu.memory_space<vmem>>, vector<1x16xf32>,
    %c0_8 = arith.constant 0 : index
    %c2 = arith.constant 2 : index
    %8 = memref.load %arg0[%c0_8, %c2] : memref<1x12xi32, #tpu.memory_space<smem>>
    %9 = arith.index_cast %8 : i32 to index
    %c0_9 = arith.constant 0 : index
    %10 = vector.load %arg2[%9, %c0_9] : memref<16x16xf32, #tpu.memory_space<vmem>>, vector<1x16xf32>
    %c2_10 = arith.constant 2 : index
    %c0_11 = arith.constant 0 : index
    %11 = vector.load %arg14[%c2_10, %c0_11] : memref<12x16xf32, #tpu.memory_space<vmem>>, vector<1x16xf32>
    tpu.vector_store %arg14[%c2_10, %c0_11], %10 {strides = array<i32>} : memref<12x16xf32, #tpu.memory_space<vmem>>, vector<1x16xf32>,
    %c0_12 = arith.constant 0 : index
    %c3 = arith.constant 3 : index
    %12 = memref.load %arg0[%c0_12, %c3] : memref<1x12xi32, #tpu.memory_space<smem>>
    %13 = arith.index_cast %12 : i32 to index
    %c0_13 = arith.constant 0 : index
    %14 = vector.load %arg2[%13, %c0_13] : memref<16x16xf32, #tpu.memory_space<vmem>>, vector<1x16xf32>
    %c3_14 = arith.constant 3 : index
    %c0_15 = arith.constant 0 : index
    %15 = vector.load %arg14[%c3_14, %c0_15] : memref<12x16xf32, #tpu.memory_space<vmem>>, vector<1x16xf32>
    tpu.vector_store %arg14[%c3_14, %c0_15], %14 {strides = array<i32>} : memref<12x16xf32, #tpu.memory_space<vmem>>, vector<1x16xf32>,
    %c0_16 = arith.constant 0 : index
    %c4 = arith.constant 4 : index
    %16 = memref.load %arg0[%c0_16, %c4] : memref<1x12xi32, #tpu.memory_space<smem>>
    %17 = arith.index_cast %16 : i32 to index
    %c0_17 = arith.constant 0 : index
    %18 = vector.load %arg2[%17, %c0_17] : memref<16x16xf32, #tpu.memory_space<vmem>>, vector<1x16xf32>
    %c4_18 = arith.constant 4 : index
    %c0_19 = arith.constant 0 : index
    %19 = vector.load %arg14[%c4_18, %c0_19] : memref<12x16xf32, #tpu.memory_space<vmem>>, vector<1x16xf32>
    tpu.vector_store %arg14[%c4_18, %c0_19], %18 {strides = array<i32>} : memref<12x16xf32, #tpu.memory_space<vmem>>, vector<1x16xf32>,
    %c0_20 = arith.constant 0 : index
    %c5 = arith.constant 5 : index
    %20 = memref.load %arg0[%c0_20, %c5] : memref<1x12xi32, #tpu.memory_space<smem>>
    %21 = arith.index_cast %20 : i32 to index
    %c0_21 = arith.constant 0 : index
    %22 = vector.load %arg2[%21, %c0_21] : memref<16x16xf32, #tpu.memory_space<vmem>>, vector<1x16xf32>
    %c5_22 = arith.constant 5 : index
    %c0_23 = arith.constant 0 : index
    %23 = vector.load %arg14[%c5_22, %c0_23] : memref<12x16xf32, #tpu.memory_space<vmem>>, vector<1x16xf32>
    tpu.vector_store %arg14[%c5_22, %c0_23], %22 {strides = array<i32>} : memref<12x16xf32, #tpu.memory_space<vmem>>, vector<1x16xf32>,
    %c0_24 = arith.constant 0 : index
    %c6 = arith.constant 6 : index
    %24 = memref.load %arg0[%c0_24, %c6] : memref<1x12xi32, #tpu.memory_space<smem>>
    %25 = arith.index_cast %24 : i32 to index
    %c0_25 = arith.constant 0 : index
    %26 = vector.load %arg2[%25, %c0_25] : memref<16x16xf32, #tpu.memory_space<vmem>>, vector<1x16xf32>
    %c6_26 = arith.constant 6 : index
    %c0_27 = arith.constant 0 : index
    %27 = vector.load %arg14[%c6_26, %c0_27] : memref<12x16xf32, #tpu.memory_space<vmem>>, vector<1x16xf32>
    tpu.vector_store %arg14[%c6_26, %c0_27], %26 {strides = array<i32>} : memref<12x16xf32, #tpu.memory_space<vmem>>, vector<1x16xf32>,
    %c0_28 = arith.constant 0 : index
    %c7 = arith.constant 7 : index
    %28 = memref.load %arg0[%c0_28, %c7] : memref<1x12xi32, #tpu.memory_space<smem>>
    %29 = arith.index_cast %28 : i32 to index
    %c0_29 = arith.constant 0 : index
    %30 = vector.load %arg2[%29, %c0_29] : memref<16x16xf32, #tpu.memory_space<vmem>>, vector<1x16xf32>
    %c7_30 = arith.constant 7 : index
    %c0_31 = arith.constant 0 : index
    %31 = vector.load %arg14[%c7_30, %c0_31] : memref<12x16xf32, #tpu.memory_space<vmem>>, vector<1x16xf32>
    tpu.vector_store %arg14[%c7_30, %c0_31], %30 {strides = array<i32>} : memref<12x16xf32, #tpu.memory_space<vmem>>, vector<1x16xf32>,
    %c0_32 = arith.constant 0 : index
    %c8 = arith.constant 8 : index
    %32 = memref.load %arg0[%c0_32, %c8] : memref<1x12xi32, #tpu.memory_space<smem>>
    %33 = arith.index_cast %32 : i32 to index
    %c0_33 = arith.constant 0 : index
    %34 = vector.load %arg2[%33, %c0_33] : memref<16x16xf32, #tpu.memory_space<vmem>>, vector<1x16xf32>
    %c8_34 = arith.constant 8 : index
    %c0_35 = arith.constant 0 : index
    %35 = vector.load %arg14[%c8_34, %c0_35] : memref<12x16xf32, #tpu.memory_space<vmem>>, vector<1x16xf32>
    tpu.vector_store %arg14[%c8_34, %c0_35], %34 {strides = array<i32>} : memref<12x16xf32, #tpu.memory_space<vmem>>, vector<1x16xf32>,
    %c0_36 = arith.constant 0 : index
    %c9 = arith.constant 9 : index
    %36 = memref.load %arg0[%c0_36, %c9] : memref<1x12xi32, #tpu.memory_space<smem>>
    %37 = arith.index_cast %36 : i32 to index
    %c0_37 = arith.constant 0 : index
    %38 = vector.load %arg2[%37, %c0_37] : memref<16x16xf32, #tpu.memory_space<vmem>>, vector<1x16xf32>
    %c9_38 = arith.constant 9 : index
    %c0_39 = arith.constant 0 : index
    %39 = vector.load %arg14[%c9_38, %c0_39] : memref<12x16xf32, #tpu.memory_space<vmem>>, vector<1x16xf32>
    tpu.vector_store %arg14[%c9_38, %c0_39], %38 {strides = array<i32>} : memref<12x16xf32, #tpu.memory_space<vmem>>, vector<1x16xf32>,
    %c0_40 = arith.constant 0 : index
    %c10 = arith.constant 10 : index
    %40 = memref.load %arg0[%c0_40, %c10] : memref<1x12xi32, #tpu.memory_space<smem>>
    %41 = arith.index_cast %40 : i32 to index
    %c0_41 = arith.constant 0 : index
    %42 = vector.load %arg2[%41, %c0_41] : memref<16x16xf32, #tpu.memory_space<vmem>>, vector<1x16xf32>
    %c10_42 = arith.constant 10 : index
    %c0_43 = arith.constant 0 : index
    %43 = vector.load %arg14[%c10_42, %c0_43] : memref<12x16xf32, #tpu.memory_space<vmem>>, vector<1x16xf32>
    tpu.vector_store %arg14[%c10_42, %c0_43], %42 {strides = array<i32>} : memref<12x16xf32, #tpu.memory_space<vmem>>, vector<1x16xf32>,
    %c0_44 = arith.constant 0 : index
    %c11 = arith.constant 11 : index
    %44 = memref.load %arg0[%c0_44, %c11] : memref<1x12xi32, #tpu.memory_space<smem>>
    %45 = arith.index_cast %44 : i32 to index
    %c0_45 = arith.constant 0 : index
    %46 = vector.load %arg2[%45, %c0_45] : memref<16x16xf32, #tpu.memory_space<vmem>>, vector<1x16xf32>
    %c11_46 = arith.constant 11 : index
    %c0_47 = arith.constant 0 : index
    %47 = vector.load %arg14[%c11_46, %c0_47] : memref<12x16xf32, #tpu.memory_space<vmem>>, vector<1x16xf32>
    tpu.vector_store %arg14[%c11_46, %c0_47], %46 {strides = array<i32>} : memref<12x16xf32, #tpu.memory_space<vmem>>, vector<1x16xf32>,
    %c0_48 = arith.constant 0 : index
    %c0_49 = arith.constant 0 : index
    %48 = vector.load %arg14[%c0_48, %c0_49] : memref<12x16xf32, #tpu.memory_space<vmem>>, vector<12x16xf32>
    %49 = arith.truncf %48 : vector<12x16xf32> to vector<12x16xbf16>
    %c0_50 = arith.constant 0 : index
    %c0_51 = arith.constant 0 : index
    %50 = vector.load %arg3[%c0_50, %c0_51] : memref<16x32xf32, #tpu.memory_space<vmem>>, vector<16x32xf32>
    %51 = arith.truncf %50 : vector<16x32xf32> to vector<16x32xbf16>
    %cst = arith.constant dense<0.000000e+00> : vector<12x32xf32>
    %52 = tpu.matmul %49, %51, %cst {dimension_numbers = #tpu.dot_dimension_numbers<[1], [0], [0], [1], [0, 0, 1, 1], [], []>} : vector<12x16xbf16>, vector<16x32xbf16>, vector<12x32xf32> -> vector<12x32xf32>
    %53 = tpu.iota {dimensions = array<i32: 0>} : vector<16x12xi32>
    %c0_52 = arith.constant 0 : index
    %c0_53 = arith.constant 0 : index
    %54 = vector.load %arg1[%c0_52, %c0_53] : memref<1x12xi32, #tpu.memory_space<vmem>>, vector<1x12xi32>
    %55 = vector.broadcast %54 : vector<1x12xi32> to vector<16x12xi32>
    %56 = arith.cmpi eq, %53, %55 : vector<16x12xi32>
    %57 = arith.extui %56 : vector<16x12xi1> to vector<16x12xi32>
    %58 = arith.sitofp %57 : vector<16x12xi32> to vector<16x12xf32>
    %59 = arith.truncf %58 : vector<16x12xf32> to vector<16x12xbf16>
    %cst_54 = arith.constant dense<0.000000e+00> : vector<12x12xf32>
    %60 = tpu.matmul %49, %59, %cst_54 {dimension_numbers = #tpu.dot_dimension_numbers<[1], [0], [0], [1], [0, 0, 1, 1], [], []>} : vector<12x16xbf16>, vector<16x12xbf16>, vector<12x12xf32> -> vector<12x12xf32>
    %cst_55 = arith.constant 1.000000e+00 : bf16
    %61 = vector.broadcast %cst_55 : bf16 to vector<1x12xbf16>
    %62 = arith.truncf %60 : vector<12x12xf32> to vector<12x12xbf16>
    %cst_56 = arith.constant dense<0.000000e+00> : vector<1x12xf32>
    %63 = tpu.matmul %61, %62, %cst_56 {dimension_numbers = #tpu.dot_dimension_numbers<[1], [1], [0], [0], [0, 0, 1, 0], [], []>} : vector<1x12xbf16>, vector<12x12xbf16>, vector<1x12xf32> -> vector<1x12xf32>
    %64 = vector.broadcast %63 : vector<1x12xf32> to vector<12x12xf32>
    %65 = arith.divf %60, %64 : vector<12x12xf32>
    %c0_57 = arith.constant 0 : index
    %c0_58 = arith.constant 0 : index
    %66 = vector.load %arg9[%c0_57, %c0_58] : memref<12x12xf32, #tpu.memory_space<vmem>>, vector<12x12xf32>
    tpu.vector_store %arg9[%c0_57, %c0_58], %65 {strides = array<i32>} : memref<12x12xf32, #tpu.memory_space<vmem>>, vector<12x12xf32>,
    %c0_59 = arith.constant 0 : index
    %c0_60 = arith.constant 0 : index
    %67 = vector.load %arg4[%c0_59, %c0_60] : memref<32x32xbf16, #tpu.memory_space<vmem>>, vector<32x32xbf16>
    %c0_61 = arith.constant 0 : index
    %c0_62 = arith.constant 0 : index
    %68 = vector.load %arg5[%c0_61, %c0_62] : memref<1x32xf32, #tpu.memory_space<vmem>>, vector<1x32xf32>
    %cst_63 = arith.constant dense<0.000000e+00> : vector<32xf32>
    %69 = vector.multi_reduction <add>, %52, %cst_63 [0] : vector<12x32xf32> to vector<32xf32>
    %70 = vector.shape_cast %69 : vector<32xf32> to vector<1x32xf32>
    %cst_64 = arith.constant 1.200000e+01 : f32
    %71 = vector.broadcast %cst_64 : f32 to vector<1x32xf32>
    %72 = arith.divf %70, %71 : vector<1x32xf32>
    %73 = vector.broadcast %72 : vector<1x32xf32> to vector<12x32xf32>
    %74 = arith.subf %52, %73 : vector<12x32xf32>
    %75 = arith.mulf %74, %74 : vector<12x32xf32>
    %cst_65 = arith.constant dense<0.000000e+00> : vector<32xf32>
    %76 = vector.multi_reduction <add>, %75, %cst_65 [0] : vector<12x32xf32> to vector<32xf32>
    %77 = vector.shape_cast %76 : vector<32xf32> to vector<1x32xf32>
    %cst_66 = arith.constant 1.200000e+01 : f32
    %78 = vector.broadcast %cst_66 : f32 to vector<1x32xf32>
    %79 = arith.divf %77, %78 : vector<1x32xf32>
    %cst_67 = arith.constant 9.99999974E-6 : f32
    %80 = vector.broadcast %cst_67 : f32 to vector<1x32xf32>
    %81 = arith.addf %79, %80 : vector<1x32xf32>
    %82 = math.rsqrt %81 : vector<1x32xf32>
    %83 = vector.broadcast %82 : vector<1x32xf32> to vector<12x32xf32>
    %84 = arith.mulf %74, %83 : vector<12x32xf32>
    %85 = arith.truncf %84 : vector<12x32xf32> to vector<12x32xbf16>
    %cst_68 = arith.constant dense<0.000000e+00> : vector<12x32xf32>
    %86 = tpu.matmul %85, %67, %cst_68 {dimension_numbers = #tpu.dot_dimension_numbers<[1], [0], [0], [1], [0, 0, 1, 1], [], []>} : vector<12x32xbf16>, vector<32x32xbf16>, vector<12x32xf32> -> vector<12x32xf32>
    %87 = vector.broadcast %68 : vector<1x32xf32> to vector<12x32xf32>
    %88 = arith.addf %86, %87 : vector<12x32xf32>
    %cst_69 = arith.constant dense<0.000000e+00> : vector<12xf32>
    %89 = vector.multi_reduction <add>, %65, %cst_69 [1] : vector<12x12xf32> to vector<12xf32>
    %90 = vector.shape_cast %89 : vector<12xf32> to vector<12x1xf32>
    %cst_70 = arith.constant 1.000000e+00 : f32
    %91 = vector.broadcast %cst_70 : f32 to vector<12x1xf32>
    %92 = arith.addf %90, %91 : vector<12x1xf32>
    %93 = math.rsqrt %92 : vector<12x1xf32>
    %94 = arith.truncf %65 : vector<12x12xf32> to vector<12x12xbf16>
    %95 = vector.broadcast %93 : vector<12x1xf32> to vector<12x32xf32>
    %96 = arith.mulf %95, %88 : vector<12x32xf32>
    %97 = arith.truncf %96 : vector<12x32xf32> to vector<12x32xbf16>
    %cst_71 = arith.constant dense<0.000000e+00> : vector<12x32xf32>
    %98 = tpu.matmul %94, %97, %cst_71 {dimension_numbers = #tpu.dot_dimension_numbers<[1], [0], [0], [1], [0, 0, 1, 1], [], []>} : vector<12x12xbf16>, vector<12x32xbf16>, vector<12x32xf32> -> vector<12x32xf32>
    %99 = vector.broadcast %93 : vector<12x1xf32> to vector<12x32xf32>
    %100 = arith.mulf %99, %98 : vector<12x32xf32>
    %101 = arith.mulf %93, %93 : vector<12x1xf32>
    %102 = vector.broadcast %101 : vector<12x1xf32> to vector<12x32xf32>
    %103 = arith.mulf %102, %88 : vector<12x32xf32>
    %104 = arith.addf %100, %103 : vector<12x32xf32>
    %cst_72 = arith.constant 0.000000e+00 : f32
    %105 = vector.broadcast %cst_72 : f32 to vector<12x32xf32>
    %106 = arith.cmpf oge, %104, %105 : vector<12x32xf32>
    %cst_73 = arith.constant 0.00999999977 : f32
    %107 = vector.broadcast %cst_73 : f32 to vector<12x32xf32>
    %108 = arith.mulf %107, %104 : vector<12x32xf32>
    %109 = arith.select %106, %104, %108 : vector<12x32xi1>, vector<12x32xf32>
    %c0_74 = arith.constant 0 : index
    %c0_75 = arith.constant 0 : index
    %110 = vector.load %arg10[%c0_74, %c0_75] : memref<12x32xf32, #tpu.memory_space<vmem>>, vector<12x32xf32>
    tpu.vector_store %arg10[%c0_74, %c0_75], %109 {strides = array<i32>} : memref<12x32xf32, #tpu.memory_space<vmem>>, vector<12x32xf32>,
    %c0_76 = arith.constant 0 : index
    %c0_77 = arith.constant 0 : index
    %111 = vector.load %arg6[%c0_76, %c0_77] : memref<1x32xf32, #tpu.memory_space<vmem>>, vector<1x32xf32>
    %c0_78 = arith.constant 0 : index
    %c0_79 = arith.constant 0 : index
    %112 = memref.load %arg7[%c0_78, %c0_79] : memref<1x1xf32, #tpu.memory_space<smem>>
    %c0_80 = arith.constant 0 : index
    %c0_81 = arith.constant 0 : index
    %113 = memref.load %arg8[%c0_80, %c0_81] : memref<1x1xf32, #tpu.memory_space<smem>>
    %cst_82 = arith.constant dense<0.000000e+00> : vector<32xf32>
    %114 = vector.multi_reduction <add>, %109, %cst_82 [0] : vector<12x32xf32> to vector<32xf32>
    %115 = vector.shape_cast %114 : vector<32xf32> to vector<1x32xf32>
    %cst_83 = arith.constant 1.200000e+01 : f32
    %116 = vector.broadcast %cst_83 : f32 to vector<1x32xf32>
    %117 = arith.divf %115, %116 : vector<1x32xf32>
    %118 = vector.broadcast %117 : vector<1x32xf32> to vector<12x32xf32>
    %119 = arith.subf %109, %118 : vector<12x32xf32>
    %120 = arith.mulf %119, %119 : vector<12x32xf32>
    %cst_84 = arith.constant dense<0.000000e+00> : vector<32xf32>
    %121 = vector.multi_reduction <add>, %120, %cst_84 [0] : vector<12x32xf32> to vector<32xf32>
    %122 = vector.shape_cast %121 : vector<32xf32> to vector<1x32xf32>
    %cst_85 = arith.constant 1.200000e+01 : f32
    %123 = vector.broadcast %cst_85 : f32 to vector<1x32xf32>
    %124 = arith.divf %122, %123 : vector<1x32xf32>
    %cst_86 = arith.constant 9.99999974E-6 : f32
    %125 = vector.broadcast %cst_86 : f32 to vector<1x32xf32>
    %126 = arith.addf %124, %125 : vector<1x32xf32>
    %127 = math.rsqrt %126 : vector<1x32xf32>
    %128 = vector.broadcast %127 : vector<1x32xf32> to vector<12x32xf32>
    %129 = arith.mulf %119, %128 : vector<12x32xf32>
    %cst_87 = arith.constant dense<0.000000e+00> : vector<12xf32>
    %130 = vector.multi_reduction <add>, %65, %cst_87 [1] : vector<12x12xf32> to vector<12xf32>
    %131 = vector.shape_cast %130 : vector<12xf32> to vector<12x1xf32>
    %132 = arith.truncf %65 : vector<12x12xf32> to vector<12x12xbf16>
    %133 = arith.truncf %129 : vector<12x32xf32> to vector<12x32xbf16>
    %cst_88 = arith.constant dense<0.000000e+00> : vector<12x32xf32>
    %134 = tpu.matmul %132, %133, %cst_88 {dimension_numbers = #tpu.dot_dimension_numbers<[1], [0], [0], [1], [0, 0, 1, 1], [], []>} : vector<12x12xbf16>, vector<12x32xbf16>, vector<12x32xf32> -> vector<12x32xf32>
    %135 = vector.broadcast %131 : vector<12x1xf32> to vector<12x32xf32>
    %136 = arith.divf %134, %135 : vector<12x32xf32>
    %137 = arith.subf %129, %136 : vector<12x32xf32>
    %138 = math.absf %137 : vector<12x32xf32>
    %cst_89 = arith.constant dense<0.000000e+00> : vector<12xf32>
    %139 = vector.multi_reduction <add>, %138, %cst_89 [1] : vector<12x32xf32> to vector<12xf32>
    %140 = vector.shape_cast %139 : vector<12xf32> to vector<12x1xf32>
    %141 = arith.addf %140, %131 : vector<12x1xf32>
    %cst_90 = arith.constant 5.000000e-01 : f32
    %142 = vector.broadcast %cst_90 : f32 to vector<12x1xf32>
    %143 = arith.mulf %142, %141 : vector<12x1xf32>
    %144 = math.tanh %143 : vector<12x1xf32>
    %cst_91 = arith.constant 5.000000e-01 : f32
    %145 = vector.broadcast %cst_91 : f32 to vector<12x1xf32>
    %146 = arith.mulf %145, %144 : vector<12x1xf32>
    %cst_92 = arith.constant 5.000000e-01 : f32
    %147 = vector.broadcast %cst_92 : f32 to vector<12x1xf32>
    %148 = arith.addf %146, %147 : vector<12x1xf32>
    %149 = vector.broadcast %111 : vector<1x32xf32> to vector<12x32xf32>
    %150 = arith.mulf %136, %149 : vector<12x32xf32>
    %cst_93 = arith.constant dense<0.000000e+00> : vector<12xf32>
    %151 = vector.multi_reduction <add>, %150, %cst_93 [1] : vector<12x32xf32> to vector<12xf32>
    %152 = vector.shape_cast %151 : vector<12xf32> to vector<12x1xf32>
    %153 = vector.broadcast %112 : f32 to vector<12x1xf32>
    %154 = arith.addf %152, %153 : vector<12x1xf32>
    %cst_94 = arith.constant dense<0xFF800000> : vector<1xf32>
    %155 = vector.multi_reduction <maximumf>, %154, %cst_94 [0] : vector<12x1xf32> to vector<1xf32>
    %156 = vector.shape_cast %155 : vector<1xf32> to vector<1x1xf32>
    %157 = vector.broadcast %156 : vector<1x1xf32> to vector<12x1xf32>
    %158 = arith.subf %154, %157 : vector<12x1xf32>
    %159 = math.exp %158 : vector<12x1xf32>
    %cst_95 = arith.constant dense<0.000000e+00> : vector<1xf32>
    %160 = vector.multi_reduction <add>, %159, %cst_95 [0] : vector<12x1xf32> to vector<1xf32>
    %161 = vector.shape_cast %160 : vector<1xf32> to vector<1x1xf32>
    %162 = vector.broadcast %161 : vector<1x1xf32> to vector<12x1xf32>
    %163 = arith.divf %159, %162 : vector<12x1xf32>
    %164 = arith.addf %148, %163 : vector<12x1xf32>
    %cst_96 = arith.constant 5.000000e-01 : f32
    %165 = vector.broadcast %cst_96 : f32 to vector<12x1xf32>
    %166 = arith.mulf %165, %164 : vector<12x1xf32>
    %167 = math.tanh %166 : vector<12x1xf32>
    %cst_97 = arith.constant 5.000000e-01 : f32
    %168 = vector.broadcast %cst_97 : f32 to vector<12x1xf32>
    %169 = arith.mulf %168, %167 : vector<12x1xf32>
    %cst_98 = arith.constant 5.000000e-01 : f32
    %170 = vector.broadcast %cst_98 : f32 to vector<12x1xf32>
    %171 = arith.addf %169, %170 : vector<12x1xf32>
    %172 = vector.broadcast %111 : vector<1x32xf32> to vector<12x32xf32>
    %173 = arith.mulf %129, %172 : vector<12x32xf32>
    %cst_99 = arith.constant dense<0.000000e+00> : vector<12xf32>
    %174 = vector.multi_reduction <add>, %173, %cst_99 [1] : vector<12x32xf32> to vector<12xf32>
    %175 = vector.shape_cast %174 : vector<12xf32> to vector<12x1xf32>
    %176 = vector.broadcast %112 : f32 to vector<12x1xf32>
    %177 = arith.addf %175, %176 : vector<12x1xf32>
    %cst_100 = arith.constant 5.000000e-01 : f32
    %178 = vector.broadcast %cst_100 : f32 to vector<12x1xf32>
    %179 = arith.mulf %178, %177 : vector<12x1xf32>
    %180 = math.tanh %179 : vector<12x1xf32>
    %cst_101 = arith.constant 5.000000e-01 : f32
    %181 = vector.broadcast %cst_101 : f32 to vector<12x1xf32>
    %182 = arith.mulf %181, %180 : vector<12x1xf32>
    %cst_102 = arith.constant 5.000000e-01 : f32
    %183 = vector.broadcast %cst_102 : f32 to vector<12x1xf32>
    %184 = arith.addf %182, %183 : vector<12x1xf32>
    %185 = vector.broadcast %113 : f32 to vector<12x1xf32>
    %186 = arith.mulf %185, %171 : vector<12x1xf32>
    %cst_103 = arith.constant 1.000000e+00 : f32
    %187 = arith.subf %cst_103, %113 : f32
    %188 = vector.broadcast %187 : f32 to vector<12x1xf32>
    %189 = arith.mulf %188, %184 : vector<12x1xf32>
    %190 = arith.addf %186, %189 : vector<12x1xf32>
    %191 = vector.broadcast %190 : vector<12x1xf32> to vector<12x32xf32>
    %192 = arith.mulf %191, %129 : vector<12x32xf32>
    %cst_104 = arith.constant 0.000000e+00 : f32
    %193 = vector.broadcast %cst_104 : f32 to vector<12x12xf32>
    %194 = arith.cmpf one, %65, %193 : vector<12x12xf32>
    %195 = arith.extui %194 : vector<12x12xi1> to vector<12x12xi32>
    %196 = arith.sitofp %195 : vector<12x12xi32> to vector<12x12xf32>
    %197 = arith.truncf %196 : vector<12x12xf32> to vector<12x12xbf16>
    %cst_105 = arith.constant dense<0.000000e+00> : vector<12x12xf32>
    %198 = tpu.matmul %197, %197, %cst_105 {dimension_numbers = #tpu.dot_dimension_numbers<[1], [0], [0], [1], [0, 0, 1, 1], [], []>} : vector<12x12xbf16>, vector<12x12xbf16>, vector<12x12xf32> -> vector<12x12xf32>
    %cst_106 = arith.constant 0.000000e+00 : f32
    %199 = vector.broadcast %cst_106 : f32 to vector<12x12xf32>
    %200 = arith.cmpf one, %198, %199 : vector<12x12xf32>
    %201 = arith.extui %200 : vector<12x12xi1> to vector<12x12xi32>
    %202 = arith.sitofp %201 : vector<12x12xi32> to vector<12x12xf32>
    %c0_107 = arith.constant 0 : index
    %c0_108 = arith.constant 0 : index
    %203 = vector.load %arg12[%c0_107, %c0_108] : memref<12x32xf32, #tpu.memory_space<vmem>>, vector<12x32xf32>
    tpu.vector_store %arg12[%c0_107, %c0_108], %192 {strides = array<i32>} : memref<12x32xf32, #tpu.memory_space<vmem>>, vector<12x32xf32>,
    %c0_109 = arith.constant 0 : index
    %c0_110 = arith.constant 0 : index
    %204 = vector.load %arg13[%c0_109, %c0_110] : memref<12x12xf32, #tpu.memory_space<vmem>>, vector<12x12xf32>
    tpu.vector_store %arg13[%c0_109, %c0_110], %202 {strides = array<i32>} : memref<12x12xf32, #tpu.memory_space<vmem>>, vector<12x12xf32>,
    %205 = vector.shape_cast %190 : vector<12x1xf32> to vector<12x1xf32>
    %206 = vector.broadcast %205 : vector<12x1xf32> to vector<12x128xf32>
    %c0_111 = arith.constant 0 : index
    %c0_112 = arith.constant 0 : index
    %207 = vector.load %arg11[%c0_111, %c0_112] : memref<12x128xf32, #tpu.memory_space<vmem>>, vector<12x128xf32>
    tpu.vector_store %arg11[%c0_111, %c0_112], %206 {strides = array<i32>} : memref<12x128xf32, #tpu.memory_space<vmem>>, vector<12x128xf32>,
    return
  }
}

module attributes {stable_mosaic.version = 11 : i64} {
  func.func @_bottom_fused_kernel(%arg0: memref<1x6xi32, #tpu.memory_space<smem>>, %arg1: memref<1x6xi32, #tpu.memory_space<vmem>>, %arg2: memref<12x12xf32, #tpu.memory_space<vmem>>, %arg3: memref<12x32xf32, #tpu.memory_space<vmem>>, %arg4: memref<32x32xbf16, #tpu.memory_space<vmem>>, %arg5: memref<1x32xf32, #tpu.memory_space<vmem>>, %arg6: memref<6x32xf32, #tpu.memory_space<vmem>>, %arg7: memref<6x12xf32, #tpu.memory_space<vmem>>) attributes {dimension_semantics = [], scalar_prefetch = 0 : i64, scratch_operands = 1 : i64, tpu.core_type = #tpu.core_type<tc>} {
    %c0 = arith.constant 0 : index
    %c0_0 = arith.constant 0 : index
    %0 = memref.load %arg0[%c0, %c0_0] : memref<1x6xi32, #tpu.memory_space<smem>>
    %1 = arith.index_cast %0 : i32 to index
    %c0_1 = arith.constant 0 : index
    %2 = vector.load %arg2[%1, %c0_1] : memref<12x12xf32, #tpu.memory_space<vmem>>, vector<1x12xf32>
    %c0_2 = arith.constant 0 : index
    %c0_3 = arith.constant 0 : index
    %3 = vector.load %arg7[%c0_2, %c0_3] : memref<6x12xf32, #tpu.memory_space<vmem>>, vector<1x12xf32>
    tpu.vector_store %arg7[%c0_2, %c0_3], %2 {strides = array<i32>} : memref<6x12xf32, #tpu.memory_space<vmem>>, vector<1x12xf32>,
    %c0_4 = arith.constant 0 : index
    %c1 = arith.constant 1 : index
    %4 = memref.load %arg0[%c0_4, %c1] : memref<1x6xi32, #tpu.memory_space<smem>>
    %5 = arith.index_cast %4 : i32 to index
    %c0_5 = arith.constant 0 : index
    %6 = vector.load %arg2[%5, %c0_5] : memref<12x12xf32, #tpu.memory_space<vmem>>, vector<1x12xf32>
    %c1_6 = arith.constant 1 : index
    %c0_7 = arith.constant 0 : index
    %7 = vector.load %arg7[%c1_6, %c0_7] : memref<6x12xf32, #tpu.memory_space<vmem>>, vector<1x12xf32>
    tpu.vector_store %arg7[%c1_6, %c0_7], %6 {strides = array<i32>} : memref<6x12xf32, #tpu.memory_space<vmem>>, vector<1x12xf32>,
    %c0_8 = arith.constant 0 : index
    %c2 = arith.constant 2 : index
    %8 = memref.load %arg0[%c0_8, %c2] : memref<1x6xi32, #tpu.memory_space<smem>>
    %9 = arith.index_cast %8 : i32 to index
    %c0_9 = arith.constant 0 : index
    %10 = vector.load %arg2[%9, %c0_9] : memref<12x12xf32, #tpu.memory_space<vmem>>, vector<1x12xf32>
    %c2_10 = arith.constant 2 : index
    %c0_11 = arith.constant 0 : index
    %11 = vector.load %arg7[%c2_10, %c0_11] : memref<6x12xf32, #tpu.memory_space<vmem>>, vector<1x12xf32>
    tpu.vector_store %arg7[%c2_10, %c0_11], %10 {strides = array<i32>} : memref<6x12xf32, #tpu.memory_space<vmem>>, vector<1x12xf32>,
    %c0_12 = arith.constant 0 : index
    %c3 = arith.constant 3 : index
    %12 = memref.load %arg0[%c0_12, %c3] : memref<1x6xi32, #tpu.memory_space<smem>>
    %13 = arith.index_cast %12 : i32 to index
    %c0_13 = arith.constant 0 : index
    %14 = vector.load %arg2[%13, %c0_13] : memref<12x12xf32, #tpu.memory_space<vmem>>, vector<1x12xf32>
    %c3_14 = arith.constant 3 : index
    %c0_15 = arith.constant 0 : index
    %15 = vector.load %arg7[%c3_14, %c0_15] : memref<6x12xf32, #tpu.memory_space<vmem>>, vector<1x12xf32>
    tpu.vector_store %arg7[%c3_14, %c0_15], %14 {strides = array<i32>} : memref<6x12xf32, #tpu.memory_space<vmem>>, vector<1x12xf32>,
    %c0_16 = arith.constant 0 : index
    %c4 = arith.constant 4 : index
    %16 = memref.load %arg0[%c0_16, %c4] : memref<1x6xi32, #tpu.memory_space<smem>>
    %17 = arith.index_cast %16 : i32 to index
    %c0_17 = arith.constant 0 : index
    %18 = vector.load %arg2[%17, %c0_17] : memref<12x12xf32, #tpu.memory_space<vmem>>, vector<1x12xf32>
    %c4_18 = arith.constant 4 : index
    %c0_19 = arith.constant 0 : index
    %19 = vector.load %arg7[%c4_18, %c0_19] : memref<6x12xf32, #tpu.memory_space<vmem>>, vector<1x12xf32>
    tpu.vector_store %arg7[%c4_18, %c0_19], %18 {strides = array<i32>} : memref<6x12xf32, #tpu.memory_space<vmem>>, vector<1x12xf32>,
    %c0_20 = arith.constant 0 : index
    %c5 = arith.constant 5 : index
    %20 = memref.load %arg0[%c0_20, %c5] : memref<1x6xi32, #tpu.memory_space<smem>>
    %21 = arith.index_cast %20 : i32 to index
    %c0_21 = arith.constant 0 : index
    %22 = vector.load %arg2[%21, %c0_21] : memref<12x12xf32, #tpu.memory_space<vmem>>, vector<1x12xf32>
    %c5_22 = arith.constant 5 : index
    %c0_23 = arith.constant 0 : index
    %23 = vector.load %arg7[%c5_22, %c0_23] : memref<6x12xf32, #tpu.memory_space<vmem>>, vector<1x12xf32>
    tpu.vector_store %arg7[%c5_22, %c0_23], %22 {strides = array<i32>} : memref<6x12xf32, #tpu.memory_space<vmem>>, vector<1x12xf32>,
    %c0_24 = arith.constant 0 : index
    %c0_25 = arith.constant 0 : index
    %24 = vector.load %arg7[%c0_24, %c0_25] : memref<6x12xf32, #tpu.memory_space<vmem>>, vector<6x12xf32>
    %25 = arith.truncf %24 : vector<6x12xf32> to vector<6x12xbf16>
    %c0_26 = arith.constant 0 : index
    %c0_27 = arith.constant 0 : index
    %26 = vector.load %arg3[%c0_26, %c0_27] : memref<12x32xf32, #tpu.memory_space<vmem>>, vector<12x32xf32>
    %27 = arith.truncf %26 : vector<12x32xf32> to vector<12x32xbf16>
    %cst = arith.constant dense<0.000000e+00> : vector<6x32xf32>
    %28 = tpu.matmul %25, %27, %cst {dimension_numbers = #tpu.dot_dimension_numbers<[1], [0], [0], [1], [0, 0, 1, 1], [], []>} : vector<6x12xbf16>, vector<12x32xbf16>, vector<6x32xf32> -> vector<6x32xf32>
    %29 = tpu.iota {dimensions = array<i32: 0>} : vector<12x6xi32>
    %c0_28 = arith.constant 0 : index
    %c0_29 = arith.constant 0 : index
    %30 = vector.load %arg1[%c0_28, %c0_29] : memref<1x6xi32, #tpu.memory_space<vmem>>, vector<1x6xi32>
    %31 = vector.broadcast %30 : vector<1x6xi32> to vector<12x6xi32>
    %32 = arith.cmpi eq, %29, %31 : vector<12x6xi32>
    %33 = arith.extui %32 : vector<12x6xi1> to vector<12x6xi32>
    %34 = arith.sitofp %33 : vector<12x6xi32> to vector<12x6xf32>
    %35 = arith.truncf %34 : vector<12x6xf32> to vector<12x6xbf16>
    %cst_30 = arith.constant dense<0.000000e+00> : vector<6x6xf32>
    %36 = tpu.matmul %25, %35, %cst_30 {dimension_numbers = #tpu.dot_dimension_numbers<[1], [0], [0], [1], [0, 0, 1, 1], [], []>} : vector<6x12xbf16>, vector<12x6xbf16>, vector<6x6xf32> -> vector<6x6xf32>
    %cst_31 = arith.constant 1.000000e+00 : bf16
    %37 = vector.broadcast %cst_31 : bf16 to vector<1x6xbf16>
    %38 = arith.truncf %36 : vector<6x6xf32> to vector<6x6xbf16>
    %cst_32 = arith.constant dense<0.000000e+00> : vector<1x6xf32>
    %39 = tpu.matmul %37, %38, %cst_32 {dimension_numbers = #tpu.dot_dimension_numbers<[1], [1], [0], [0], [0, 0, 1, 0], [], []>} : vector<1x6xbf16>, vector<6x6xbf16>, vector<1x6xf32> -> vector<1x6xf32>
    %40 = vector.broadcast %39 : vector<1x6xf32> to vector<6x6xf32>
    %41 = arith.divf %36, %40 : vector<6x6xf32>
    %c0_33 = arith.constant 0 : index
    %c0_34 = arith.constant 0 : index
    %42 = vector.load %arg4[%c0_33, %c0_34] : memref<32x32xbf16, #tpu.memory_space<vmem>>, vector<32x32xbf16>
    %c0_35 = arith.constant 0 : index
    %c0_36 = arith.constant 0 : index
    %43 = vector.load %arg5[%c0_35, %c0_36] : memref<1x32xf32, #tpu.memory_space<vmem>>, vector<1x32xf32>
    %cst_37 = arith.constant dense<0.000000e+00> : vector<32xf32>
    %44 = vector.multi_reduction <add>, %28, %cst_37 [0] : vector<6x32xf32> to vector<32xf32>
    %45 = vector.shape_cast %44 : vector<32xf32> to vector<1x32xf32>
    %cst_38 = arith.constant 6.000000e+00 : f32
    %46 = vector.broadcast %cst_38 : f32 to vector<1x32xf32>
    %47 = arith.divf %45, %46 : vector<1x32xf32>
    %48 = vector.broadcast %47 : vector<1x32xf32> to vector<6x32xf32>
    %49 = arith.subf %28, %48 : vector<6x32xf32>
    %50 = arith.mulf %49, %49 : vector<6x32xf32>
    %cst_39 = arith.constant dense<0.000000e+00> : vector<32xf32>
    %51 = vector.multi_reduction <add>, %50, %cst_39 [0] : vector<6x32xf32> to vector<32xf32>
    %52 = vector.shape_cast %51 : vector<32xf32> to vector<1x32xf32>
    %cst_40 = arith.constant 6.000000e+00 : f32
    %53 = vector.broadcast %cst_40 : f32 to vector<1x32xf32>
    %54 = arith.divf %52, %53 : vector<1x32xf32>
    %cst_41 = arith.constant 9.99999974E-6 : f32
    %55 = vector.broadcast %cst_41 : f32 to vector<1x32xf32>
    %56 = arith.addf %54, %55 : vector<1x32xf32>
    %57 = math.rsqrt %56 : vector<1x32xf32>
    %58 = vector.broadcast %57 : vector<1x32xf32> to vector<6x32xf32>
    %59 = arith.mulf %49, %58 : vector<6x32xf32>
    %60 = arith.truncf %59 : vector<6x32xf32> to vector<6x32xbf16>
    %cst_42 = arith.constant dense<0.000000e+00> : vector<6x32xf32>
    %61 = tpu.matmul %60, %42, %cst_42 {dimension_numbers = #tpu.dot_dimension_numbers<[1], [0], [0], [1], [0, 0, 1, 1], [], []>} : vector<6x32xbf16>, vector<32x32xbf16>, vector<6x32xf32> -> vector<6x32xf32>
    %62 = vector.broadcast %43 : vector<1x32xf32> to vector<6x32xf32>
    %63 = arith.addf %61, %62 : vector<6x32xf32>
    %cst_43 = arith.constant dense<0.000000e+00> : vector<6xf32>
    %64 = vector.multi_reduction <add>, %41, %cst_43 [1] : vector<6x6xf32> to vector<6xf32>
    %65 = vector.shape_cast %64 : vector<6xf32> to vector<6x1xf32>
    %cst_44 = arith.constant 1.000000e+00 : f32
    %66 = vector.broadcast %cst_44 : f32 to vector<6x1xf32>
    %67 = arith.addf %65, %66 : vector<6x1xf32>
    %68 = math.rsqrt %67 : vector<6x1xf32>
    %69 = arith.truncf %41 : vector<6x6xf32> to vector<6x6xbf16>
    %70 = vector.broadcast %68 : vector<6x1xf32> to vector<6x32xf32>
    %71 = arith.mulf %70, %63 : vector<6x32xf32>
    %72 = arith.truncf %71 : vector<6x32xf32> to vector<6x32xbf16>
    %cst_45 = arith.constant dense<0.000000e+00> : vector<6x32xf32>
    %73 = tpu.matmul %69, %72, %cst_45 {dimension_numbers = #tpu.dot_dimension_numbers<[1], [0], [0], [1], [0, 0, 1, 1], [], []>} : vector<6x6xbf16>, vector<6x32xbf16>, vector<6x32xf32> -> vector<6x32xf32>
    %74 = vector.broadcast %68 : vector<6x1xf32> to vector<6x32xf32>
    %75 = arith.mulf %74, %73 : vector<6x32xf32>
    %76 = arith.mulf %68, %68 : vector<6x1xf32>
    %77 = vector.broadcast %76 : vector<6x1xf32> to vector<6x32xf32>
    %78 = arith.mulf %77, %63 : vector<6x32xf32>
    %79 = arith.addf %75, %78 : vector<6x32xf32>
    %cst_46 = arith.constant 0.000000e+00 : f32
    %80 = vector.broadcast %cst_46 : f32 to vector<6x32xf32>
    %81 = arith.cmpf oge, %79, %80 : vector<6x32xf32>
    %cst_47 = arith.constant 0.00999999977 : f32
    %82 = vector.broadcast %cst_47 : f32 to vector<6x32xf32>
    %83 = arith.mulf %82, %79 : vector<6x32xf32>
    %84 = arith.select %81, %79, %83 : vector<6x32xi1>, vector<6x32xf32>
    %c0_48 = arith.constant 0 : index
    %c0_49 = arith.constant 0 : index
    %85 = vector.load %arg6[%c0_48, %c0_49] : memref<6x32xf32, #tpu.memory_space<vmem>>, vector<6x32xf32>
    tpu.vector_store %arg6[%c0_48, %c0_49], %84 {strides = array<i32>} : memref<6x32xf32, #tpu.memory_space<vmem>>, vector<6x32xf32>,
    return
  }
}

module attributes {stable_mosaic.version = 11 : i64} {
  func.func @_up_kernel(%arg0: memref<1x6xi32, #tpu.memory_space<smem>>, %arg1: memref<12x12xf32, #tpu.memory_space<vmem>>, %arg2: memref<6x32xf32, #tpu.memory_space<vmem>>, %arg3: memref<12x32xf32, #tpu.memory_space<vmem>>, %arg4: memref<32x32xbf16, #tpu.memory_space<vmem>>, %arg5: memref<1x32xf32, #tpu.memory_space<vmem>>, %arg6: memref<32x32xbf16, #tpu.memory_space<vmem>>, %arg7: memref<1x32xf32, #tpu.memory_space<vmem>>, %arg8: memref<12x32xf32, #tpu.memory_space<vmem>>, %arg9: memref<12x32xf32, #tpu.memory_space<vmem>>) attributes {dimension_semantics = [], scalar_prefetch = 0 : i64, scratch_operands = 1 : i64, tpu.core_type = #tpu.core_type<tc>} {
    %cst = arith.constant 0.000000e+00 : f32
    %0 = vector.broadcast %cst : f32 to vector<12x32xf32>
    %c0 = arith.constant 0 : index
    %c0_0 = arith.constant 0 : index
    %1 = vector.load %arg9[%c0, %c0_0] : memref<12x32xf32, #tpu.memory_space<vmem>>, vector<12x32xf32>
    tpu.vector_store %arg9[%c0, %c0_0], %0 {strides = array<i32>} : memref<12x32xf32, #tpu.memory_space<vmem>>, vector<12x32xf32>,
    %c0_1 = arith.constant 0 : index
    %c0_2 = arith.constant 0 : index
    %2 = vector.load %arg2[%c0_1, %c0_2] : memref<6x32xf32, #tpu.memory_space<vmem>>, vector<1x32xf32>
    %c0_3 = arith.constant 0 : index
    %c0_4 = arith.constant 0 : index
    %3 = memref.load %arg0[%c0_3, %c0_4] : memref<1x6xi32, #tpu.memory_space<smem>>
    %4 = arith.index_cast %3 : i32 to index
    %c0_5 = arith.constant 0 : index
    %5 = vector.load %arg9[%4, %c0_5] : memref<12x32xf32, #tpu.memory_space<vmem>>, vector<1x32xf32>
    tpu.vector_store %arg9[%4, %c0_5], %2 {strides = array<i32>} : memref<12x32xf32, #tpu.memory_space<vmem>>, vector<1x32xf32>,
    %c1 = arith.constant 1 : index
    %c0_6 = arith.constant 0 : index
    %6 = vector.load %arg2[%c1, %c0_6] : memref<6x32xf32, #tpu.memory_space<vmem>>, vector<1x32xf32>
    %c0_7 = arith.constant 0 : index
    %c1_8 = arith.constant 1 : index
    %7 = memref.load %arg0[%c0_7, %c1_8] : memref<1x6xi32, #tpu.memory_space<smem>>
    %8 = arith.index_cast %7 : i32 to index
    %c0_9 = arith.constant 0 : index
    %9 = vector.load %arg9[%8, %c0_9] : memref<12x32xf32, #tpu.memory_space<vmem>>, vector<1x32xf32>
    tpu.vector_store %arg9[%8, %c0_9], %6 {strides = array<i32>} : memref<12x32xf32, #tpu.memory_space<vmem>>, vector<1x32xf32>,
    %c2 = arith.constant 2 : index
    %c0_10 = arith.constant 0 : index
    %10 = vector.load %arg2[%c2, %c0_10] : memref<6x32xf32, #tpu.memory_space<vmem>>, vector<1x32xf32>
    %c0_11 = arith.constant 0 : index
    %c2_12 = arith.constant 2 : index
    %11 = memref.load %arg0[%c0_11, %c2_12] : memref<1x6xi32, #tpu.memory_space<smem>>
    %12 = arith.index_cast %11 : i32 to index
    %c0_13 = arith.constant 0 : index
    %13 = vector.load %arg9[%12, %c0_13] : memref<12x32xf32, #tpu.memory_space<vmem>>, vector<1x32xf32>
    tpu.vector_store %arg9[%12, %c0_13], %10 {strides = array<i32>} : memref<12x32xf32, #tpu.memory_space<vmem>>, vector<1x32xf32>,
    %c3 = arith.constant 3 : index
    %c0_14 = arith.constant 0 : index
    %14 = vector.load %arg2[%c3, %c0_14] : memref<6x32xf32, #tpu.memory_space<vmem>>, vector<1x32xf32>
    %c0_15 = arith.constant 0 : index
    %c3_16 = arith.constant 3 : index
    %15 = memref.load %arg0[%c0_15, %c3_16] : memref<1x6xi32, #tpu.memory_space<smem>>
    %16 = arith.index_cast %15 : i32 to index
    %c0_17 = arith.constant 0 : index
    %17 = vector.load %arg9[%16, %c0_17] : memref<12x32xf32, #tpu.memory_space<vmem>>, vector<1x32xf32>
    tpu.vector_store %arg9[%16, %c0_17], %14 {strides = array<i32>} : memref<12x32xf32, #tpu.memory_space<vmem>>, vector<1x32xf32>,
    %c4 = arith.constant 4 : index
    %c0_18 = arith.constant 0 : index
    %18 = vector.load %arg2[%c4, %c0_18] : memref<6x32xf32, #tpu.memory_space<vmem>>, vector<1x32xf32>
    %c0_19 = arith.constant 0 : index
    %c4_20 = arith.constant 4 : index
    %19 = memref.load %arg0[%c0_19, %c4_20] : memref<1x6xi32, #tpu.memory_space<smem>>
    %20 = arith.index_cast %19 : i32 to index
    %c0_21 = arith.constant 0 : index
    %21 = vector.load %arg9[%20, %c0_21] : memref<12x32xf32, #tpu.memory_space<vmem>>, vector<1x32xf32>
    tpu.vector_store %arg9[%20, %c0_21], %18 {strides = array<i32>} : memref<12x32xf32, #tpu.memory_space<vmem>>, vector<1x32xf32>,
    %c5 = arith.constant 5 : index
    %c0_22 = arith.constant 0 : index
    %22 = vector.load %arg2[%c5, %c0_22] : memref<6x32xf32, #tpu.memory_space<vmem>>, vector<1x32xf32>
    %c0_23 = arith.constant 0 : index
    %c5_24 = arith.constant 5 : index
    %23 = memref.load %arg0[%c0_23, %c5_24] : memref<1x6xi32, #tpu.memory_space<smem>>
    %24 = arith.index_cast %23 : i32 to index
    %c0_25 = arith.constant 0 : index
    %25 = vector.load %arg9[%24, %c0_25] : memref<12x32xf32, #tpu.memory_space<vmem>>, vector<1x32xf32>
    tpu.vector_store %arg9[%24, %c0_25], %22 {strides = array<i32>} : memref<12x32xf32, #tpu.memory_space<vmem>>, vector<1x32xf32>,
    %c0_26 = arith.constant 0 : index
    %c0_27 = arith.constant 0 : index
    %26 = vector.load %arg9[%c0_26, %c0_27] : memref<12x32xf32, #tpu.memory_space<vmem>>, vector<12x32xf32>
    %cst_28 = arith.constant dense<0.000000e+00> : vector<32xf32>
    %27 = vector.multi_reduction <add>, %26, %cst_28 [0] : vector<12x32xf32> to vector<32xf32>
    %28 = vector.shape_cast %27 : vector<32xf32> to vector<1x32xf32>
    %cst_29 = arith.constant 1.200000e+01 : f32
    %29 = vector.broadcast %cst_29 : f32 to vector<1x32xf32>
    %30 = arith.divf %28, %29 : vector<1x32xf32>
    %31 = vector.broadcast %30 : vector<1x32xf32> to vector<12x32xf32>
    %32 = arith.subf %26, %31 : vector<12x32xf32>
    %33 = arith.mulf %32, %32 : vector<12x32xf32>
    %cst_30 = arith.constant dense<0.000000e+00> : vector<32xf32>
    %34 = vector.multi_reduction <add>, %33, %cst_30 [0] : vector<12x32xf32> to vector<32xf32>
    %35 = vector.shape_cast %34 : vector<32xf32> to vector<1x32xf32>
    %cst_31 = arith.constant 1.200000e+01 : f32
    %36 = vector.broadcast %cst_31 : f32 to vector<1x32xf32>
    %37 = arith.divf %35, %36 : vector<1x32xf32>
    %cst_32 = arith.constant 9.99999974E-6 : f32
    %38 = vector.broadcast %cst_32 : f32 to vector<1x32xf32>
    %39 = arith.addf %37, %38 : vector<1x32xf32>
    %40 = math.rsqrt %39 : vector<1x32xf32>
    %41 = vector.broadcast %40 : vector<1x32xf32> to vector<12x32xf32>
    %42 = arith.mulf %32, %41 : vector<12x32xf32>
    %c0_33 = arith.constant 0 : index
    %c0_34 = arith.constant 0 : index
    %43 = vector.load %arg3[%c0_33, %c0_34] : memref<12x32xf32, #tpu.memory_space<vmem>>, vector<12x32xf32>
    %cst_35 = arith.constant dense<0.000000e+00> : vector<32xf32>
    %44 = vector.multi_reduction <add>, %43, %cst_35 [0] : vector<12x32xf32> to vector<32xf32>
    %45 = vector.shape_cast %44 : vector<32xf32> to vector<1x32xf32>
    %cst_36 = arith.constant 1.200000e+01 : f32
    %46 = vector.broadcast %cst_36 : f32 to vector<1x32xf32>
    %47 = arith.divf %45, %46 : vector<1x32xf32>
    %48 = vector.broadcast %47 : vector<1x32xf32> to vector<12x32xf32>
    %49 = arith.subf %43, %48 : vector<12x32xf32>
    %50 = arith.mulf %49, %49 : vector<12x32xf32>
    %cst_37 = arith.constant dense<0.000000e+00> : vector<32xf32>
    %51 = vector.multi_reduction <add>, %50, %cst_37 [0] : vector<12x32xf32> to vector<32xf32>
    %52 = vector.shape_cast %51 : vector<32xf32> to vector<1x32xf32>
    %cst_38 = arith.constant 1.200000e+01 : f32
    %53 = vector.broadcast %cst_38 : f32 to vector<1x32xf32>
    %54 = arith.divf %52, %53 : vector<1x32xf32>
    %cst_39 = arith.constant 9.99999974E-6 : f32
    %55 = vector.broadcast %cst_39 : f32 to vector<1x32xf32>
    %56 = arith.addf %54, %55 : vector<1x32xf32>
    %57 = math.rsqrt %56 : vector<1x32xf32>
    %58 = vector.broadcast %57 : vector<1x32xf32> to vector<12x32xf32>
    %59 = arith.mulf %49, %58 : vector<12x32xf32>
    %c0_40 = arith.constant 0 : index
    %c0_41 = arith.constant 0 : index
    %60 = vector.load %arg4[%c0_40, %c0_41] : memref<32x32xbf16, #tpu.memory_space<vmem>>, vector<32x32xbf16>
    %c0_42 = arith.constant 0 : index
    %c0_43 = arith.constant 0 : index
    %61 = vector.load %arg5[%c0_42, %c0_43] : memref<1x32xf32, #tpu.memory_space<vmem>>, vector<1x32xf32>
    %62 = arith.truncf %42 : vector<12x32xf32> to vector<12x32xbf16>
    %cst_44 = arith.constant dense<0.000000e+00> : vector<12x32xf32>
    %63 = tpu.matmul %62, %60, %cst_44 {dimension_numbers = #tpu.dot_dimension_numbers<[1], [0], [0], [1], [0, 0, 1, 1], [], []>} : vector<12x32xbf16>, vector<32x32xbf16>, vector<12x32xf32> -> vector<12x32xf32>
    %64 = vector.broadcast %61 : vector<1x32xf32> to vector<12x32xf32>
    %65 = arith.addf %63, %64 : vector<12x32xf32>
    %66 = arith.truncf %59 : vector<12x32xf32> to vector<12x32xbf16>
    %cst_45 = arith.constant dense<0.000000e+00> : vector<12x32xf32>
    %67 = tpu.matmul %66, %60, %cst_45 {dimension_numbers = #tpu.dot_dimension_numbers<[1], [0], [0], [1], [0, 0, 1, 1], [], []>} : vector<12x32xbf16>, vector<32x32xbf16>, vector<12x32xf32> -> vector<12x32xf32>
    %68 = vector.broadcast %61 : vector<1x32xf32> to vector<12x32xf32>
    %69 = arith.addf %67, %68 : vector<12x32xf32>
    %70 = arith.truncf %65 : vector<12x32xf32> to vector<12x32xbf16>
    %71 = arith.truncf %65 : vector<12x32xf32> to vector<12x32xbf16>
    %cst_46 = arith.constant dense<0.000000e+00> : vector<12x12xf32>
    %72 = tpu.matmul %70, %71, %cst_46 {dimension_numbers = #tpu.dot_dimension_numbers<[1], [1], [0], [0], [0, 0, 1, 0], [], []>} : vector<12x32xbf16>, vector<12x32xbf16>, vector<12x12xf32> -> vector<12x12xf32>
    %cst_47 = arith.constant dense<0xFF800000> : vector<12xf32>
    %73 = vector.multi_reduction <maximumf>, %72, %cst_47 [1] : vector<12x12xf32> to vector<12xf32>
    %74 = vector.shape_cast %73 : vector<12xf32> to vector<12x1xf32>
    %75 = vector.broadcast %74 : vector<12x1xf32> to vector<12x12xf32>
    %76 = arith.subf %72, %75 : vector<12x12xf32>
    %77 = math.exp %76 : vector<12x12xf32>
    %cst_48 = arith.constant dense<0.000000e+00> : vector<12xf32>
    %78 = vector.multi_reduction <add>, %77, %cst_48 [1] : vector<12x12xf32> to vector<12xf32>
    %79 = vector.shape_cast %78 : vector<12xf32> to vector<12x1xf32>
    %80 = tpu.reciprocal %79 {approx = true} : vector<12x1xf32> -> vector<12x1xf32>
    %81 = vector.broadcast %80 : vector<12x1xf32> to vector<12x12xf32>
    %82 = arith.mulf %77, %81 : vector<12x12xf32>
    %83 = arith.truncf %82 : vector<12x12xf32> to vector<12x12xbf16>
    %84 = arith.truncf %69 : vector<12x32xf32> to vector<12x32xbf16>
    %cst_49 = arith.constant dense<0.000000e+00> : vector<12x32xf32>
    %85 = tpu.matmul %83, %84, %cst_49 {dimension_numbers = #tpu.dot_dimension_numbers<[1], [0], [0], [1], [0, 0, 1, 1], [], []>} : vector<12x12xbf16>, vector<12x32xbf16>, vector<12x32xf32> -> vector<12x32xf32>
    %cst_50 = arith.constant dense<0xFF800000> : vector<12xf32>
    %86 = vector.multi_reduction <maximumf>, %85, %cst_50 [1] : vector<12x32xf32> to vector<12xf32>
    %87 = vector.shape_cast %86 : vector<12xf32> to vector<12x1xf32>
    %88 = vector.broadcast %87 : vector<12x1xf32> to vector<12x32xf32>
    %89 = arith.subf %85, %88 : vector<12x32xf32>
    %90 = math.exp %89 : vector<12x32xf32>
    %cst_51 = arith.constant dense<0.000000e+00> : vector<12xf32>
    %91 = vector.multi_reduction <add>, %90, %cst_51 [1] : vector<12x32xf32> to vector<12xf32>
    %92 = vector.shape_cast %91 : vector<12xf32> to vector<12x1xf32>
    %93 = tpu.reciprocal %92 {approx = true} : vector<12x1xf32> -> vector<12x1xf32>
    %94 = vector.broadcast %93 : vector<12x1xf32> to vector<12x32xf32>
    %95 = arith.mulf %90, %94 : vector<12x32xf32>
    %96 = arith.mulf %95, %69 : vector<12x32xf32>
    %97 = arith.addf %96, %65 : vector<12x32xf32>
    %98 = arith.addf %97, %69 : vector<12x32xf32>
    %c0_52 = arith.constant 0 : index
    %c0_53 = arith.constant 0 : index
    %99 = vector.load %arg1[%c0_52, %c0_53] : memref<12x12xf32, #tpu.memory_space<vmem>>, vector<12x12xf32>
    %c0_54 = arith.constant 0 : index
    %c0_55 = arith.constant 0 : index
    %100 = vector.load %arg6[%c0_54, %c0_55] : memref<32x32xbf16, #tpu.memory_space<vmem>>, vector<32x32xbf16>
    %c0_56 = arith.constant 0 : index
    %c0_57 = arith.constant 0 : index
    %101 = vector.load %arg7[%c0_56, %c0_57] : memref<1x32xf32, #tpu.memory_space<vmem>>, vector<1x32xf32>
    %cst_58 = arith.constant dense<0.000000e+00> : vector<32xf32>
    %102 = vector.multi_reduction <add>, %98, %cst_58 [0] : vector<12x32xf32> to vector<32xf32>
    %103 = vector.shape_cast %102 : vector<32xf32> to vector<1x32xf32>
    %cst_59 = arith.constant 1.200000e+01 : f32
    %104 = vector.broadcast %cst_59 : f32 to vector<1x32xf32>
    %105 = arith.divf %103, %104 : vector<1x32xf32>
    %106 = vector.broadcast %105 : vector<1x32xf32> to vector<12x32xf32>
    %107 = arith.subf %98, %106 : vector<12x32xf32>
    %108 = arith.mulf %107, %107 : vector<12x32xf32>
    %cst_60 = arith.constant dense<0.000000e+00> : vector<32xf32>
    %109 = vector.multi_reduction <add>, %108, %cst_60 [0] : vector<12x32xf32> to vector<32xf32>
    %110 = vector.shape_cast %109 : vector<32xf32> to vector<1x32xf32>
    %cst_61 = arith.constant 1.200000e+01 : f32
    %111 = vector.broadcast %cst_61 : f32 to vector<1x32xf32>
    %112 = arith.divf %110, %111 : vector<1x32xf32>
    %cst_62 = arith.constant 9.99999974E-6 : f32
    %113 = vector.broadcast %cst_62 : f32 to vector<1x32xf32>
    %114 = arith.addf %112, %113 : vector<1x32xf32>
    %115 = math.rsqrt %114 : vector<1x32xf32>
    %116 = vector.broadcast %115 : vector<1x32xf32> to vector<12x32xf32>
    %117 = arith.mulf %107, %116 : vector<12x32xf32>
    %118 = arith.truncf %117 : vector<12x32xf32> to vector<12x32xbf16>
    %cst_63 = arith.constant dense<0.000000e+00> : vector<12x32xf32>
    %119 = tpu.matmul %118, %100, %cst_63 {dimension_numbers = #tpu.dot_dimension_numbers<[1], [0], [0], [1], [0, 0, 1, 1], [], []>} : vector<12x32xbf16>, vector<32x32xbf16>, vector<12x32xf32> -> vector<12x32xf32>
    %120 = vector.broadcast %101 : vector<1x32xf32> to vector<12x32xf32>
    %121 = arith.addf %119, %120 : vector<12x32xf32>
    %cst_64 = arith.constant dense<0.000000e+00> : vector<12xf32>
    %122 = vector.multi_reduction <add>, %99, %cst_64 [1] : vector<12x12xf32> to vector<12xf32>
    %123 = vector.shape_cast %122 : vector<12xf32> to vector<12x1xf32>
    %cst_65 = arith.constant 1.000000e+00 : f32
    %124 = vector.broadcast %cst_65 : f32 to vector<12x1xf32>
    %125 = arith.addf %123, %124 : vector<12x1xf32>
    %126 = math.rsqrt %125 : vector<12x1xf32>
    %127 = arith.truncf %99 : vector<12x12xf32> to vector<12x12xbf16>
    %128 = vector.broadcast %126 : vector<12x1xf32> to vector<12x32xf32>
    %129 = arith.mulf %128, %121 : vector<12x32xf32>
    %130 = arith.truncf %129 : vector<12x32xf32> to vector<12x32xbf16>
    %cst_66 = arith.constant dense<0.000000e+00> : vector<12x32xf32>
    %131 = tpu.matmul %127, %130, %cst_66 {dimension_numbers = #tpu.dot_dimension_numbers<[1], [0], [0], [1], [0, 0, 1, 1], [], []>} : vector<12x12xbf16>, vector<12x32xbf16>, vector<12x32xf32> -> vector<12x32xf32>
    %132 = vector.broadcast %126 : vector<12x1xf32> to vector<12x32xf32>
    %133 = arith.mulf %132, %131 : vector<12x32xf32>
    %134 = arith.mulf %126, %126 : vector<12x1xf32>
    %135 = vector.broadcast %134 : vector<12x1xf32> to vector<12x32xf32>
    %136 = arith.mulf %135, %121 : vector<12x32xf32>
    %137 = arith.addf %133, %136 : vector<12x32xf32>
    %cst_67 = arith.constant 0.000000e+00 : f32
    %138 = vector.broadcast %cst_67 : f32 to vector<12x32xf32>
    %139 = arith.cmpf oge, %137, %138 : vector<12x32xf32>
    %cst_68 = arith.constant 0.00999999977 : f32
    %140 = vector.broadcast %cst_68 : f32 to vector<12x32xf32>
    %141 = arith.mulf %140, %137 : vector<12x32xf32>
    %142 = arith.select %139, %137, %141 : vector<12x32xi1>, vector<12x32xf32>
    %c0_69 = arith.constant 0 : index
    %c0_70 = arith.constant 0 : index
    %143 = vector.load %arg8[%c0_69, %c0_70] : memref<12x32xf32, #tpu.memory_space<vmem>>, vector<12x32xf32>
    tpu.vector_store %arg8[%c0_69, %c0_70], %142 {strides = array<i32>} : memref<12x32xf32, #tpu.memory_space<vmem>>, vector<12x32xf32>,
    return
  }
}

module attributes {stable_mosaic.version = 11 : i64} {
  func.func @_up_kernel(%arg0: memref<1x12xi32, #tpu.memory_space<smem>>, %arg1: memref<16x16xf32, #tpu.memory_space<vmem>>, %arg2: memref<12x32xf32, #tpu.memory_space<vmem>>, %arg3: memref<16x32xf32, #tpu.memory_space<vmem>>, %arg4: memref<32x32xbf16, #tpu.memory_space<vmem>>, %arg5: memref<1x32xf32, #tpu.memory_space<vmem>>, %arg6: memref<32x32xbf16, #tpu.memory_space<vmem>>, %arg7: memref<1x32xf32, #tpu.memory_space<vmem>>, %arg8: memref<16x32xf32, #tpu.memory_space<vmem>>, %arg9: memref<16x32xf32, #tpu.memory_space<vmem>>) attributes {dimension_semantics = [], scalar_prefetch = 0 : i64, scratch_operands = 1 : i64, tpu.core_type = #tpu.core_type<tc>} {
    %cst = arith.constant 0.000000e+00 : f32
    %0 = vector.broadcast %cst : f32 to vector<16x32xf32>
    %c0 = arith.constant 0 : index
    %c0_0 = arith.constant 0 : index
    %1 = vector.load %arg9[%c0, %c0_0] : memref<16x32xf32, #tpu.memory_space<vmem>>, vector<16x32xf32>
    tpu.vector_store %arg9[%c0, %c0_0], %0 {strides = array<i32>} : memref<16x32xf32, #tpu.memory_space<vmem>>, vector<16x32xf32>,
    %c0_1 = arith.constant 0 : index
    %c0_2 = arith.constant 0 : index
    %2 = vector.load %arg2[%c0_1, %c0_2] : memref<12x32xf32, #tpu.memory_space<vmem>>, vector<1x32xf32>
    %c0_3 = arith.constant 0 : index
    %c0_4 = arith.constant 0 : index
    %3 = memref.load %arg0[%c0_3, %c0_4] : memref<1x12xi32, #tpu.memory_space<smem>>
    %4 = arith.index_cast %3 : i32 to index
    %c0_5 = arith.constant 0 : index
    %5 = vector.load %arg9[%4, %c0_5] : memref<16x32xf32, #tpu.memory_space<vmem>>, vector<1x32xf32>
    tpu.vector_store %arg9[%4, %c0_5], %2 {strides = array<i32>} : memref<16x32xf32, #tpu.memory_space<vmem>>, vector<1x32xf32>,
    %c1 = arith.constant 1 : index
    %c0_6 = arith.constant 0 : index
    %6 = vector.load %arg2[%c1, %c0_6] : memref<12x32xf32, #tpu.memory_space<vmem>>, vector<1x32xf32>
    %c0_7 = arith.constant 0 : index
    %c1_8 = arith.constant 1 : index
    %7 = memref.load %arg0[%c0_7, %c1_8] : memref<1x12xi32, #tpu.memory_space<smem>>
    %8 = arith.index_cast %7 : i32 to index
    %c0_9 = arith.constant 0 : index
    %9 = vector.load %arg9[%8, %c0_9] : memref<16x32xf32, #tpu.memory_space<vmem>>, vector<1x32xf32>
    tpu.vector_store %arg9[%8, %c0_9], %6 {strides = array<i32>} : memref<16x32xf32, #tpu.memory_space<vmem>>, vector<1x32xf32>,
    %c2 = arith.constant 2 : index
    %c0_10 = arith.constant 0 : index
    %10 = vector.load %arg2[%c2, %c0_10] : memref<12x32xf32, #tpu.memory_space<vmem>>, vector<1x32xf32>
    %c0_11 = arith.constant 0 : index
    %c2_12 = arith.constant 2 : index
    %11 = memref.load %arg0[%c0_11, %c2_12] : memref<1x12xi32, #tpu.memory_space<smem>>
    %12 = arith.index_cast %11 : i32 to index
    %c0_13 = arith.constant 0 : index
    %13 = vector.load %arg9[%12, %c0_13] : memref<16x32xf32, #tpu.memory_space<vmem>>, vector<1x32xf32>
    tpu.vector_store %arg9[%12, %c0_13], %10 {strides = array<i32>} : memref<16x32xf32, #tpu.memory_space<vmem>>, vector<1x32xf32>,
    %c3 = arith.constant 3 : index
    %c0_14 = arith.constant 0 : index
    %14 = vector.load %arg2[%c3, %c0_14] : memref<12x32xf32, #tpu.memory_space<vmem>>, vector<1x32xf32>
    %c0_15 = arith.constant 0 : index
    %c3_16 = arith.constant 3 : index
    %15 = memref.load %arg0[%c0_15, %c3_16] : memref<1x12xi32, #tpu.memory_space<smem>>
    %16 = arith.index_cast %15 : i32 to index
    %c0_17 = arith.constant 0 : index
    %17 = vector.load %arg9[%16, %c0_17] : memref<16x32xf32, #tpu.memory_space<vmem>>, vector<1x32xf32>
    tpu.vector_store %arg9[%16, %c0_17], %14 {strides = array<i32>} : memref<16x32xf32, #tpu.memory_space<vmem>>, vector<1x32xf32>,
    %c4 = arith.constant 4 : index
    %c0_18 = arith.constant 0 : index
    %18 = vector.load %arg2[%c4, %c0_18] : memref<12x32xf32, #tpu.memory_space<vmem>>, vector<1x32xf32>
    %c0_19 = arith.constant 0 : index
    %c4_20 = arith.constant 4 : index
    %19 = memref.load %arg0[%c0_19, %c4_20] : memref<1x12xi32, #tpu.memory_space<smem>>
    %20 = arith.index_cast %19 : i32 to index
    %c0_21 = arith.constant 0 : index
    %21 = vector.load %arg9[%20, %c0_21] : memref<16x32xf32, #tpu.memory_space<vmem>>, vector<1x32xf32>
    tpu.vector_store %arg9[%20, %c0_21], %18 {strides = array<i32>} : memref<16x32xf32, #tpu.memory_space<vmem>>, vector<1x32xf32>,
    %c5 = arith.constant 5 : index
    %c0_22 = arith.constant 0 : index
    %22 = vector.load %arg2[%c5, %c0_22] : memref<12x32xf32, #tpu.memory_space<vmem>>, vector<1x32xf32>
    %c0_23 = arith.constant 0 : index
    %c5_24 = arith.constant 5 : index
    %23 = memref.load %arg0[%c0_23, %c5_24] : memref<1x12xi32, #tpu.memory_space<smem>>
    %24 = arith.index_cast %23 : i32 to index
    %c0_25 = arith.constant 0 : index
    %25 = vector.load %arg9[%24, %c0_25] : memref<16x32xf32, #tpu.memory_space<vmem>>, vector<1x32xf32>
    tpu.vector_store %arg9[%24, %c0_25], %22 {strides = array<i32>} : memref<16x32xf32, #tpu.memory_space<vmem>>, vector<1x32xf32>,
    %c6 = arith.constant 6 : index
    %c0_26 = arith.constant 0 : index
    %26 = vector.load %arg2[%c6, %c0_26] : memref<12x32xf32, #tpu.memory_space<vmem>>, vector<1x32xf32>
    %c0_27 = arith.constant 0 : index
    %c6_28 = arith.constant 6 : index
    %27 = memref.load %arg0[%c0_27, %c6_28] : memref<1x12xi32, #tpu.memory_space<smem>>
    %28 = arith.index_cast %27 : i32 to index
    %c0_29 = arith.constant 0 : index
    %29 = vector.load %arg9[%28, %c0_29] : memref<16x32xf32, #tpu.memory_space<vmem>>, vector<1x32xf32>
    tpu.vector_store %arg9[%28, %c0_29], %26 {strides = array<i32>} : memref<16x32xf32, #tpu.memory_space<vmem>>, vector<1x32xf32>,
    %c7 = arith.constant 7 : index
    %c0_30 = arith.constant 0 : index
    %30 = vector.load %arg2[%c7, %c0_30] : memref<12x32xf32, #tpu.memory_space<vmem>>, vector<1x32xf32>
    %c0_31 = arith.constant 0 : index
    %c7_32 = arith.constant 7 : index
    %31 = memref.load %arg0[%c0_31, %c7_32] : memref<1x12xi32, #tpu.memory_space<smem>>
    %32 = arith.index_cast %31 : i32 to index
    %c0_33 = arith.constant 0 : index
    %33 = vector.load %arg9[%32, %c0_33] : memref<16x32xf32, #tpu.memory_space<vmem>>, vector<1x32xf32>
    tpu.vector_store %arg9[%32, %c0_33], %30 {strides = array<i32>} : memref<16x32xf32, #tpu.memory_space<vmem>>, vector<1x32xf32>,
    %c8 = arith.constant 8 : index
    %c0_34 = arith.constant 0 : index
    %34 = vector.load %arg2[%c8, %c0_34] : memref<12x32xf32, #tpu.memory_space<vmem>>, vector<1x32xf32>
    %c0_35 = arith.constant 0 : index
    %c8_36 = arith.constant 8 : index
    %35 = memref.load %arg0[%c0_35, %c8_36] : memref<1x12xi32, #tpu.memory_space<smem>>
    %36 = arith.index_cast %35 : i32 to index
    %c0_37 = arith.constant 0 : index
    %37 = vector.load %arg9[%36, %c0_37] : memref<16x32xf32, #tpu.memory_space<vmem>>, vector<1x32xf32>
    tpu.vector_store %arg9[%36, %c0_37], %34 {strides = array<i32>} : memref<16x32xf32, #tpu.memory_space<vmem>>, vector<1x32xf32>,
    %c9 = arith.constant 9 : index
    %c0_38 = arith.constant 0 : index
    %38 = vector.load %arg2[%c9, %c0_38] : memref<12x32xf32, #tpu.memory_space<vmem>>, vector<1x32xf32>
    %c0_39 = arith.constant 0 : index
    %c9_40 = arith.constant 9 : index
    %39 = memref.load %arg0[%c0_39, %c9_40] : memref<1x12xi32, #tpu.memory_space<smem>>
    %40 = arith.index_cast %39 : i32 to index
    %c0_41 = arith.constant 0 : index
    %41 = vector.load %arg9[%40, %c0_41] : memref<16x32xf32, #tpu.memory_space<vmem>>, vector<1x32xf32>
    tpu.vector_store %arg9[%40, %c0_41], %38 {strides = array<i32>} : memref<16x32xf32, #tpu.memory_space<vmem>>, vector<1x32xf32>,
    %c10 = arith.constant 10 : index
    %c0_42 = arith.constant 0 : index
    %42 = vector.load %arg2[%c10, %c0_42] : memref<12x32xf32, #tpu.memory_space<vmem>>, vector<1x32xf32>
    %c0_43 = arith.constant 0 : index
    %c10_44 = arith.constant 10 : index
    %43 = memref.load %arg0[%c0_43, %c10_44] : memref<1x12xi32, #tpu.memory_space<smem>>
    %44 = arith.index_cast %43 : i32 to index
    %c0_45 = arith.constant 0 : index
    %45 = vector.load %arg9[%44, %c0_45] : memref<16x32xf32, #tpu.memory_space<vmem>>, vector<1x32xf32>
    tpu.vector_store %arg9[%44, %c0_45], %42 {strides = array<i32>} : memref<16x32xf32, #tpu.memory_space<vmem>>, vector<1x32xf32>,
    %c11 = arith.constant 11 : index
    %c0_46 = arith.constant 0 : index
    %46 = vector.load %arg2[%c11, %c0_46] : memref<12x32xf32, #tpu.memory_space<vmem>>, vector<1x32xf32>
    %c0_47 = arith.constant 0 : index
    %c11_48 = arith.constant 11 : index
    %47 = memref.load %arg0[%c0_47, %c11_48] : memref<1x12xi32, #tpu.memory_space<smem>>
    %48 = arith.index_cast %47 : i32 to index
    %c0_49 = arith.constant 0 : index
    %49 = vector.load %arg9[%48, %c0_49] : memref<16x32xf32, #tpu.memory_space<vmem>>, vector<1x32xf32>
    tpu.vector_store %arg9[%48, %c0_49], %46 {strides = array<i32>} : memref<16x32xf32, #tpu.memory_space<vmem>>, vector<1x32xf32>,
    %c0_50 = arith.constant 0 : index
    %c0_51 = arith.constant 0 : index
    %50 = vector.load %arg9[%c0_50, %c0_51] : memref<16x32xf32, #tpu.memory_space<vmem>>, vector<16x32xf32>
    %cst_52 = arith.constant dense<0.000000e+00> : vector<32xf32>
    %51 = vector.multi_reduction <add>, %50, %cst_52 [0] : vector<16x32xf32> to vector<32xf32>
    %52 = vector.shape_cast %51 : vector<32xf32> to vector<1x32xf32>
    %cst_53 = arith.constant 1.600000e+01 : f32
    %53 = vector.broadcast %cst_53 : f32 to vector<1x32xf32>
    %54 = arith.divf %52, %53 : vector<1x32xf32>
    %55 = vector.broadcast %54 : vector<1x32xf32> to vector<16x32xf32>
    %56 = arith.subf %50, %55 : vector<16x32xf32>
    %57 = arith.mulf %56, %56 : vector<16x32xf32>
    %cst_54 = arith.constant dense<0.000000e+00> : vector<32xf32>
    %58 = vector.multi_reduction <add>, %57, %cst_54 [0] : vector<16x32xf32> to vector<32xf32>
    %59 = vector.shape_cast %58 : vector<32xf32> to vector<1x32xf32>
    %cst_55 = arith.constant 1.600000e+01 : f32
    %60 = vector.broadcast %cst_55 : f32 to vector<1x32xf32>
    %61 = arith.divf %59, %60 : vector<1x32xf32>
    %cst_56 = arith.constant 9.99999974E-6 : f32
    %62 = vector.broadcast %cst_56 : f32 to vector<1x32xf32>
    %63 = arith.addf %61, %62 : vector<1x32xf32>
    %64 = math.rsqrt %63 : vector<1x32xf32>
    %65 = vector.broadcast %64 : vector<1x32xf32> to vector<16x32xf32>
    %66 = arith.mulf %56, %65 : vector<16x32xf32>
    %c0_57 = arith.constant 0 : index
    %c0_58 = arith.constant 0 : index
    %67 = vector.load %arg3[%c0_57, %c0_58] : memref<16x32xf32, #tpu.memory_space<vmem>>, vector<16x32xf32>
    %cst_59 = arith.constant dense<0.000000e+00> : vector<32xf32>
    %68 = vector.multi_reduction <add>, %67, %cst_59 [0] : vector<16x32xf32> to vector<32xf32>
    %69 = vector.shape_cast %68 : vector<32xf32> to vector<1x32xf32>
    %cst_60 = arith.constant 1.600000e+01 : f32
    %70 = vector.broadcast %cst_60 : f32 to vector<1x32xf32>
    %71 = arith.divf %69, %70 : vector<1x32xf32>
    %72 = vector.broadcast %71 : vector<1x32xf32> to vector<16x32xf32>
    %73 = arith.subf %67, %72 : vector<16x32xf32>
    %74 = arith.mulf %73, %73 : vector<16x32xf32>
    %cst_61 = arith.constant dense<0.000000e+00> : vector<32xf32>
    %75 = vector.multi_reduction <add>, %74, %cst_61 [0] : vector<16x32xf32> to vector<32xf32>
    %76 = vector.shape_cast %75 : vector<32xf32> to vector<1x32xf32>
    %cst_62 = arith.constant 1.600000e+01 : f32
    %77 = vector.broadcast %cst_62 : f32 to vector<1x32xf32>
    %78 = arith.divf %76, %77 : vector<1x32xf32>
    %cst_63 = arith.constant 9.99999974E-6 : f32
    %79 = vector.broadcast %cst_63 : f32 to vector<1x32xf32>
    %80 = arith.addf %78, %79 : vector<1x32xf32>
    %81 = math.rsqrt %80 : vector<1x32xf32>
    %82 = vector.broadcast %81 : vector<1x32xf32> to vector<16x32xf32>
    %83 = arith.mulf %73, %82 : vector<16x32xf32>
    %c0_64 = arith.constant 0 : index
    %c0_65 = arith.constant 0 : index
    %84 = vector.load %arg4[%c0_64, %c0_65] : memref<32x32xbf16, #tpu.memory_space<vmem>>, vector<32x32xbf16>
    %c0_66 = arith.constant 0 : index
    %c0_67 = arith.constant 0 : index
    %85 = vector.load %arg5[%c0_66, %c0_67] : memref<1x32xf32, #tpu.memory_space<vmem>>, vector<1x32xf32>
    %86 = arith.truncf %66 : vector<16x32xf32> to vector<16x32xbf16>
    %cst_68 = arith.constant dense<0.000000e+00> : vector<16x32xf32>
    %87 = tpu.matmul %86, %84, %cst_68 {dimension_numbers = #tpu.dot_dimension_numbers<[1], [0], [0], [1], [0, 0, 1, 1], [], []>} : vector<16x32xbf16>, vector<32x32xbf16>, vector<16x32xf32> -> vector<16x32xf32>
    %88 = vector.broadcast %85 : vector<1x32xf32> to vector<16x32xf32>
    %89 = arith.addf %87, %88 : vector<16x32xf32>
    %90 = arith.truncf %83 : vector<16x32xf32> to vector<16x32xbf16>
    %cst_69 = arith.constant dense<0.000000e+00> : vector<16x32xf32>
    %91 = tpu.matmul %90, %84, %cst_69 {dimension_numbers = #tpu.dot_dimension_numbers<[1], [0], [0], [1], [0, 0, 1, 1], [], []>} : vector<16x32xbf16>, vector<32x32xbf16>, vector<16x32xf32> -> vector<16x32xf32>
    %92 = vector.broadcast %85 : vector<1x32xf32> to vector<16x32xf32>
    %93 = arith.addf %91, %92 : vector<16x32xf32>
    %94 = arith.truncf %89 : vector<16x32xf32> to vector<16x32xbf16>
    %95 = arith.truncf %89 : vector<16x32xf32> to vector<16x32xbf16>
    %cst_70 = arith.constant dense<0.000000e+00> : vector<16x16xf32>
    %96 = tpu.matmul %94, %95, %cst_70 {dimension_numbers = #tpu.dot_dimension_numbers<[1], [1], [0], [0], [0, 0, 1, 0], [], []>} : vector<16x32xbf16>, vector<16x32xbf16>, vector<16x16xf32> -> vector<16x16xf32>
    %cst_71 = arith.constant dense<0xFF800000> : vector<16xf32>
    %97 = vector.multi_reduction <maximumf>, %96, %cst_71 [1] : vector<16x16xf32> to vector<16xf32>
    %98 = vector.shape_cast %97 : vector<16xf32> to vector<16x1xf32>
    %99 = vector.broadcast %98 : vector<16x1xf32> to vector<16x16xf32>
    %100 = arith.subf %96, %99 : vector<16x16xf32>
    %101 = math.exp %100 : vector<16x16xf32>
    %cst_72 = arith.constant dense<0.000000e+00> : vector<16xf32>
    %102 = vector.multi_reduction <add>, %101, %cst_72 [1] : vector<16x16xf32> to vector<16xf32>
    %103 = vector.shape_cast %102 : vector<16xf32> to vector<16x1xf32>
    %104 = tpu.reciprocal %103 {approx = true} : vector<16x1xf32> -> vector<16x1xf32>
    %105 = vector.broadcast %104 : vector<16x1xf32> to vector<16x16xf32>
    %106 = arith.mulf %101, %105 : vector<16x16xf32>
    %107 = arith.truncf %106 : vector<16x16xf32> to vector<16x16xbf16>
    %108 = arith.truncf %93 : vector<16x32xf32> to vector<16x32xbf16>
    %cst_73 = arith.constant dense<0.000000e+00> : vector<16x32xf32>
    %109 = tpu.matmul %107, %108, %cst_73 {dimension_numbers = #tpu.dot_dimension_numbers<[1], [0], [0], [1], [0, 0, 1, 1], [], []>} : vector<16x16xbf16>, vector<16x32xbf16>, vector<16x32xf32> -> vector<16x32xf32>
    %cst_74 = arith.constant dense<0xFF800000> : vector<16xf32>
    %110 = vector.multi_reduction <maximumf>, %109, %cst_74 [1] : vector<16x32xf32> to vector<16xf32>
    %111 = vector.shape_cast %110 : vector<16xf32> to vector<16x1xf32>
    %112 = vector.broadcast %111 : vector<16x1xf32> to vector<16x32xf32>
    %113 = arith.subf %109, %112 : vector<16x32xf32>
    %114 = math.exp %113 : vector<16x32xf32>
    %cst_75 = arith.constant dense<0.000000e+00> : vector<16xf32>
    %115 = vector.multi_reduction <add>, %114, %cst_75 [1] : vector<16x32xf32> to vector<16xf32>
    %116 = vector.shape_cast %115 : vector<16xf32> to vector<16x1xf32>
    %117 = tpu.reciprocal %116 {approx = true} : vector<16x1xf32> -> vector<16x1xf32>
    %118 = vector.broadcast %117 : vector<16x1xf32> to vector<16x32xf32>
    %119 = arith.mulf %114, %118 : vector<16x32xf32>
    %120 = arith.mulf %119, %93 : vector<16x32xf32>
    %121 = arith.addf %120, %89 : vector<16x32xf32>
    %122 = arith.addf %121, %93 : vector<16x32xf32>
    %c0_76 = arith.constant 0 : index
    %c0_77 = arith.constant 0 : index
    %123 = vector.load %arg1[%c0_76, %c0_77] : memref<16x16xf32, #tpu.memory_space<vmem>>, vector<16x16xf32>
    %c0_78 = arith.constant 0 : index
    %c0_79 = arith.constant 0 : index
    %124 = vector.load %arg6[%c0_78, %c0_79] : memref<32x32xbf16, #tpu.memory_space<vmem>>, vector<32x32xbf16>
    %c0_80 = arith.constant 0 : index
    %c0_81 = arith.constant 0 : index
    %125 = vector.load %arg7[%c0_80, %c0_81] : memref<1x32xf32, #tpu.memory_space<vmem>>, vector<1x32xf32>
    %cst_82 = arith.constant dense<0.000000e+00> : vector<32xf32>
    %126 = vector.multi_reduction <add>, %122, %cst_82 [0] : vector<16x32xf32> to vector<32xf32>
    %127 = vector.shape_cast %126 : vector<32xf32> to vector<1x32xf32>
    %cst_83 = arith.constant 1.600000e+01 : f32
    %128 = vector.broadcast %cst_83 : f32 to vector<1x32xf32>
    %129 = arith.divf %127, %128 : vector<1x32xf32>
    %130 = vector.broadcast %129 : vector<1x32xf32> to vector<16x32xf32>
    %131 = arith.subf %122, %130 : vector<16x32xf32>
    %132 = arith.mulf %131, %131 : vector<16x32xf32>
    %cst_84 = arith.constant dense<0.000000e+00> : vector<32xf32>
    %133 = vector.multi_reduction <add>, %132, %cst_84 [0] : vector<16x32xf32> to vector<32xf32>
    %134 = vector.shape_cast %133 : vector<32xf32> to vector<1x32xf32>
    %cst_85 = arith.constant 1.600000e+01 : f32
    %135 = vector.broadcast %cst_85 : f32 to vector<1x32xf32>
    %136 = arith.divf %134, %135 : vector<1x32xf32>
    %cst_86 = arith.constant 9.99999974E-6 : f32
    %137 = vector.broadcast %cst_86 : f32 to vector<1x32xf32>
    %138 = arith.addf %136, %137 : vector<1x32xf32>
    %139 = math.rsqrt %138 : vector<1x32xf32>
    %140 = vector.broadcast %139 : vector<1x32xf32> to vector<16x32xf32>
    %141 = arith.mulf %131, %140 : vector<16x32xf32>
    %142 = arith.truncf %141 : vector<16x32xf32> to vector<16x32xbf16>
    %cst_87 = arith.constant dense<0.000000e+00> : vector<16x32xf32>
    %143 = tpu.matmul %142, %124, %cst_87 {dimension_numbers = #tpu.dot_dimension_numbers<[1], [0], [0], [1], [0, 0, 1, 1], [], []>} : vector<16x32xbf16>, vector<32x32xbf16>, vector<16x32xf32> -> vector<16x32xf32>
    %144 = vector.broadcast %125 : vector<1x32xf32> to vector<16x32xf32>
    %145 = arith.addf %143, %144 : vector<16x32xf32>
    %cst_88 = arith.constant dense<0.000000e+00> : vector<16xf32>
    %146 = vector.multi_reduction <add>, %123, %cst_88 [1] : vector<16x16xf32> to vector<16xf32>
    %147 = vector.shape_cast %146 : vector<16xf32> to vector<16x1xf32>
    %cst_89 = arith.constant 1.000000e+00 : f32
    %148 = vector.broadcast %cst_89 : f32 to vector<16x1xf32>
    %149 = arith.addf %147, %148 : vector<16x1xf32>
    %150 = math.rsqrt %149 : vector<16x1xf32>
    %151 = arith.truncf %123 : vector<16x16xf32> to vector<16x16xbf16>
    %152 = vector.broadcast %150 : vector<16x1xf32> to vector<16x32xf32>
    %153 = arith.mulf %152, %145 : vector<16x32xf32>
    %154 = arith.truncf %153 : vector<16x32xf32> to vector<16x32xbf16>
    %cst_90 = arith.constant dense<0.000000e+00> : vector<16x32xf32>
    %155 = tpu.matmul %151, %154, %cst_90 {dimension_numbers = #tpu.dot_dimension_numbers<[1], [0], [0], [1], [0, 0, 1, 1], [], []>} : vector<16x16xbf16>, vector<16x32xbf16>, vector<16x32xf32> -> vector<16x32xf32>
    %156 = vector.broadcast %150 : vector<16x1xf32> to vector<16x32xf32>
    %157 = arith.mulf %156, %155 : vector<16x32xf32>
    %158 = arith.mulf %150, %150 : vector<16x1xf32>
    %159 = vector.broadcast %158 : vector<16x1xf32> to vector<16x32xf32>
    %160 = arith.mulf %159, %145 : vector<16x32xf32>
    %161 = arith.addf %157, %160 : vector<16x32xf32>
    %cst_91 = arith.constant 0.000000e+00 : f32
    %162 = vector.broadcast %cst_91 : f32 to vector<16x32xf32>
    %163 = arith.cmpf oge, %161, %162 : vector<16x32xf32>
    %cst_92 = arith.constant 0.00999999977 : f32
    %164 = vector.broadcast %cst_92 : f32 to vector<16x32xf32>
    %165 = arith.mulf %164, %161 : vector<16x32xf32>
    %166 = arith.select %163, %161, %165 : vector<16x32xi1>, vector<16x32xf32>
    %c0_93 = arith.constant 0 : index
    %c0_94 = arith.constant 0 : index
    %167 = vector.load %arg8[%c0_93, %c0_94] : memref<16x32xf32, #tpu.memory_space<vmem>>, vector<16x32xf32>
    tpu.vector_store %arg8[%c0_93, %c0_94], %166 {strides = array<i32>} : memref<16x32xf32, #tpu.memory_space<vmem>>, vector<16x32xf32>,
    return
  }
}

</mosaic_0001>

<bundles_post_ra>
// kernel: graph_unet_forward.5
= control target key start
LH: loop header
LB: loop body
LE: loop exit
PB: predicated region body
PF: predicated region fallthrough
CT: control target
= control target key end

     0   :  { %18 = vsyncpa [#allocation5], 0  ;;  %s837_s0 = inlined_call_operand.vmem [shape: f32[16,16], index: 0, kind: input, shape index: {}]   ;;  %s838_s1 = inlined_call_operand.vmem [shape: f32[16,32], index: 1, kind: input, shape index: {}]   ;;  %s839_s2 = inlined_call_operand.hbm [shape: bf16[32,32], index: 2, kind: input, shape index: {}]   ;;  %s840_s3 = inlined_call_operand.vmem [shape: f32[1,32], index: 3, kind: input, shape index: {}]   ;;  %s841_s4 = inlined_call_operand.hbm [shape: f32[1,32], index: 4, kind: input, shape index: {}]   ;;  %s842_s5 = inlined_call_operand.<no memory space> [shape: f32[1,1], index: 5, kind: input, shape index: {}]   ;;  %s843_s6 = inlined_call_operand.<no memory space> [shape: f32[1,1], index: 6, kind: input, shape index: {}]   ;;  %s844_s7 = inlined_call_operand.vmem [shape: f32[16,32], index: 7, kind: output, shape index: {0}]   ;;  %s845_s8 = inlined_call_operand.vmem [shape: f32[16,128], index: 8, kind: output, shape index: {1}]   ;;  %s846_s9 = inlined_call_operand.vmem [shape: f32[16,32], index: 9, kind: output, shape index: {2}]   ;;  %s847_s10 = inlined_call_operand.vmem [shape: f32[16,16], index: 10, kind: output, shape index: {3}]  }
   0x1   :  { %19 = vsyncpa [#allocation7], 0  ;;  %s625_s13 = smov [#allocation4]  }
   0x2   :  { %s29_s14 = sshll.u32 %s625_s13, 4  ;;  %s30_s14 = int_to_ptr.vmem [resolvable:$true] %s29_s14 }
   0x3   :  { %s589_s15 = scalar_lea.vmem %s30_s14, 256  ;;  %p594_p1 = scmp.lt.s32.totalorder %s30_s14, %s30_s14 }
   0x4   :  { %p590_p0 = scmp.ne.s32.totalorder %s30_s14, %s589_s15  ;;  %p595_p2 = scmp.lt.s32.totalorder %s589_s15, %s589_s15 }
   0x6   :  { %p596_p3 = por %p595_p2, %p594_p1 }
   0x8   :  { %p597_p4 = pnand %p596_p3, %p590_p0 }
   0xa   :  { %600 = shalt.err (!%p597_p4)
}
   0xb   :  { %s626_s16 = smov 64   ;;  %s627_s17 = smov 4  }
   0xc   :  { %35 = dma.hbm_to_vmem [thread:$0]  %s839_s2, 256, %s30_s14, [#allocation5], %s626_s16, %s626_s16, %s627_s17  }
   0xd   :  { %s628_s20 = smov [#allocation6]  }
   0xe   :  { %s44_s21 = sshll.u32 %s628_s20, 4  ;;  %s45_s21 = int_to_ptr.vmem [resolvable:$true] %s44_s21 }
   0xf   :  { %s609_s22 = scalar_lea.vmem %s45_s21, 16  ;;  %s613_s23 = scalar_lea.vmem %s45_s21, 32 }
  0x10   :  { %p610_p5 = scmp.ne.s32.totalorder %s45_s21, %s609_s22  ;;  %p614_p6 = scmp.lt.s32.totalorder %s45_s21, %s45_s21 }
  0x11   :  { %p615_p7 = scmp.lt.s32.totalorder %s613_s23, %s609_s22 }
  0x13   :  { %p616_p8 = por %p615_p7, %p614_p6 }
  0x15   :  { %p617_p9 = pnand %p616_p8, %p610_p5 }
  0x17   :  { %620 = shalt.err (!%p617_p9)
}
  0x18   :  { %47 = dma.hbm_to_vmem [thread:$0]  %s841_s4, 16, %s45_s21, [#allocation7]  }
  0x19   :  { %621 = dma.done.wait [#allocation5], 256  }
  0x1a   :  { %622 = vsyncadd [#allocation5], 4294967040 }
  0x1b   :  { %623 = dma.done.wait [#allocation7], 16  }
  0x1c   :  { %624 = vsyncadd [#allocation7], 4294967280  ;;  %v629_v0 = vmov 0.0   ;;  %vm630_vm0 = vmmov 0   ;;  %vm68_vm1 = vcmask 261120   ;;  %v549_v1 = vld [vmem:[#allocation4 + $0x8] sm:$0xff]  }
  0x1d   :  { %516 = vmatprep.subr.bf16.mxu0 %v629_v0  ;;  %520 = vmatprep.mubr.msk.bf16.mxu0 %vm630_vm0, %v629_v0  ;;  %vm161_vm2 = vcmask 130048   ;;  %v550_v2 = vld [vmem:[#allocation4] sm:$0xff]   ;;  %v62_v4 = vld [vmem:[%s838_s1 + $0x8] sm:$0xff]  ;;  %s404_s20 = ssub.f32 1.0, %s843_s6 }
  0x1e   :  { %524 = vmatprep.subr.bf16.mxu1 %v629_v0  ;;  %526 = vmatprep.mubr.msk.bf16.mxu1 %vm630_vm0, %v629_v0  ;;  %v61_v3 = vld [vmem:[%s838_s1] sm:$0xff]  ;;  %v70_v7 = vsel %vm68_vm1, %v62_v4, 0.0  ;;  %v719_v9 = vld [vmem:[%s837_s0 + $0x8] sm:$0xff] }
  0x1f   :  { %517 = vmatpush3.bf16.msra.mxu0 %v549_v1  ;;  %v708_v5 = vld [vmem:[%s837_s0] sm:$0xff]  ;;  %v69_v6 = vsel %vm68_vm1, %v61_v3, 0.0  ;;  %v165_v13 = vsel %vm161_vm2, %v719_v9, 0.0  ;;  %vm413_vm4 = vcmp.ne.f32.partialorder %v719_v9, 0.0 }
  0x20   :  { %518 = vmatprep.subr.bf16.mxu0 %v629_v0  ;;  %v162_v8 = vsel %vm161_vm2, %v708_v5, 0.0  ;;  %vm412_vm3 = vcmp.ne.f32.partialorder %v708_v5, 0.0  ;;  %v71_v10 = vadd.f32 %v70_v7, %v69_v6  ;;  %v728_v12 = vpack.c.bf16 %v719_v9, %v708_v5  ;;  %v493_v46 = vld [vmem:[%s840_s3] ss:$0 sm:$0xff] }
  0x21   :  { %v724_v11 = vsel %vm412_vm3, 1.0, %v629_v0  ;;  %163 = vadd.xlane.f32.xlu0 %v162_v8  ;;  %v736_v15 = vsel %vm413_vm4, 1.0, %v629_v0  ;;  %vm502_vm7 = vmpackc.low %vm413_vm4, %vm412_vm3 }
  0x22   :  { %v72_v14 = vrot.slane %v71_v10, 4  ;;  %v418_v16 = vpack.c.bf16 %v736_v15, %v724_v11 }
  0x23   :  { %519 = vmatpush3.bf16.msra.mxu0 %v550_v2 }
  0x24   :  { %536 = vmatprep.subr.bf16.mxu0 %v629_v0  ;;  %v73_v17 = vadd.f32 %v72_v14, %v71_v10 }
  0x25   :  { %166 = vadd.xlane.f32.xlu0 %v165_v13 }
  0x26   :  { %v74_v18 = vrot.slane %v73_v17, 2 }
  0x28   :  { %v75_v19 = vadd.f32 %v74_v18, %v73_v17 }
  0x2a   :  { %v76_v20 = vrot.slane %v75_v19, 1 }
  0x2c   :  { %v77_v21 = vadd.f32 %v76_v20, %v75_v19 }
  0x2e   :  { %v79_v22 = vmul.f32 0.0625, %v77_v21 }
  0x30   :  { %v80_v23 = vsub.f32 %v61_v3, %v79_v22  ;;  %v81_v24 = vsub.f32 %v62_v4, %v79_v22 }
  0x32   :  { %v82_v25 = vmul.f32 %v80_v23, %v80_v23  ;;  %v83_v26 = vmul.f32 %v81_v24, %v81_v24 }
  0x34   :  { %v84_v27 = vsel %vm68_vm1, %v82_v25, 0.0  ;;  %v85_v28 = vsel %vm68_vm1, %v83_v26, 0.0 }
  0x35   :  { %v86_v29 = vadd.f32 %v85_v28, %v84_v27 }
  0x37   :  { %v87_v30 = vrot.slane %v86_v29, 4 }
  0x39   :  { %v88_v31 = vadd.f32 %v87_v30, %v86_v29 }
  0x3b   :  { %v89_v32 = vrot.slane %v88_v31, 2 }
  0x3d   :  { %v90_v33 = vadd.f32 %v89_v32, %v88_v31 }
  0x3f   :  { %v91_v34 = vrot.slane %v90_v33, 1 }
  0x41   :  { %v92_v35 = vadd.f32 %v91_v34, %v90_v33 }
  0x43   :  { %v93_v36 = vmul.f32 0.0625, %v92_v35 }
  0x45   :  { %v94_v37 = vadd.f32 1e-05, %v93_v36 }
  0x47   :  { %551 = vrsqrt.f32 %v94_v37 }
  0x54   :  { %v552_v38 = vpop.eup %551 }
  0x55   :  { %v96_v39 = vmul.f32 %v552_v38, %v80_v23  ;;  %v97_v40 = vmul.f32 %v552_v38, %v81_v24 }
  0x57   :  { %v98_v41 = vpack.c.bf16 %v97_v40, %v96_v39 }
  0x59   :  { %521 = vmatmul.mubr.msk.bf16.vlgmr.msra.gmra.mxu0 %vm68_vm1, %v98_v41 }
  0x5a   :  { %538 = vmatprep.mubr.msk.bf16.mxu0 %vm630_vm0, %v629_v0 }
  0xaa   :  { %v746_v42 = vpop.xlane.xlu0 %163 }
  0xab   :  { %v168_v44 = vadd.f32 1.0, %v746_v42 }
  0xad   :  { %553 = vrsqrt.f32 %v168_v44 }
  0xae   :  { %v748_v43 = vpop.xlane.xlu0 %166 }
  0xaf   :  { %v169_v45 = vadd.f32 1.0, %v748_v43 }
  0xb1   :  { %555 = vrsqrt.f32 %v169_v45 }
  0xba   :  { %v554_v51 = vpop.eup %553 }
  0xbb   :  { %v222_v58 = vmul.f32 %v554_v51, %v554_v51 }
  0xbe   :  { %v556_v53 = vpop.eup %555 }
  0xbf   :  { %v223_v61 = vmul.f32 %v556_v53, %v556_v53 }
 0x119   :  { %v154_v47 = vpop.f32.mrf.mxu0 }
 0x11a   :  { %v155_v49 = vadd.f32 %v493_v46, %v154_v47 }
 0x11b   :  { %v522_v48 = vpop.f32.mrf.mxu0 }
 0x11c   :  { %v173_v55 = vmul.f32 %v554_v51, %v155_v49  ;;  %v224_v60 = vmul.f32 %v222_v58, %v155_v49  ;;  %v631_v48 = vmov 1.0|1.0  }
 0x11d   :  { %v157_v50 = vpop.f32.mrf.mxu0  ;;  %537 = vmatpush3.bf16.msk.msra.mxu0 %vm502_vm7, %v631_v48 }
 0x11e   :  { %v158_v52 = vadd.f32 %v493_v46, %v157_v50 }
 0x11f   :  { %v523_v54 = vpop.f32.mrf.mxu0 }
 0x120   :  { %v174_v56 = vmul.f32 %v556_v53, %v158_v52  ;;  %v225_v3 = vmul.f32 %v223_v61, %v158_v52  ;;  %539 = vmatmul.mubr.msk.bf16.vlgmr.msra.gmra.mxu0 %vm161_vm2, %v418_v16  ;;  %v499_v52 = vld [vmem:[#allocation6] ss:$0 sm:$0xff] }
 0x122   :  { %v175_v57 = vpack.c.bf16 %v174_v56, %v173_v55 }
 0x124   :  { %525 = vmatpush3.bf16.msra.mxu1 %v175_v57 }
 0x125   :  { %530 = vmatprep.subr.bf16.mxu1 %v629_v0 }
 0x127   :  { %527 = vmatmul.mubr.msk.bf16.vlgmr.msra.gmra.mxu1 %vm161_vm2, %v728_v12 }
 0x128   :  { %532 = vmatprep.mubr.msk.bf16.mxu1 %vm630_vm0, %v629_v0 }
 0x1e7   :  { %v213_v59 = vpop.f32.mrf.mxu1 }
 0x1e8   :  { %v220_v62 = vmul.f32 %v554_v51, %v213_v59 }
 0x1e9   :  { %v528_v63 = vpop.f32.mrf.mxu1 }
 0x1ea   :  { %v226_v1 = vadd.f32 %v224_v60, %v220_v62 }
 0x1eb   :  { %v216_v2 = vpop.f32.mrf.mxu1 }
 0x1ec   :  { %vm228_vm5 = vcmp.ge.f32.partialorder %v226_v1, 0.0  ;;  %v230_v4 = vmul.f32 0.01, %v226_v1  ;;  %v221_v6 = vmul.f32 %v556_v53, %v216_v2 }
 0x1ed   :  { %v529_v7 = vpop.f32.mrf.mxu1 }
 0x1ee   :  { %v232_v8 = vsel %vm228_vm5, %v226_v1, %v230_v4  ;;  %v227_v10 = vadd.f32 %v225_v3, %v221_v6  ;;  %v456_v3 = vpop.f32.mrf.mxu0 }
 0x1ef   :  { %234 = vst.msk [vmem:[%s844_s7] sm:$0xff] %vm68_vm1, %v232_v8  ;;  %v239_v17 = vsel %vm68_vm1, %v232_v8, 0.0  ;;  %vm463_vm8 = vcmp.ne.f32.partialorder %v456_v3, 0.0 }
 0x1f0   :  { %vm229_vm6 = vcmp.ge.f32.partialorder %v227_v10, 0.0  ;;  %v231_v13 = vmul.f32 0.01, %v227_v10  ;;  %v540_v4 = vpop.f32.mrf.mxu0 }
 0x1f2   :  { %v233_v14 = vsel %vm229_vm6, %v227_v10, %v231_v13  ;;  %v459_v6 = vpop.f32.mrf.mxu0 }
 0x1f3   :  { %235 = vst.msk [vmem:[%s844_s7 + $0x8] sm:$0xff] %vm68_vm1, %v233_v14  ;;  %v240_v18 = vsel %vm68_vm1, %v233_v14, 0.0  ;;  %vm464_vm9 = vcmp.ne.f32.partialorder %v459_v6, 0.0  ;;  %v401_v6 = vstv %s843_s6 }
 0x1f4   :  { %v241_v19 = vadd.f32 %v240_v18, %v239_v17  ;;  %v541_v7 = vpop.f32.mrf.mxu0  ;;  %v506_v10 = vsel %vm464_vm9, 1.0, %v629_v0 }
 0x1f5   :  { %472 = vst.msk [vmem:[%s847_s10 + $0x8] sm:$0xff] %vm161_vm2, %v506_v10  ;;  %v405_v7 = vstv %s404_s20 }
 0x1f6   :  { %v242_v20 = vrot.slane %v241_v19, 4 }
 0x1f8   :  { %v243_v21 = vadd.f32 %v242_v20, %v241_v19 }
 0x1fa   :  { %v244_v22 = vrot.slane %v243_v21, 2 }
 0x1fc   :  { %v245_v23 = vadd.f32 %v244_v22, %v243_v21 }
 0x1fe   :  { %v246_v24 = vrot.slane %v245_v23, 1 }
 0x200   :  { %v247_v25 = vadd.f32 %v246_v24, %v245_v23 }
 0x202   :  { %v248_v26 = vmul.f32 0.0625, %v247_v25 }
 0x204   :  { %v249_v27 = vsub.f32 %v232_v8, %v248_v26  ;;  %v250_v28 = vsub.f32 %v233_v14, %v248_v26  ;;  %v505_v8 = vsel %vm463_vm8, 1.0, %v629_v0  ;;  %v347_v14 = vstv %s842_s5 }
 0x205   :  { %471 = vst.msk [vmem:[%s847_s10] sm:$0xff] %vm161_vm2, %v505_v8 }
 0x206   :  { %v251_v29 = vmul.f32 %v249_v27, %v249_v27  ;;  %v252_v30 = vmul.f32 %v250_v28, %v250_v28 }
 0x208   :  { %v253_v31 = vsel %vm68_vm1, %v251_v29, 0.0  ;;  %v254_v32 = vsel %vm68_vm1, %v252_v30, 0.0 }
 0x209   :  { %v255_v33 = vadd.f32 %v254_v32, %v253_v31 }
 0x20b   :  { %v256_v34 = vrot.slane %v255_v33, 4 }
 0x20d   :  { %v257_v35 = vadd.f32 %v256_v34, %v255_v33 }
 0x20f   :  { %v258_v36 = vrot.slane %v257_v35, 2 }
 0x211   :  { %v259_v37 = vadd.f32 %v258_v36, %v257_v35 }
 0x213   :  { %v260_v38 = vrot.slane %v259_v37, 1 }
 0x215   :  { %v261_v39 = vadd.f32 %v260_v38, %v259_v37 }
 0x217   :  { %v262_v40 = vmul.f32 0.0625, %v261_v39 }
 0x219   :  { %v263_v41 = vadd.f32 1e-05, %v262_v40 }
 0x21b   :  { %557 = vrsqrt.f32 %v263_v41 }
 0x21c   :  { %559 = vrcp.f32 %v746_v42 }
 0x21d   :  { %561 = vrcp.f32 %v748_v43 }
 0x228   :  { %v558_v44 = vpop.eup %557 }
 0x229   :  { %v772_v45 = vmul.f32 %v558_v44, %v249_v27  ;;  %v774_v46 = vmul.f32 %v558_v44, %v250_v28  ;;  %v560_v49 = vpop.eup %559 }
 0x22a   :  { %v562_v53 = vpop.eup %561 }
 0x22b   :  { %v267_v47 = vpack.c.bf16 %v774_v46, %v772_v45  ;;  %v383_v59 = vmul.f32 %v499_v52, %v772_v45  ;;  %v384_v1 = vmul.f32 %v499_v52, %v774_v46 }
 0x22d   :  { %531 = vmatpush3.bf16.msra.mxu1 %v267_v47  ;;  %v385_v62 = vsel %vm68_vm1, %v383_v59, 0.0  ;;  %v388_v2 = vsel %vm68_vm1, %v384_v1, 0.0 }
 0x230   :  { %533 = vmatmul.mubr.msk.bf16.vlgmr.msra.gmra.mxu1 %vm161_vm2, %v728_v12 }
 0x2f0   :  { %v302_v50 = vpop.f32.mrf.mxu1 }
 0x2f1   :  { %v310_v51 = vmul.f32 %v560_v49, %v302_v50 }
 0x2f2   :  { %v534_v12 = vpop.f32.mrf.mxu1 }
 0x2f3   :  { %v313_v5 = vsub.f32 %v772_v45, %v310_v51  ;;  %v339_v9 = vmul.f32 %v499_v52, %v310_v51 }
 0x2f4   :  { %v305_v54 = vpop.f32.mrf.mxu1 }
 0x2f5   :  { %v312_v55 = vmul.f32 %v562_v53, %v305_v54  ;;  %v341_v56 = vsel %vm68_vm1, %v339_v9, 0.0  ;;  %v315_v11 = vand.u32 2147483647, %v313_v5 }
 0x2f6   :  { %342 = vadd.xlane.f32.xlu1 %v341_v56  ;;  %v535_v15 = vpop.f32.mrf.mxu1 }
 0x2f7   :  { %v314_v16 = vsub.f32 %v774_v46, %v312_v55  ;;  %v317_v57 = vsel %vm68_vm1, %v315_v11, 0.0  ;;  %v340_v58 = vmul.f32 %v499_v52, %v312_v55 }
 0x2f8   :  { %318 = vadd.xlane.f32.xlu0 %v317_v57 }
 0x2f9   :  { %v344_v60 = vsel %vm68_vm1, %v340_v58, 0.0  ;;  %v316_v61 = vand.u32 2147483647, %v314_v16 }
 0x2fa   :  { %345 = vadd.xlane.f32.xlu1 %v344_v60 }
 0x2fb   :  { %v320_v63 = vsel %vm68_vm1, %v316_v61, 0.0 }
 0x2fc   :  { %386 = vadd.xlane.f32.xlu0 %v385_v62 }
 0x2fe   :  { %321 = vadd.xlane.f32.xlu1 %v320_v63 }
 0x302   :  { %389 = vadd.xlane.f32.xlu1 %v388_v2 }
 0x37f   :  { %v343_v13 = vpop.xlane.xlu1 %342 }
 0x380   :  { %v348_v18 = vadd.f32 %v347_v14, %v343_v13 }
 0x381   :  { %v319_v30 = vpop.xlane.xlu0 %318 }
 0x382   :  { %v323_v34 = vadd.f32 %v319_v30, %v746_v42 }
 0x383   :  { %v346_v17 = vpop.xlane.xlu1 %345 }
 0x384   :  { %v349_v19 = vadd.f32 %v347_v14, %v346_v17  ;;  %v325_v38 = vmul.f32 0.5, %v323_v34 }
 0x385   :  { %v387_v49 = vpop.xlane.xlu0 %386 }
 0x386   :  { %v350_v20 = vmax.f32 %v348_v18, %v349_v19  ;;  %v391_v51 = vadd.f32 %v387_v49, %v347_v14 }
 0x387   :  { %v322_v31 = vpop.xlane.xlu1 %321 }
 0x388   :  { %v351_v0 = vrot.slane %v350_v20, 4  ;;  %v324_v36 = vadd.f32 %v322_v31, %v748_v43  ;;  %v393_v5 = vmul.f32 0.5, %v391_v51 }
 0x38a   :  { %v352_v21 = vmax.f32 %v350_v20, %v351_v0  ;;  %v326_v40 = vmul.f32 0.5, %v324_v36 }
 0x38b   :  { %v390_v50 = vpop.xlane.xlu1 %389 }
 0x38c   :  { %v353_v22 = vrot.slane %v352_v21, 2  ;;  %v392_v42 = vadd.f32 %v390_v50, %v347_v14 }
 0x38e   :  { %v354_v23 = vmax.f32 %v352_v21, %v353_v22  ;;  %v394_v53 = vmul.f32 0.5, %v392_v42 }
 0x390   :  { %v355_v24 = vrot.slane %v354_v23, 1 }
 0x392   :  { %v356_v25 = vmax.f32 %v354_v23, %v355_v24 }
 0x394   :  { %v357_v26 = vsub.f32 %v348_v18, %v356_v25  ;;  %v358_v27 = vsub.f32 %v349_v19, %v356_v25 }
 0x396   :  { %v359_v28 = vmul.f32 1.442695, %v357_v26  ;;  %v361_v29 = vmul.f32 1.442695, %v358_v27 }
 0x398   :  { %563 = vpow2.f32 %v359_v28 }
 0x399   :  { %565 = vpow2.f32 %v361_v29 }
 0x39a   :  { %567 = vtanh.f32 %v325_v38 }
 0x39b   :  { %569 = vtanh.f32 %v326_v40 }
 0x3a5   :  { %v564_v32 = vpop.eup %563 }
 0x3a6   :  { %v566_v33 = vpop.eup %565 }
 0x3a7   :  { %v363_v35 = vadd.f32 %v566_v33, %v564_v32  ;;  %v568_v12 = vpop.eup %567 }
 0x3a8   :  { %v570_v52 = vpop.eup %569  ;;  %v329_v9 = vmul.f32 0.5, %v568_v12 }
 0x3a9   :  { %v364_v37 = vrot.slane %v363_v35, 4  ;;  %v330_v43 = vmul.f32 0.5, %v570_v52 }
 0x3aa   :  { %v331_v55 = vadd.f32 0.5, %v329_v9 }
 0x3ab   :  { %v365_v39 = vadd.f32 %v364_v37, %v363_v35  ;;  %v332_v15 = vadd.f32 0.5, %v330_v43 }
 0x3ad   :  { %v366_v41 = vrot.slane %v365_v39, 2 }
 0x3af   :  { %v367_v44 = vadd.f32 %v366_v41, %v365_v39 }
 0x3b1   :  { %v368_v47 = vrot.slane %v367_v44, 1 }
 0x3b3   :  { %v369_v48 = vadd.f32 %v368_v47, %v367_v44 }
 0x3b5   :  { %571 = vrcp.f32 %v369_v48 }
 0x3b6   :  { %573 = vtanh.f32 %v393_v5 }
 0x3b7   :  { %575 = vtanh.f32 %v394_v53 }
 0x3c2   :  { %v572_v54 = vpop.eup %571 }
 0x3c3   :  { %v371_v56 = vmul.f32 %v572_v54, %v564_v32  ;;  %v372_v11 = vmul.f32 %v572_v54, %v566_v33  ;;  %v574_v60 = vpop.eup %573 }
 0x3c4   :  { %v576_v61 = vpop.eup %575  ;;  %v397_v62 = vmul.f32 0.5, %v574_v60 }
 0x3c5   :  { %v373_v16 = vadd.f32 %v371_v56, %v331_v55  ;;  %v374_v57 = vadd.f32 %v372_v11, %v332_v15  ;;  %v398_v63 = vmul.f32 0.5, %v576_v61 }
 0x3c6   :  { %v399_v4 = vadd.f32 0.5, %v397_v62 }
 0x3c7   :  { %v375_v58 = vmul.f32 0.5, %v373_v16  ;;  %v376_v59 = vmul.f32 0.5, %v374_v57  ;;  %v400_v10 = vadd.f32 0.5, %v398_v63 }
 0x3c8   :  { %v406_v18 = vmul.f32 %v405_v7, %v399_v4 }
 0x3c9   :  { %577 = vtanh.f32 %v375_v58  ;;  %v407_v20 = vmul.f32 %v405_v7, %v400_v10 }
 0x3ca   :  { %579 = vtanh.f32 %v376_v59 }
 0x3d6   :  { %v578_v1 = vpop.eup %577 }
 0x3d7   :  { %v580_v2 = vpop.eup %579  ;;  %v379_v3 = vmul.f32 0.5, %v578_v1 }
 0x3d8   :  { %v380_v8 = vmul.f32 0.5, %v580_v2 }
 0x3d9   :  { %v381_v13 = vadd.f32 0.5, %v379_v3 }
 0x3da   :  { %v382_v14 = vadd.f32 0.5, %v380_v8 }
 0x3db   :  { %v402_v17 = vmul.f32 %v401_v6, %v381_v13 }
 0x3dc   :  { %v403_v19 = vmul.f32 %v401_v6, %v382_v14 }
 0x3dd   :  { %v408_v0 = vadd.f32 %v406_v18, %v402_v17 }
 0x3de   :  { %v409_v21 = vadd.f32 %v407_v20, %v403_v19 }
 0x3df   :  { %v410_v22 = vmul.f32 %v408_v0, %v772_v45  ;;  %473 = vst [vmem:[%s845_s8] sm:$0xff] %v408_v0 }
 0x3e0   :  { %v411_v23 = vmul.f32 %v409_v21, %v774_v46  ;;  %474 = vst [vmem:[%s845_s8 + $0x8] sm:$0xff] %v409_v21 }
 0x3e1   :  { %469 = vst.msk [vmem:[%s846_s9] sm:$0xff] %vm68_vm1, %v410_v22 }
 0x3e2   :  { %470 = vst.msk [vmem:[%s846_s9 + $0x8] sm:$0xff] %vm68_vm1, %v411_v23 }
 0x3e3   :  { %491 = vsyncpa [#allocation5], 1 }
 0x3e4   :  { %492 = vsyncpa [#allocation7], 1 }

// kernel: graph_unet_forward.7
= control target key start
LH: loop header
LB: loop body
LE: loop exit
PB: predicated region body
PF: predicated region fallthrough
CT: control target
= control target key end

     0   :  { %11 = vsyncpa [#allocation4], 0  ;;  %s597_s0 = inlined_call_operand.vmem [shape: s32[1,6], index: 0, kind: input, shape index: {}, may-alias: {0,1}]   ;;  %s598_s1 = inlined_call_operand.vmem [shape: s32[1,6], index: 1, kind: input, shape index: {}, may-alias: {0,1}]   ;;  %s599_s2 = inlined_call_operand.vmem [shape: f32[12,12], index: 2, kind: input, shape index: {}]   ;;  %s600_s3 = inlined_call_operand.vmem [shape: f32[12,32], index: 3, kind: input, shape index: {}]   ;;  %s601_s4 = inlined_call_operand.vmem [shape: bf16[32,32], index: 4, kind: input, shape index: {}]   ;;  %s602_s5 = inlined_call_operand.vmem [shape: f32[1,32], index: 5, kind: input, shape index: {}]   ;;  %s603_s6 = inlined_call_operand.vmem [shape: f32[6,32], index: 6, kind: output, shape index: {}]  }
   0x1   :  { %s18_s23 = sshll.u32 %s597_s0, 4  ;;  %s19_s23 = int_to_ptr.vmem [resolvable:$true] %s18_s23 }
   0x2   :  { %s465_s24 = scalar_lea.vmem %s19_s23, 16  ;;  %p470_p1 = scmp.lt.s32.totalorder %s19_s23, %s19_s23 }
   0x3   :  { %p466_p0 = scmp.ne.s32.totalorder %s19_s23, %s465_s24  ;;  %p471_p2 = scmp.lt.s32.totalorder %s465_s24, %s465_s24 }
   0x5   :  { %p472_p3 = por %p471_p2, %p470_p1 }
   0x7   :  { %p473_p4 = pnand %p472_p3, %p466_p0 }
   0x9   :  { %476 = shalt.err (!%p473_p4)
}
   0xa   :  { %s479_s25 = smov [#allocation3]  }
   0xb   :  { %21 = dma.vmem_to_smem %s19_s23, 16, %s479_s25, [#allocation4]  }
   0xc   :  { %477 = dma.done.wait [#allocation4], 16  }
   0xd   :  { %478 = vsyncadd [#allocation4], 4294967280 }
   0xe   :  { %35 = sfence }
   0xf   :  { %v116_v0 = vlaneseq  ;;  %v65_v1 = vld [vmem:[%s600_s3] sm:$0xff]  ;;  %v480_v2 = vmov 0.0   ;;  %vm481_vm0 = vmmov 0   ;;  %s38_s29 = sld [smem:[#allocation3]]  ;;  %v66_v4 = vld [vmem:[%s600_s3 + $0x8] sm:$0xf] }
  0x10   :  { %427 = vmatprep.subr.bf16.mxu1 %v480_v2  ;;  %v400_v3 = vld [vmem:[%s598_s1] ss:$0 sm:$0xff]  ;;  %429 = vmatprep.mubr.msk.bf16.mxu1 %vm481_vm0, %v480_v2  ;;  %vm72_vm1 = vcmask 1045504   ;;  %s394_s8 = sld [smem:[#allocation3 + $0x1]]  ;;  %v67_v6 = vpack.c.bf16 %v66_v4, %v65_v1  ;;  %vm41_vm4 = vcmask 90112   ;;  %vm68_vm5 = vcmask 97280  }
  0x11   :  { %v533_v5 = vshrl.u32 %v116_v0, 7  ;;  %421 = vmatprep.subr.bf16.mxu0 %v480_v2  ;;  %423 = vmatprep.mubr.msk.bf16.mxu0 %vm481_vm0, %v480_v2  ;;  %s395_s1 = sld [smem:[#allocation3 + $0x2]]  ;;  %v457_v21 = vld [vmem:[%s601_s4 + $0x8] sm:$0xff]   ;;  %v458_v22 = vld [vmem:[%s601_s4] sm:$0xff]   ;;  %vm233_vm6 = vcmask 259072   ;;  %vm175_vm7 = vcmask 48128  }
  0x12   :  { %s396_s9 = sld [smem:[#allocation3 + $0x3]]  ;;  %v74_v8 = vsel %vm72_vm1, %v67_v6, 0  ;;  %v482_v39 = vmov 1065369472   ;;  %vm275_vm8 = vcmask 261120   ;;  %vm319_vm9 = vcmask 46080  }
  0x13   :  { %v118_v7 = vadd.s32 8, %v533_v5  ;;  %vm124_vm2 = vcmp.eq.s32.totalorder %v533_v5, %v400_v3  ;;  %s397_s3 = sld [smem:[#allocation3 + $0x4]]  ;;  %422 = vmatpush3.bf16.msra.mxu0 %v74_v8  ;;  %v224_v56 = vsub.s32 0, %v533_v5  ;;  %v405_v5 = vld [vmem:[%s602_s5] ss:$0 sm:$0xff]  ;;  %vm331_vm10 = vcmask 1042432  }
  0x14   :  { %v401_v9 = vsel %vm124_vm2, 1.0, %v480_v2  ;;  %s398_s10 = sld [smem:[#allocation3 + $0x5]]  ;;  %433 = vmatprep.subr.bf16.mxu0 %v480_v2 }
  0x15   :  { %vm125_vm3 = vcmp.eq.s32.totalorder %v118_v7, %v400_v3  ;;  %s39_s13 = scalar_lea.vmem %s599_s2, %s38_s29 }
  0x16   :  { %v402_v10 = vsel %vm125_vm3, 1.0, %v480_v2  ;;  %v40_v12 = vld [vmem:[%s39_s13] sm:$0x1]  ;;  %s44_s16 = scalar_lea.vmem %s599_s2, %s394_s8 }
  0x17   :  { %v130_v11 = vpack.c.bf16 %v402_v10, %v401_v9  ;;  %42 = vst.msk [vmem:[#allocation2] sm:$0x1] %vm41_vm4, %v40_v12  ;;  %v45_v13 = vld [vmem:[%s44_s16] sm:$0x1]  ;;  %s48_s19 = scalar_lea.vmem %s599_s2, %s395_s1 }
  0x18   :  { %46 = vst.msk [vmem:[#allocation2 + $0x1] sm:$0x1] %vm41_vm4, %v45_v13  ;;  %v49_v15 = vld [vmem:[%s48_s19] sm:$0x1]  ;;  %s52_s22 = scalar_lea.vmem %s599_s2, %s396_s9 }
  0x19   :  { %v132_v14 = vsel %vm72_vm1, %v130_v11, 0  ;;  %50 = vst.msk [vmem:[#allocation2 + $0x2] sm:$0x1] %vm41_vm4, %v49_v15  ;;  %v53_v16 = vld [vmem:[%s52_s22] sm:$0x1]  ;;  %s56_s25 = scalar_lea.vmem %s599_s2, %s397_s3 }
  0x1a   :  { %428 = vmatpush3.bf16.msra.mxu1 %v132_v14  ;;  %54 = vst.msk [vmem:[#allocation2 + $0x3] sm:$0x1] %vm41_vm4, %v53_v16  ;;  %v57_v17 = vld [vmem:[%s56_s25] sm:$0x1]  ;;  %s60_s0 = scalar_lea.vmem %s599_s2, %s398_s10 }
  0x1b   :  { %439 = vmatprep.subr.bf16.mxu1 %v480_v2  ;;  %58 = vst.msk [vmem:[#allocation2 + $0x4] sm:$0x1] %vm41_vm4, %v57_v17  ;;  %v61_v18 = vld [vmem:[%s60_s0] sm:$0x1] }
  0x1c   :  { %62 = vst.msk [vmem:[#allocation2 + $0x5] sm:$0x1] %vm41_vm4, %v61_v18 }
  0x23   :  { %v63_v19 = vld [vmem:[#allocation2] sm:$0x3f] }
  0x24   :  { %v64_v20 = vpack.c.bf16 %v63_v19, %v63_v19 }
  0x26   :  { %430 = vmatmul.mubr.msk.bf16.vlgmr.msra.gmra.mxu1 %vm68_vm5, %v64_v20  ;;  %424 = vmatmul.mubr.msk.bf16.vlgmr.msra.gmra.mxu0 %vm68_vm5, %v64_v20 }
  0x27   :  { %435 = vmatprep.mubr.msk.bf16.mxu0 %vm481_vm0, %v480_v2  ;;  %443 = vmatprep.mubr.msk.bf16.mxu1 %vm481_vm0, %v480_v2 }
  0x28   :  { %440 = vmatpush3.bf16.msra.mxu1 %v457_v21 }
  0x29   :  { %441 = vmatprep.subr.bf16.mxu1 %v480_v2 }
  0x2c   :  { %442 = vmatpush3.bf16.msra.mxu1 %v458_v22 }
  0xe6   :  { %v168_v23 = vpop.f32.mrf.mxu1  ;;  %v110_v24 = vpop.f32.mrf.mxu0 }
  0xe7   :  { %v174_v25 = vpack.c.bf16 %v168_v23, %v168_v23  ;;  %v234_v26 = vsel %vm233_vm6, %v110_v24, 0.0 }
  0xe8   :  { %v431_v27 = vpop.f32.mrf.mxu1  ;;  %v235_v28 = vrot.slane %v234_v26, 4  ;;  %v425_v29 = vpop.f32.mrf.mxu0 }
  0xe9   :  { %v180_v30 = vsel %vm175_vm7, %v174_v25, 0 }
  0xea   :  { %v171_v31 = vpop.f32.mrf.mxu1  ;;  %434 = vmatpush3.bf16.xpose.msra.mxu0 %v180_v30  ;;  %v236_v32 = vadd.f32 %v235_v28, %v234_v26  ;;  %v113_v33 = vpop.f32.mrf.mxu0 }
  0xeb   :  { %447 = vmatprep.subr.bf16.mxu0 %v480_v2 }
  0xec   :  { %v432_v34 = vpop.f32.mrf.mxu1  ;;  %v237_v35 = vrot.slane %v236_v32, 2  ;;  %v426_v36 = vpop.f32.mrf.mxu0 }
  0xee   :  { %v238_v37 = vadd.f32 %v237_v35, %v236_v32 }
  0xf0   :  { %v239_v38 = vrot.slane %v238_v37, 1 }
  0xf1   :  { %436 = vmatmul.mubr.msk.bf16.vlgmr.msra.gmra.mxu0 %vm175_vm7, %v482_v39 }
  0xf2   :  { %v240_v40 = vadd.f32 %v239_v38, %v238_v37  ;;  %449 = vmatprep.mubr.msk.bf16.mxu0 %vm481_vm0, %v480_v2 }
  0xf4   :  { %v242_v41 = vmul.f32 0.16666667, %v240_v40 }
  0xf6   :  { %v243_v42 = vsub.f32 %v110_v24, %v242_v41 }
  0xf8   :  { %v244_v43 = vmul.f32 %v243_v42, %v243_v42 }
  0xfa   :  { %v245_v44 = vsel %vm233_vm6, %v244_v43, 0.0 }
  0xfb   :  { %v246_v45 = vrot.slane %v245_v44, 4 }
  0xfd   :  { %v247_v46 = vadd.f32 %v246_v45, %v245_v44 }
  0xff   :  { %v248_v47 = vrot.slane %v247_v46, 2 }
 0x101   :  { %v249_v48 = vadd.f32 %v248_v47, %v247_v46 }
 0x103   :  { %v250_v49 = vrot.slane %v249_v48, 1 }
 0x105   :  { %v251_v50 = vadd.f32 %v250_v49, %v249_v48 }
 0x107   :  { %v252_v51 = vmul.f32 0.16666667, %v251_v50 }
 0x109   :  { %v253_v52 = vadd.f32 1e-05, %v252_v51 }
 0x10b   :  { %459 = vrsqrt.f32 %v253_v52 }
 0x118   :  { %v460_v53 = vpop.eup %459 }
 0x119   :  { %v255_v54 = vmul.f32 %v460_v53, %v243_v42 }
 0x11b   :  { %v256_v55 = vpack.c.bf16 %v255_v54, %v255_v54 }
 0x11d   :  { %444 = vmatmul.mubr.msk.bf16.vlgmr.msra.gmra.mxu1 %vm275_vm8, %v256_v55 }
 0x1b1   :  { %v216_v57 = vpop.f32.mrf.mxu0 }
 0x1b2   :  { %v225_v58 = vrot.slane %v216_v57, %v224_v56 }
 0x1b3   :  { %v437_v59 = vpop.f32.mrf.mxu0 }
 0x1b4   :  { %461 = vrcp.f32 %v225_v58 }
 0x1b5   :  { %v219_v60 = vpop.f32.mrf.mxu0 }
 0x1b7   :  { %v438_v61 = vpop.f32.mrf.mxu0 }
 0x1c1   :  { %v462_v62 = vpop.eup %461 }
 0x1c2   :  { %v227_v63 = vmul.f32 %v462_v62, %v168_v23 }
 0x1c4   :  { %v320_v0 = vsel %vm319_vm9, %v227_v63, 0.0  ;;  %v325_v13 = vpack.c.bf16 %v227_v63, %v227_v63 }
 0x1c5   :  { %321 = vadd.xlane.f32.xlu0 %v320_v0 }
 0x1dd   :  { %v313_v1 = vpop.f32.mrf.mxu1 }
 0x1de   :  { %v314_v8 = vadd.f32 %v405_v5, %v313_v1 }
 0x1df   :  { %v445_v2 = vpop.f32.mrf.mxu1 }
 0x1e1   :  { %v316_v3 = vpop.f32.mrf.mxu1 }
 0x1e3   :  { %v446_v4 = vpop.f32.mrf.mxu1 }
 0x24e   :  { %v322_v6 = vpop.xlane.xlu0 %321 }
 0x24f   :  { %v323_v7 = vadd.f32 1.0, %v322_v6 }
 0x251   :  { %463 = vrsqrt.f32 %v323_v7 }
 0x25e   :  { %v464_v9 = vpop.eup %463 }
 0x25f   :  { %v326_v10 = vmul.f32 %v464_v9, %v314_v8  ;;  %v376_v14 = vmul.f32 %v464_v9, %v464_v9 }
 0x261   :  { %v327_v11 = vpack.c.bf16 %v326_v10, %v326_v10  ;;  %v377_v17 = vmul.f32 %v376_v14, %v314_v8 }
 0x263   :  { %v333_v12 = vsel %vm331_vm10, %v327_v11, 0 }
 0x264   :  { %448 = vmatpush3.bf16.msra.mxu0 %v333_v12 }
 0x267   :  { %450 = vmatmul.mubr.msk.bf16.vlgmr.msra.gmra.mxu0 %vm175_vm7, %v325_v13 }
 0x327   :  { %v369_v15 = vpop.f32.mrf.mxu0 }
 0x328   :  { %v375_v16 = vmul.f32 %v464_v9, %v369_v15 }
 0x329   :  { %v451_v18 = vpop.f32.mrf.mxu0 }
 0x32a   :  { %v378_v19 = vadd.f32 %v377_v17, %v375_v16 }
 0x32b   :  { %v372_v20 = vpop.f32.mrf.mxu0 }
 0x32c   :  { %vm379_vm11 = vcmp.ge.f32.partialorder %v378_v19, 0.0  ;;  %v380_v21 = vmul.f32 0.01, %v378_v19 }
 0x32d   :  { %v452_v22 = vpop.f32.mrf.mxu0 }
 0x32e   :  { %v381_v23 = vsel %vm379_vm11, %v378_v19, %v380_v21 }
 0x32f   :  { %382 = vst.msk [vmem:[%s603_s6] sm:$0x3f] %vm233_vm6, %v381_v23 }
 0x330   :  { %387 = vsyncpa [#allocation4], 1 }

// kernel: graph_unet_forward.6
= control target key start
LH: loop header
LB: loop body
LE: loop exit
PB: predicated region body
PF: predicated region fallthrough
CT: control target
= control target key end

     0   :  { %21 = vsyncpa [#allocation6], 0  ;;  %s1146_s0 = inlined_call_operand.vmem [shape: s32[1,12], index: 0, kind: input, shape index: {}, may-alias: {0,1}]   ;;  %s1147_s1 = inlined_call_operand.vmem [shape: s32[1,12], index: 1, kind: input, shape index: {}, may-alias: {0,1}]   ;;  %s1148_s2 = inlined_call_operand.vmem [shape: f32[16,16], index: 2, kind: input, shape index: {}]   ;;  %s1149_s3 = inlined_call_operand.vmem [shape: f32[16,32], index: 3, kind: input, shape index: {}]   ;;  %s1150_s4 = inlined_call_operand.vmem [shape: bf16[32,32], index: 4, kind: input, shape index: {}]   ;;  %s1151_s5 = inlined_call_operand.vmem [shape: f32[1,32], index: 5, kind: input, shape index: {}]   ;;  %s1152_s6 = inlined_call_operand.vmem [shape: f32[1,32], index: 6, kind: input, shape index: {}]   ;;  %s1153_s7 = inlined_call_operand.<no memory space> [shape: f32[1,1], index: 7, kind: input, shape index: {}]   ;;  %s1154_s8 = inlined_call_operand.<no memory space> [shape: f32[1,1], index: 8, kind: input, shape index: {}]   ;;  %s1155_s9 = inlined_call_operand.vmem [shape: f32[12,12], index: 9, kind: output, shape index: {0}]   ;;  %s1156_s10 = inlined_call_operand.vmem [shape: f32[12,32], index: 10, kind: output, shape index: {1}]   ;;  %s1157_s11 = inlined_call_operand.vmem [shape: f32[12,128], index: 11, kind: output, shape index: {2}]   ;;  %s1158_s12 = inlined_call_operand.vmem [shape: f32[12,32], index: 12, kind: output, shape index: {3}]   ;;  %s1159_s13 = inlined_call_operand.vmem [shape: f32[12,12], index: 13, kind: output, shape index: {4}]  }
   0x1   :  { %s28_s27 = sshll.u32 %s1146_s0, 4  ;;  %s29_s27 = int_to_ptr.vmem [resolvable:$true] %s28_s27 }
   0x2   :  { %s854_s28 = scalar_lea.vmem %s29_s27, 16  ;;  %p859_p1 = scmp.lt.s32.totalorder %s29_s27, %s29_s27 }
   0x3   :  { %p855_p0 = scmp.ne.s32.totalorder %s29_s27, %s854_s28  ;;  %p860_p2 = scmp.lt.s32.totalorder %s854_s28, %s854_s28 }
   0x5   :  { %p861_p3 = por %p860_p2, %p859_p1 }
   0x7   :  { %p862_p4 = pnand %p861_p3, %p855_p0 }
   0x9   :  { %865 = shalt.err (!%p862_p4)
}
   0xa   :  { %s868_s29 = smov [#allocation5]  }
   0xb   :  { %31 = dma.vmem_to_smem %s29_s27, 16, %s868_s29, [#allocation6]  }
   0xc   :  { %866 = dma.done.wait [#allocation6], 16  }
   0xd   :  { %867 = vsyncadd [#allocation6], 4294967280 }
   0xe   :  { %51 = sfence }
   0xf   :  { %v154_v0 = vlaneseq  ;;  %v869_v1 = vmov 0.0   ;;  %v737_v2 = vld [vmem:[%s1147_s1] ss:$0 sm:$0xff]  ;;  %vm870_vm0 = vmmov 0   ;;  %s54_s0 = sld [smem:[#allocation5]]  ;;  %v107_v4 = vld [vmem:[%s1149_s3 + $0x8] sm:$0xff] }
  0x10   :  { %777 = vmatprep.subr.bf16.mxu1 %v869_v1  ;;  %779 = vmatprep.mubr.msk.bf16.mxu1 %vm870_vm0, %v869_v1  ;;  %v106_v3 = vld [vmem:[%s1149_s3] sm:$0xff]  ;;  %s725_s19 = sld [smem:[#allocation5 + $0x1]]  ;;  %vm57_vm3 = vcmask 122880   ;;  %v871_v8 = vmov 1.0|1.0   ;;  %vm109_vm5 = vcmask 130048  }
  0x11   :  { %v958_v5 = vshrl.u32 %v154_v0, 7  ;;  %771 = vmatprep.subr.bf16.mxu0 %v869_v1  ;;  %v108_v6 = vpack.c.bf16 %v107_v4, %v106_v3  ;;  %773 = vmatprep.mubr.msk.bf16.mxu0 %vm870_vm0, %v869_v1  ;;  %s726_s1 = sld [smem:[#allocation5 + $0x2]]  ;;  %v820_v24 = vld [vmem:[%s1150_s4 + $0x8] sm:$0xff]   ;;  %v821_v25 = vld [vmem:[%s1150_s4] sm:$0xff]   ;;  %vm273_vm6 = vcmask 261120   ;;  %vm275_vm7 = vcmask 257024  }
  0x12   :  { %s727_s20 = sld [smem:[#allocation5 + $0x3]]  ;;  %vm211_vm8 = vcmask 97280   ;;  %v872_v43 = vmov 1065369472   ;;  %vm266_vm9 = vcmask 93184   ;;  %vm384_vm12 = vcmask 1045504  }
  0x13   :  { %v156_v7 = vadd.s32 8, %v958_v5  ;;  %vm162_vm1 = vcmp.eq.s32.totalorder %v958_v5, %v737_v2  ;;  %772 = vmatpush3.bf16.msra.mxu0 %v108_v6  ;;  %s728_s21 = sld [smem:[#allocation5 + $0x4]]  ;;  %v260_v3 = vsub.s32 0, %v958_v5 }
  0x14   :  { %783 = vmatprep.subr.bf16.mxu0 %v869_v1  ;;  %s729_s3 = sld [smem:[#allocation5 + $0x5]] }
  0x15   :  { %vm163_vm2 = vcmp.eq.s32.totalorder %v156_v7, %v737_v2  ;;  %s55_s24 = scalar_lea.vmem %s1148_s2, %s54_s0  ;;  %s730_s25 = sld [smem:[#allocation5 + $0x6]] }
  0x16   :  { %vm740_vm4 = vmpackc.low %vm163_vm2, %vm162_vm1  ;;  %v56_v9 = vld [vmem:[%s55_s24] sm:$0x1]  ;;  %s60_s28 = scalar_lea.vmem %s1148_s2, %s725_s19  ;;  %s731_s29 = sld [smem:[#allocation5 + $0x7]]  ;;  %vm562_vm1 = vcmask 1043456  }
  0x17   :  { %778 = vmatpush3.bf16.msk.msra.mxu1 %vm740_vm4, %v871_v8  ;;  %58 = vst.msk [vmem:[#allocation2] sm:$0x1] %vm57_vm3, %v56_v9  ;;  %v61_v10 = vld [vmem:[%s60_s28] sm:$0x1]  ;;  %s64_s15 = scalar_lea.vmem %s1148_s2, %s726_s1  ;;  %s732_s16 = sld [smem:[#allocation5 + $0x8]] }
  0x18   :  { %789 = vmatprep.subr.bf16.mxu1 %v869_v1  ;;  %62 = vst.msk [vmem:[#allocation2 + $0x1] sm:$0x1] %vm57_vm3, %v61_v10  ;;  %v65_v11 = vld [vmem:[%s64_s15] sm:$0x1]  ;;  %s68_s18 = scalar_lea.vmem %s1148_s2, %s727_s20  ;;  %s733_s22 = sld [smem:[#allocation5 + $0x9]] }
  0x19   :  { %66 = vst.msk [vmem:[#allocation2 + $0x2] sm:$0x1] %vm57_vm3, %v65_v11  ;;  %v69_v12 = vld [vmem:[%s68_s18] sm:$0x1]  ;;  %s72_s24 = scalar_lea.vmem %s1148_s2, %s728_s21  ;;  %s734_s26 = sld [smem:[#allocation5 + $0xa]] }
  0x1a   :  { %70 = vst.msk [vmem:[#allocation2 + $0x3] sm:$0x1] %vm57_vm3, %v69_v12  ;;  %v73_v13 = vld [vmem:[%s72_s24] sm:$0x1]  ;;  %s76_s28 = scalar_lea.vmem %s1148_s2, %s729_s3  ;;  %s735_s30 = sld [smem:[#allocation5 + $0xb]] }
  0x1b   :  { %74 = vst.msk [vmem:[#allocation2 + $0x4] sm:$0x1] %vm57_vm3, %v73_v13  ;;  %v77_v14 = vld [vmem:[%s76_s28] sm:$0x1]  ;;  %s80_s15 = scalar_lea.vmem %s1148_s2, %s730_s25 }
  0x1c   :  { %78 = vst.msk [vmem:[#allocation2 + $0x5] sm:$0x1] %vm57_vm3, %v77_v14  ;;  %v81_v15 = vld [vmem:[%s80_s15] sm:$0x1]  ;;  %s84_s17 = scalar_lea.vmem %s1148_s2, %s731_s29 }
  0x1d   :  { %82 = vst.msk [vmem:[#allocation2 + $0x6] sm:$0x1] %vm57_vm3, %v81_v15  ;;  %v85_v16 = vld [vmem:[%s84_s17] sm:$0x1]  ;;  %s88_s19 = scalar_lea.vmem %s1148_s2, %s732_s16 }
  0x1e   :  { %86 = vst.msk [vmem:[#allocation2 + $0x7] sm:$0x1] %vm57_vm3, %v85_v16  ;;  %v89_v17 = vld [vmem:[%s88_s19] sm:$0x1]  ;;  %s92_s25 = scalar_lea.vmem %s1148_s2, %s733_s22 }
  0x1f   :  { %90 = vst.msk [vmem:[#allocation2 + $0x8] sm:$0x1] %vm57_vm3, %v89_v17  ;;  %v93_v18 = vld [vmem:[%s92_s25] sm:$0x1]  ;;  %s96_s29 = scalar_lea.vmem %s1148_s2, %s734_s26 }
  0x20   :  { %94 = vst.msk [vmem:[#allocation2 + $0x9] sm:$0x1] %vm57_vm3, %v93_v18  ;;  %v97_v19 = vld [vmem:[%s96_s29] sm:$0x1]  ;;  %s100_s16 = scalar_lea.vmem %s1148_s2, %s735_s30  ;;  %s619_s29 = ssub.f32 1.0, %s1154_s8 }
  0x21   :  { %98 = vst.msk [vmem:[#allocation2 + $0xa] sm:$0x1] %vm57_vm3, %v97_v19  ;;  %v101_v20 = vld [vmem:[%s100_s16] sm:$0x1] }
  0x22   :  { %102 = vst.msk [vmem:[#allocation2 + $0xb] sm:$0x1] %vm57_vm3, %v101_v20 }
  0x25   :  { %v103_v21 = vld [vmem:[#allocation2] sm:$0xff] }
  0x29   :  { %v104_v22 = vld [vmem:[#allocation2 + $0x8] sm:$0xf] }
  0x2a   :  { %v105_v23 = vpack.c.bf16 %v104_v22, %v103_v21 }
  0x2c   :  { %780 = vmatmul.mubr.msk.bf16.vlgmr.msra.gmra.mxu1 %vm109_vm5, %v105_v23  ;;  %774 = vmatmul.mubr.msk.bf16.vlgmr.msra.gmra.mxu0 %vm109_vm5, %v105_v23 }
  0x2d   :  { %785 = vmatprep.mubr.msk.bf16.mxu0 %vm870_vm0, %v869_v1  ;;  %793 = vmatprep.mubr.msk.bf16.mxu1 %vm870_vm0, %v869_v1 }
  0x2e   :  { %790 = vmatpush3.bf16.msra.mxu1 %v820_v24 }
  0x2f   :  { %791 = vmatprep.subr.bf16.mxu1 %v869_v1 }
  0x32   :  { %792 = vmatpush3.bf16.msra.mxu1 %v821_v25 }
  0x33   :  { %803 = vmatprep.subr.bf16.mxu1 %v869_v1 }
  0xec   :  { %v203_v26 = vpop.f32.mrf.mxu1  ;;  %v147_v27 = vpop.f32.mrf.mxu0 }
  0xed   :  { %v274_v30 = vsel %vm273_vm6, %v147_v27, 0.0 }
  0xee   :  { %v781_v28 = vpop.f32.mrf.mxu1  ;;  %v775_v29 = vpop.f32.mrf.mxu0 }
  0xf0   :  { %v206_v31 = vpop.f32.mrf.mxu1  ;;  %v150_v32 = vpop.f32.mrf.mxu0 }
  0xf1   :  { %v210_v33 = vpack.c.bf16 %v206_v31, %v203_v26  ;;  %v276_v34 = vsel %vm275_vm7, %v150_v32, 0.0 }
  0xf2   :  { %v782_v35 = vpop.f32.mrf.mxu1  ;;  %v277_v36 = vadd.f32 %v276_v34, %v274_v30  ;;  %v776_v37 = vpop.f32.mrf.mxu0 }
  0xf3   :  { %v216_v38 = vsel %vm211_vm8, %v210_v33, 0 }
  0xf4   :  { %784 = vmatpush3.bf16.xpose.msra.mxu0 %v216_v38  ;;  %v278_v39 = vrot.slane %v277_v36, 4 }
  0xf5   :  { %797 = vmatprep.subr.bf16.mxu0 %v869_v1 }
  0xf6   :  { %v279_v40 = vadd.f32 %v278_v39, %v277_v36 }
  0xf8   :  { %v280_v41 = vrot.slane %v279_v40, 2 }
  0xfa   :  { %v281_v42 = vadd.f32 %v280_v41, %v279_v40 }
  0xfb   :  { %786 = vmatmul.mubr.msk.bf16.vlgmr.msra.gmra.mxu0 %vm211_vm8, %v872_v43 }
  0xfc   :  { %v282_v44 = vrot.slane %v281_v42, 1  ;;  %799 = vmatprep.mubr.msk.bf16.mxu0 %vm870_vm0, %v869_v1 }
  0xfe   :  { %v283_v45 = vadd.f32 %v282_v44, %v281_v42 }
 0x100   :  { %v285_v46 = vmul.f32 0.083333336, %v283_v45 }
 0x102   :  { %v286_v47 = vsub.f32 %v147_v27, %v285_v46  ;;  %v287_v48 = vsub.f32 %v150_v32, %v285_v46 }
 0x104   :  { %v288_v49 = vmul.f32 %v286_v47, %v286_v47  ;;  %v289_v50 = vmul.f32 %v287_v48, %v287_v48 }
 0x106   :  { %v290_v51 = vsel %vm273_vm6, %v288_v49, 0.0  ;;  %v291_v52 = vsel %vm275_vm7, %v289_v50, 0.0 }
 0x107   :  { %v292_v53 = vadd.f32 %v291_v52, %v290_v51 }
 0x109   :  { %v293_v54 = vrot.slane %v292_v53, 4 }
 0x10b   :  { %v294_v55 = vadd.f32 %v293_v54, %v292_v53 }
 0x10d   :  { %v295_v56 = vrot.slane %v294_v55, 2 }
 0x10f   :  { %v296_v57 = vadd.f32 %v295_v56, %v294_v55 }
 0x111   :  { %v297_v58 = vrot.slane %v296_v57, 1 }
 0x113   :  { %v298_v59 = vadd.f32 %v297_v58, %v296_v57 }
 0x115   :  { %v299_v60 = vmul.f32 0.083333336, %v298_v59 }
 0x117   :  { %v300_v61 = vadd.f32 1e-05, %v299_v60 }
 0x119   :  { %822 = vrsqrt.f32 %v300_v61 }
 0x126   :  { %v823_v62 = vpop.eup %822 }
 0x127   :  { %v302_v63 = vmul.f32 %v823_v62, %v286_v47  ;;  %v303_v0 = vmul.f32 %v823_v62, %v287_v48 }
 0x129   :  { %v304_v2 = vpack.c.bf16 %v303_v0, %v302_v63 }
 0x12b   :  { %794 = vmatmul.mubr.msk.bf16.vlgmr.msra.gmra.mxu1 %vm273_vm6, %v304_v2 }
 0x12c   :  { %805 = vmatprep.mubr.msk.bf16.mxu1 %vm870_vm0, %v869_v1 }
 0x1bb   :  { %v252_v4 = vpop.f32.mrf.mxu0 }
 0x1bc   :  { %v261_v6 = vrot.slane %v252_v4, %v260_v3 }
 0x1bd   :  { %v787_v7 = vpop.f32.mrf.mxu0 }
 0x1be   :  { %824 = vrcp.f32 %v261_v6 }
 0x1bf   :  { %v255_v8 = vpop.f32.mrf.mxu0 }
 0x1c1   :  { %v788_v9 = vpop.f32.mrf.mxu0 }
 0x1cb   :  { %v825_v10 = vpop.eup %824 }
 0x1cc   :  { %v263_v11 = vmul.f32 %v825_v10, %v203_v26  ;;  %v264_v12 = vmul.f32 %v825_v10, %v206_v31  ;;  %v744_v26 = vld [vmem:[%s1151_s5] ss:$0 sm:$0xff] }
 0x1ce   :  { %v367_v13 = vsel %vm211_vm8, %v263_v11, 0.0  ;;  %265 = vst.msk [vmem:[%s1155_s9] sm:$0xff] %vm211_vm8, %v263_v11  ;;  %v1049_v5 = vpack.c.bf16 %v264_v12, %v263_v11  ;;  %vm627_vm10 = vcmp.ne.f32.partialorder %v263_v11, 0.0  ;;  %vm628_vm11 = vcmp.ne.f32.partialorder %v264_v12, 0.0 }
 0x1cf   :  { %267 = vst.msk [vmem:[%s1155_s9 + $0x8] sm:$0xf] %vm266_vm9, %v264_v12  ;;  %368 = vadd.xlane.f32.xlu0 %v367_v13  ;;  %v751_v14 = vsel %vm627_vm10, 1.0, %v869_v1  ;;  %v752_v15 = vsel %vm628_vm11, 1.0, %v869_v1  ;;  %v370_v17 = vsel %vm266_vm9, %v264_v12, 0.0 }
 0x1d0   :  { %v633_v16 = vpack.c.bf16 %v752_v15, %v751_v14 }
 0x1d2   :  { %v637_v35 = vsel %vm384_vm12, %v633_v16, 0 }
 0x1d3   :  { %371 = vadd.xlane.f32.xlu0 %v370_v17 }
 0x1eb   :  { %v360_v18 = vpop.f32.mrf.mxu1 }
 0x1ec   :  { %v361_v28 = vadd.f32 %v744_v26, %v360_v18 }
 0x1ed   :  { %v795_v19 = vpop.f32.mrf.mxu1 }
 0x1ef   :  { %v363_v20 = vpop.f32.mrf.mxu1 }
 0x1f0   :  { %v364_v29 = vadd.f32 %v744_v26, %v363_v20 }
 0x1f1   :  { %v796_v21 = vpop.f32.mrf.mxu1 }
 0x258   :  { %v1054_v22 = vpop.xlane.xlu0 %368 }
 0x259   :  { %v373_v23 = vadd.f32 1.0, %v1054_v22 }
 0x25b   :  { %826 = vrsqrt.f32 %v373_v23 }
 0x25c   :  { %v1057_v24 = vpop.xlane.xlu0 %371 }
 0x25d   :  { %v374_v25 = vadd.f32 1.0, %v1057_v24 }
 0x25f   :  { %828 = vrsqrt.f32 %v374_v25 }
 0x268   :  { %v827_v27 = vpop.eup %826 }
 0x269   :  { %v378_v31 = vmul.f32 %v827_v27, %v361_v28  ;;  %v431_v36 = vmul.f32 %v827_v27, %v827_v27 }
 0x26b   :  { %v433_v39 = vmul.f32 %v431_v36, %v361_v28 }
 0x26c   :  { %v829_v30 = vpop.eup %828 }
 0x26d   :  { %v379_v32 = vmul.f32 %v829_v30, %v364_v29  ;;  %v432_v40 = vmul.f32 %v829_v30, %v829_v30 }
 0x26f   :  { %v380_v33 = vpack.c.bf16 %v379_v32, %v378_v31  ;;  %v434_v46 = vmul.f32 %v432_v40, %v364_v29 }
 0x271   :  { %v386_v34 = vsel %vm384_vm12, %v380_v33, 0 }
 0x272   :  { %798 = vmatpush3.bf16.msra.mxu0 %v386_v34  ;;  %v750_v34 = vld [vmem:[%s1152_s6] ss:$0 sm:$0xff] }
 0x273   :  { %809 = vmatprep.subr.bf16.mxu0 %v869_v1 }
 0x275   :  { %800 = vmatmul.mubr.msk.bf16.vlgmr.msra.gmra.mxu0 %vm211_vm8, %v1049_v5 }
 0x276   :  { %810 = vmatpush3.bf16.msra.mxu0 %v637_v35  ;;  %811 = vmatprep.mubr.msk.bf16.mxu0 %vm870_vm0, %v869_v1 }
 0x27d   :  { %812 = vmatmul.mubr.msk.bf16.vlgmr.msra.gmra.mxu0 %vm211_vm8, %v633_v16 }
 0x335   :  { %v422_v37 = vpop.f32.mrf.mxu0 }
 0x336   :  { %v429_v38 = vmul.f32 %v827_v27, %v422_v37 }
 0x337   :  { %v801_v41 = vpop.f32.mrf.mxu0 }
 0x338   :  { %v435_v42 = vadd.f32 %v433_v39, %v429_v38 }
 0x339   :  { %v425_v43 = vpop.f32.mrf.mxu0 }
 0x33a   :  { %vm437_vm13 = vcmp.ge.f32.partialorder %v435_v42, 0.0  ;;  %v439_v44 = vmul.f32 0.01, %v435_v42  ;;  %v430_v45 = vmul.f32 %v829_v30, %v425_v43 }
 0x33b   :  { %v802_v47 = vpop.f32.mrf.mxu0 }
 0x33c   :  { %v441_v48 = vsel %vm437_vm13, %v435_v42, %v439_v44  ;;  %v436_v49 = vadd.f32 %v434_v46, %v430_v45 }
 0x33d   :  { %443 = vst.msk [vmem:[%s1156_s10] sm:$0xff] %vm273_vm6, %v441_v48  ;;  %v673_v50 = vpop.f32.mrf.mxu0  ;;  %v448_v55 = vsel %vm273_vm6, %v441_v48, 0.0 }
 0x33e   :  { %vm438_vm14 = vcmp.ge.f32.partialorder %v436_v49, 0.0  ;;  %v440_v51 = vmul.f32 0.01, %v436_v49  ;;  %vm680_vm15 = vcmp.ne.f32.partialorder %v673_v50, 0.0 }
 0x33f   :  { %v754_v52 = vsel %vm680_vm15, 1.0, %v869_v1  ;;  %v813_v53 = vpop.f32.mrf.mxu0 }
 0x340   :  { %v442_v54 = vsel %vm438_vm14, %v436_v49, %v440_v51  ;;  %688 = vst.msk [vmem:[%s1159_s13] sm:$0xff] %vm211_vm8, %v754_v52  ;;  %v559_v49 = vstv %s1153_s7 }
 0x341   :  { %444 = vst.msk [vmem:[%s1156_s10 + $0x8] sm:$0xf] %vm275_vm7, %v442_v54  ;;  %v449_v56 = vsel %vm275_vm7, %v442_v54, 0.0  ;;  %v676_v57 = vpop.f32.mrf.mxu0 }
 0x342   :  { %v450_v58 = vadd.f32 %v449_v56, %v448_v55  ;;  %vm681_vm0 = vcmp.ne.f32.partialorder %v676_v57, 0.0 }
 0x343   :  { %v755_v59 = vsel %vm681_vm0, 1.0, %v869_v1  ;;  %v814_v60 = vpop.f32.mrf.mxu0 }
 0x344   :  { %v451_v61 = vrot.slane %v450_v58, 4  ;;  %689 = vst.msk [vmem:[%s1159_s13 + $0x8] sm:$0xf] %vm266_vm9, %v755_v59 }
 0x346   :  { %v452_v62 = vadd.f32 %v451_v61, %v450_v58 }
 0x348   :  { %v453_v63 = vrot.slane %v452_v62, 2 }
 0x34a   :  { %v454_v0 = vadd.f32 %v453_v63, %v452_v62 }
 0x34c   :  { %v455_v2 = vrot.slane %v454_v0, 1 }
 0x34e   :  { %v456_v3 = vadd.f32 %v455_v2, %v454_v0 }
 0x350   :  { %v457_v4 = vmul.f32 0.083333336, %v456_v3 }
 0x352   :  { %v458_v6 = vsub.f32 %v441_v48, %v457_v4  ;;  %v459_v7 = vsub.f32 %v442_v54, %v457_v4 }
 0x354   :  { %v460_v8 = vmul.f32 %v458_v6, %v458_v6  ;;  %v461_v9 = vmul.f32 %v459_v7, %v459_v7 }
 0x356   :  { %v462_v10 = vsel %vm273_vm6, %v460_v8, 0.0  ;;  %v463_v1 = vsel %vm275_vm7, %v461_v9, 0.0 }
 0x357   :  { %v464_v11 = vadd.f32 %v463_v1, %v462_v10 }
 0x359   :  { %v465_v12 = vrot.slane %v464_v11, 4 }
 0x35b   :  { %v466_v13 = vadd.f32 %v465_v12, %v464_v11 }
 0x35d   :  { %v467_v14 = vrot.slane %v466_v13, 2 }
 0x35f   :  { %v468_v15 = vadd.f32 %v467_v14, %v466_v13 }
 0x361   :  { %v469_v16 = vrot.slane %v468_v15, 1 }
 0x363   :  { %v470_v17 = vadd.f32 %v469_v16, %v468_v15 }
 0x365   :  { %v471_v18 = vmul.f32 0.083333336, %v470_v17 }
 0x367   :  { %v472_v19 = vadd.f32 1e-05, %v471_v18 }
 0x369   :  { %830 = vrsqrt.f32 %v472_v19 }
 0x36a   :  { %832 = vrcp.f32 %v1054_v22 }
 0x36b   :  { %834 = vrcp.f32 %v1057_v24 }
 0x376   :  { %v831_v20 = vpop.eup %830 }
 0x377   :  { %v1093_v21 = vmul.f32 %v831_v20, %v459_v7  ;;  %v1095_v23 = vmul.f32 %v831_v20, %v458_v6  ;;  %v833_v27 = vpop.eup %832 }
 0x378   :  { %v835_v32 = vpop.eup %834 }
 0x379   :  { %v476_v25 = vpack.c.bf16 %v1093_v21, %v1095_v23  ;;  %v598_v39 = vmul.f32 %v750_v34, %v1095_v23  ;;  %v599_v47 = vmul.f32 %v750_v34, %v1093_v21 }
 0x37b   :  { %v478_v26 = vsel %vm384_vm12, %v476_v25, 0  ;;  %v600_v43 = vsel %vm273_vm6, %v598_v39, 0.0  ;;  %v603_v48 = vsel %vm275_vm7, %v599_v47, 0.0 }
 0x37c   :  { %804 = vmatpush3.bf16.msra.mxu1 %v478_v26 }
 0x37f   :  { %806 = vmatmul.mubr.msk.bf16.vlgmr.msra.gmra.mxu1 %vm211_vm8, %v1049_v5 }
 0x43f   :  { %v514_v28 = vpop.f32.mrf.mxu1 }
 0x440   :  { %v522_v29 = vmul.f32 %v833_v27, %v514_v28 }
 0x441   :  { %v807_v30 = vpop.f32.mrf.mxu1 }
 0x442   :  { %v525_v31 = vsub.f32 %v1095_v23, %v522_v29  ;;  %v551_v42 = vmul.f32 %v750_v34, %v522_v29 }
 0x443   :  { %v517_v33 = vpop.f32.mrf.mxu1 }
 0x444   :  { %v524_v35 = vmul.f32 %v835_v32, %v517_v33  ;;  %v527_v36 = vand.u32 2147483647, %v525_v31  ;;  %v553_v44 = vsel %vm273_vm6, %v551_v42, 0.0 }
 0x445   :  { %v808_v37 = vpop.f32.mrf.mxu1 }
 0x446   :  { %v529_v5 = vsel %vm273_vm6, %v527_v36, 0.0  ;;  %v552_v38 = vmul.f32 %v750_v34, %v524_v35  ;;  %v526_v40 = vsub.f32 %v1093_v21, %v524_v35 }
 0x447   :  { %530 = vadd.xlane.f32.xlu0 %v529_v5 }
 0x448   :  { %v556_v41 = vsel %vm275_vm7, %v552_v38, 0.0  ;;  %v528_v45 = vand.u32 2147483647, %v526_v40 }
 0x449   :  { %557 = vadd.xlane.f32.xlu1 %v556_v41 }
 0x44a   :  { %v532_v46 = vsel %vm275_vm7, %v528_v45, 0.0 }
 0x44b   :  { %601 = vadd.xlane.f32.xlu0 %v600_v43 }
 0x44d   :  { %554 = vadd.xlane.f32.xlu1 %v553_v44 }
 0x451   :  { %533 = vadd.xlane.f32.xlu1 %v532_v46 }
 0x455   :  { %604 = vadd.xlane.f32.xlu1 %v603_v48 }
 0x4d0   :  { %v531_v3 = vpop.xlane.xlu0 %530 }
 0x4d1   :  { %v535_v8 = vadd.f32 %v531_v3, %v1054_v22 }
 0x4d2   :  { %v558_v50 = vpop.xlane.xlu1 %557 }
 0x4d3   :  { %v561_v51 = vadd.f32 %v559_v49, %v558_v50  ;;  %v537_v12 = vmul.f32 0.5, %v535_v8  ;;  %v620_v50 = vstv %s619_s29 }
 0x4d4   :  { %v602_v20 = vpop.xlane.xlu0 %601 }
 0x4d5   :  { %v563_v54 = vsel %vm562_vm1, %v561_v51, -inf  ;;  %v606_v27 = vadd.f32 %v602_v20, %v559_v49 }
 0x4d6   :  { %v555_v52 = vpop.xlane.xlu1 %554 }
 0x4d7   :  { %v560_v53 = vadd.f32 %v559_v49, %v555_v52  ;;  %v608_v30 = vmul.f32 0.5, %v606_v27 }
 0x4d9   :  { %v564_v55 = vmax.f32 %v560_v53, %v563_v54 }
 0x4da   :  { %v534_v6 = vpop.xlane.xlu1 %533 }
 0x4db   :  { %v565_v56 = vrot.slane %v564_v55, 4  ;;  %v536_v1 = vadd.f32 %v534_v6, %v1057_v24 }
 0x4dd   :  { %v566_v57 = vmax.f32 %v564_v55, %v565_v56  ;;  %v538_v14 = vmul.f32 0.5, %v536_v1 }
 0x4de   :  { %v605_v19 = vpop.xlane.xlu1 %604 }
 0x4df   :  { %v567_v58 = vrot.slane %v566_v57, 2  ;;  %v607_v25 = vadd.f32 %v605_v19, %v559_v49  ;;  %v616_v49 = vstv %s1154_s8 }
 0x4e1   :  { %v568_v59 = vmax.f32 %v566_v57, %v567_v58  ;;  %v609_v28 = vmul.f32 0.5, %v607_v25 }
 0x4e3   :  { %v569_v60 = vrot.slane %v568_v59, 1 }
 0x4e5   :  { %v570_v61 = vmax.f32 %v568_v59, %v569_v60 }
 0x4e7   :  { %v571_v62 = vsub.f32 %v560_v53, %v570_v61  ;;  %v572_v63 = vsub.f32 %v561_v51, %v570_v61 }
 0x4e9   :  { %v573_v0 = vmul.f32 1.442695, %v571_v62  ;;  %v575_v2 = vmul.f32 1.442695, %v572_v63 }
 0x4eb   :  { %836 = vpow2.f32 %v573_v0 }
 0x4ec   :  { %838 = vpow2.f32 %v575_v2 }
 0x4ed   :  { %840 = vtanh.f32 %v537_v12 }
 0x4ee   :  { %842 = vtanh.f32 %v538_v14 }
 0x4f8   :  { %v837_v4 = vpop.eup %836 }
 0x4f9   :  { %v839_v7 = vpop.eup %838 }
 0x4fa   :  { %v577_v9 = vsel %vm562_vm1, %v839_v7, 0.0  ;;  %v841_v22 = vpop.eup %840 }
 0x4fb   :  { %v578_v10 = vadd.f32 %v837_v4, %v577_v9  ;;  %v843_v26 = vpop.eup %842  ;;  %v541_v29 = vmul.f32 0.5, %v841_v22 }
 0x4fc   :  { %v542_v24 = vmul.f32 0.5, %v843_v26 }
 0x4fd   :  { %v579_v11 = vrot.slane %v578_v10, 4  ;;  %v543_v32 = vadd.f32 0.5, %v541_v29 }
 0x4fe   :  { %v544_v35 = vadd.f32 0.5, %v542_v24 }
 0x4ff   :  { %v580_v13 = vadd.f32 %v579_v11, %v578_v10 }
 0x501   :  { %v581_v15 = vrot.slane %v580_v13, 2 }
 0x503   :  { %v582_v16 = vadd.f32 %v581_v15, %v580_v13 }
 0x505   :  { %v583_v17 = vrot.slane %v582_v16, 1 }
 0x507   :  { %v584_v18 = vadd.f32 %v583_v17, %v582_v16 }
 0x509   :  { %844 = vrcp.f32 %v584_v18 }
 0x50a   :  { %846 = vtanh.f32 %v609_v28 }
 0x50b   :  { %848 = vtanh.f32 %v608_v30 }
 0x516   :  { %v845_v31 = vpop.eup %844 }
 0x517   :  { %v586_v33 = vmul.f32 %v845_v31, %v837_v4  ;;  %v587_v34 = vmul.f32 %v845_v31, %v839_v7  ;;  %v847_v39 = vpop.eup %846 }
 0x518   :  { %v849_v40 = vpop.eup %848  ;;  %v613_v41 = vmul.f32 0.5, %v847_v39 }
 0x519   :  { %v588_v36 = vadd.f32 %v586_v33, %v543_v32  ;;  %v589_v37 = vadd.f32 %v587_v34, %v544_v35  ;;  %v612_v42 = vmul.f32 0.5, %v849_v40 }
 0x51a   :  { %v615_v46 = vadd.f32 0.5, %v613_v41 }
 0x51b   :  { %v591_v5 = vmul.f32 0.5, %v589_v37  ;;  %v590_v38 = vmul.f32 0.5, %v588_v36  ;;  %v614_v47 = vadd.f32 0.5, %v612_v42 }
 0x51c   :  { %v622_v54 = vmul.f32 %v620_v50, %v615_v46 }
 0x51d   :  { %850 = vtanh.f32 %v591_v5  ;;  %v621_v55 = vmul.f32 %v620_v50, %v614_v47 }
 0x51e   :  { %852 = vtanh.f32 %v590_v38 }
 0x52a   :  { %v851_v43 = vpop.eup %850 }
 0x52b   :  { %v853_v44 = vpop.eup %852  ;;  %v595_v45 = vmul.f32 0.5, %v851_v43 }
 0x52c   :  { %v594_v48 = vmul.f32 0.5, %v853_v44 }
 0x52d   :  { %v597_v51 = vadd.f32 0.5, %v595_v45 }
 0x52e   :  { %v596_v52 = vadd.f32 0.5, %v594_v48 }
 0x52f   :  { %v618_v53 = vmul.f32 %v616_v49, %v597_v51 }
 0x530   :  { %v617_v56 = vmul.f32 %v616_v49, %v596_v52 }
 0x531   :  { %v624_v57 = vadd.f32 %v622_v54, %v618_v53 }
 0x532   :  { %v623_v58 = vadd.f32 %v621_v55, %v617_v56 }
 0x533   :  { %v626_v59 = vmul.f32 %v624_v57, %v1093_v21  ;;  %691 = vst [vmem:[%s1157_s11 + $0x8] sm:$0xf] %v624_v57 }
 0x534   :  { %v625_v60 = vmul.f32 %v623_v58, %v1095_v23  ;;  %690 = vst [vmem:[%s1157_s11] sm:$0xff] %v623_v58 }
 0x535   :  { %687 = vst.msk [vmem:[%s1158_s12 + $0x8] sm:$0xf] %vm275_vm7, %v626_v59 }
 0x536   :  { %686 = vst.msk [vmem:[%s1158_s12] sm:$0xff] %vm273_vm6, %v625_v60 }
 0x537   :  { %712 = vsyncpa [#allocation6], 1 }

// kernel: graph_unet_forward.8
= control target key start
LH: loop header
LB: loop body
LE: loop exit
PB: predicated region body
PF: predicated region fallthrough
CT: control target
= control target key end

     0   :  { %13 = vsyncpa [#allocation4], 0  ;;  %s904_s0 = inlined_call_operand.vmem [shape: s32[1,6], index: 0, kind: input, shape index: {}]   ;;  %s905_s1 = inlined_call_operand.vmem [shape: f32[12,12], index: 1, kind: input, shape index: {}]   ;;  %s906_s2 = inlined_call_operand.vmem [shape: f32[6,32], index: 2, kind: input, shape index: {}]   ;;  %s907_s3 = inlined_call_operand.vmem [shape: f32[12,32], index: 3, kind: input, shape index: {}]   ;;  %s908_s4 = inlined_call_operand.vmem [shape: bf16[32,32], index: 4, kind: input, shape index: {}]   ;;  %s909_s5 = inlined_call_operand.vmem [shape: f32[1,32], index: 5, kind: input, shape index: {}]   ;;  %s910_s6 = inlined_call_operand.vmem [shape: bf16[32,32], index: 6, kind: input, shape index: {}]   ;;  %s911_s7 = inlined_call_operand.vmem [shape: f32[1,32], index: 7, kind: input, shape index: {}]   ;;  %s912_s8 = inlined_call_operand.vmem [shape: f32[12,32], index: 8, kind: output, shape index: {}]  }
   0x1   :  { %s20_s29 = sshll.u32 %s904_s0, 4  ;;  %s21_s29 = int_to_ptr.vmem [resolvable:$true] %s20_s29 }
   0x2   :  { %s686_s30 = scalar_lea.vmem %s21_s29, 16  ;;  %p691_p1 = scmp.lt.s32.totalorder %s21_s29, %s21_s29 }
   0x3   :  { %p687_p0 = scmp.ne.s32.totalorder %s21_s29, %s686_s30  ;;  %p692_p2 = scmp.lt.s32.totalorder %s686_s30, %s686_s30 }
   0x5   :  { %p693_p3 = por %p692_p2, %p691_p1 }
   0x7   :  { %p694_p4 = pnand %p693_p3, %p687_p0 }
   0x9   :  { %697 = shalt.err (!%p694_p4)
}
   0xa   :  { %s700_s9 = smov [#allocation3]  }
   0xb   :  { %23 = dma.vmem_to_smem %s21_s29, 16, %s700_s9, [#allocation4]  }
   0xc   :  { %698 = dma.done.wait [#allocation4], 16  }
   0xd   :  { %699 = vsyncadd [#allocation4], 4294967280 }
   0xe   :  { %41 = sfence }
   0xf   :  { %v656_v0 = vld [vmem:[%s908_s4 + $0x8] sm:$0xff]   ;;  %v701_v1 = vmov 0.0   ;;  %v657_v2 = vld [vmem:[%s908_s4] sm:$0xff]   ;;  %vm702_vm0 = vmmov 0   ;;  %vm43_vm1 = vcmask 261120   ;;  %vm45_vm2 = vcmask 257024  }
  0x10   :  { %611 = vmatprep.subr.bf16.mxu0 %v701_v1  ;;  %619 = vmatprep.subr.bf16.mxu1 %v701_v1  ;;  %s48_s13 = sld [smem:[#allocation3]]  ;;  %44 = vst.msk [vmem:[#allocation2] sm:$0xff] %vm43_vm1, %v701_v1  ;;  %v47_v3 = vld [vmem:[%s906_s2] sm:$0x1]  ;;  %vm50_vm3 = vcmask 253952   ;;  %vm291_vm4 = vcmask 97280  }
  0x11   :  { %612 = vmatpush3.bf16.msra.mxu0 %v656_v0  ;;  %615 = vmatprep.mubr.msk.bf16.mxu0 %vm702_vm0, %v701_v1  ;;  %46 = vst.msk [vmem:[#allocation2 + $0x8] sm:$0xf] %vm45_vm2, %v701_v1  ;;  %s579_s14 = sld [smem:[#allocation3 + $0x1]]  ;;  %v52_v4 = vld [vmem:[%s906_s2 + $0x1] sm:$0x1]  ;;  %vm295_vm5 = vcmask 93184  }
  0x12   :  { %613 = vmatprep.subr.bf16.mxu0 %v701_v1  ;;  %620 = vmatpush3.bf16.msra.mxu1 %v656_v0  ;;  %s580_s15 = sld [smem:[#allocation3 + $0x2]]  ;;  %v56_v5 = vld [vmem:[%s906_s2 + $0x2] sm:$0x1]  ;;  %v60_v6 = vld [vmem:[%s906_s2 + $0x3] sm:$0x1]  ;;  %vm320_vm6 = vcmask 1045504  }
  0x13   :  { %621 = vmatprep.subr.bf16.mxu1 %v701_v1  ;;  %623 = vmatprep.mubr.msk.bf16.mxu1 %vm702_vm0, %v701_v1  ;;  %s581_s17 = sld [smem:[#allocation3 + $0x3]]  ;;  %v64_v7 = vld [vmem:[%s906_s2 + $0x4] sm:$0x1]  ;;  %v68_v8 = vld [vmem:[%s906_s2 + $0x5] sm:$0x1] }
  0x14   :  { %s582_s20 = sld [smem:[#allocation3 + $0x4]]  ;;  %v805_v41 = vld [vmem:[%s909_s5] ss:$0 sm:$0xff]  ;;  %v104_v50 = vld [vmem:[%s907_s3 + $0x8] sm:$0xf] }
  0x15   :  { %614 = vmatpush3.bf16.msra.mxu0 %v657_v2  ;;  %s583_s21 = sld [smem:[#allocation3 + $0x5]]  ;;  %v103_v49 = vld [vmem:[%s907_s3] sm:$0xff]  ;;  %v106_v52 = vsel %vm45_vm2, %v104_v50, 0.0 }
  0x16   :  { %627 = vmatprep.subr.bf16.mxu0 %v701_v1  ;;  %622 = vmatpush3.bf16.msra.mxu1 %v657_v2  ;;  %s49_s24 = scalar_lea.vmem [#allocation2], %s48_s13  ;;  %v105_v51 = vsel %vm43_vm1, %v103_v49, 0.0 }
  0x17   :  { %633 = vmatprep.subr.bf16.mxu1 %v701_v1  ;;  %51 = vst.msk [vmem:[%s49_s24] sm:$0x1] %vm50_vm3, %v47_v3  ;;  %s54_s27 = scalar_lea.vmem [#allocation2], %s579_s14  ;;  %v107_v53 = vadd.f32 %v106_v52, %v105_v51 }
  0x18   :  { %55 = vst.msk [vmem:[%s54_s27] sm:$0x1] %vm50_vm3, %v52_v4  ;;  %s58_s30 = scalar_lea.vmem [#allocation2], %s580_s15 }
  0x19   :  { %59 = vst.msk [vmem:[%s58_s30] sm:$0x1] %vm50_vm3, %v56_v5  ;;  %s62_s11 = scalar_lea.vmem [#allocation2], %s581_s17  ;;  %v108_v54 = vrot.slane %v107_v53, 4 }
  0x1a   :  { %63 = vst.msk [vmem:[%s62_s11] sm:$0x1] %vm50_vm3, %v60_v6  ;;  %s66_s0 = scalar_lea.vmem [#allocation2], %s582_s20 }
  0x1b   :  { %67 = vst.msk [vmem:[%s66_s0] sm:$0x1] %vm50_vm3, %v64_v7  ;;  %s70_s12 = scalar_lea.vmem [#allocation2], %s583_s21  ;;  %v109_v55 = vadd.f32 %v108_v54, %v107_v53 }
  0x1c   :  { %71 = vst.msk [vmem:[%s70_s12] sm:$0x1] %vm50_vm3, %v68_v8 }
  0x1d   :  { %v110_v56 = vrot.slane %v109_v55, 2 }
  0x1f   :  { %v111_v57 = vadd.f32 %v110_v56, %v109_v55 }
  0x21   :  { %v112_v58 = vrot.slane %v111_v57, 1 }
  0x23   :  { %v72_v9 = vld [vmem:[#allocation2] sm:$0xff]  ;;  %v73_v10 = vld [vmem:[#allocation2 + $0x8] sm:$0xf]  ;;  %v113_v59 = vadd.f32 %v112_v58, %v111_v57 }
  0x24   :  { %v74_v11 = vsel %vm43_vm1, %v72_v9, 0.0  ;;  %v75_v12 = vsel %vm45_vm2, %v73_v10, 0.0 }
  0x25   :  { %v76_v13 = vadd.f32 %v75_v12, %v74_v11  ;;  %v114_v60 = vmul.f32 0.083333336, %v113_v59 }
  0x27   :  { %v77_v14 = vrot.slane %v76_v13, 4  ;;  %v115_v61 = vsub.f32 %v103_v49, %v114_v60  ;;  %v116_v62 = vsub.f32 %v104_v50, %v114_v60 }
  0x29   :  { %v78_v15 = vadd.f32 %v77_v14, %v76_v13  ;;  %v117_v63 = vmul.f32 %v115_v61, %v115_v61  ;;  %v118_v0 = vmul.f32 %v116_v62, %v116_v62 }
  0x2b   :  { %v79_v16 = vrot.slane %v78_v15, 2  ;;  %v119_v2 = vsel %vm43_vm1, %v117_v63, 0.0  ;;  %v120_v3 = vsel %vm45_vm2, %v118_v0, 0.0 }
  0x2c   :  { %v121_v4 = vadd.f32 %v120_v3, %v119_v2  ;;  %v658_v3 = vld [vmem:[%s910_s6 + $0x8] sm:$0xff]  }
  0x2d   :  { %v80_v17 = vadd.f32 %v79_v16, %v78_v15 }
  0x2e   :  { %v122_v5 = vrot.slane %v121_v4, 4 }
  0x2f   :  { %v81_v18 = vrot.slane %v80_v17, 1 }
  0x30   :  { %v123_v6 = vadd.f32 %v122_v5, %v121_v4  ;;  %v659_v4 = vld [vmem:[%s910_s6] sm:$0xff]  }
  0x31   :  { %v82_v19 = vadd.f32 %v81_v18, %v80_v17  ;;  %v864_v5 = vld [vmem:[%s905_s1] sm:$0xff] }
  0x32   :  { %v124_v7 = vrot.slane %v123_v6, 2 }
  0x33   :  { %v84_v20 = vmul.f32 0.083333336, %v82_v19 }
  0x34   :  { %v125_v8 = vadd.f32 %v124_v7, %v123_v6  ;;  %v869_v6 = vld [vmem:[%s905_s1 + $0x8] sm:$0xf]  ;;  %v491_v7 = vsel %vm291_vm4, %v864_v5, 0.0 }
  0x35   :  { %v85_v21 = vsub.f32 %v72_v9, %v84_v20  ;;  %v86_v22 = vsub.f32 %v73_v10, %v84_v20 }
  0x36   :  { %v126_v9 = vrot.slane %v125_v8, 1 }
  0x37   :  { %v87_v23 = vmul.f32 %v85_v21, %v85_v21  ;;  %v88_v24 = vmul.f32 %v86_v22, %v86_v22 }
  0x38   :  { %v127_v10 = vadd.f32 %v126_v9, %v125_v8  ;;  %v494_v8 = vsel %vm295_vm5, %v869_v6, 0.0 }
  0x39   :  { %v89_v25 = vsel %vm43_vm1, %v87_v23, 0.0  ;;  %v90_v26 = vsel %vm45_vm2, %v88_v24, 0.0 }
  0x3a   :  { %v91_v27 = vadd.f32 %v90_v26, %v89_v25  ;;  %v128_v11 = vmul.f32 0.083333336, %v127_v10 }
  0x3c   :  { %v92_v28 = vrot.slane %v91_v27, 4  ;;  %v129_v12 = vadd.f32 1e-05, %v128_v11 }
  0x3e   :  { %v93_v29 = vadd.f32 %v92_v28, %v91_v27 }
  0x40   :  { %v94_v30 = vrot.slane %v93_v29, 2 }
  0x42   :  { %v95_v31 = vadd.f32 %v94_v30, %v93_v29 }
  0x44   :  { %v96_v32 = vrot.slane %v95_v31, 1 }
  0x46   :  { %v97_v33 = vadd.f32 %v96_v32, %v95_v31 }
  0x48   :  { %v98_v34 = vmul.f32 0.083333336, %v97_v33 }
  0x4a   :  { %v99_v35 = vadd.f32 1e-05, %v98_v34 }
  0x4c   :  { %660 = vrsqrt.f32 %v99_v35 }
  0x4d   :  { %662 = vrsqrt.f32 %v129_v12 }
  0x59   :  { %v661_v36 = vpop.eup %660 }
  0x5a   :  { %v101_v37 = vmul.f32 %v661_v36, %v85_v21  ;;  %v102_v38 = vmul.f32 %v661_v36, %v86_v22  ;;  %v663_v13 = vpop.eup %662 }
  0x5b   :  { %v131_v14 = vmul.f32 %v663_v13, %v115_v61  ;;  %v132_v15 = vmul.f32 %v663_v13, %v116_v62 }
  0x5c   :  { %v138_v39 = vpack.c.bf16 %v102_v38, %v101_v37 }
  0x5d   :  { %v201_v16 = vpack.c.bf16 %v132_v15, %v131_v14 }
  0x5e   :  { %616 = vmatmul.mubr.msk.bf16.vlgmr.msra.gmra.mxu0 %vm43_vm1, %v138_v39 }
  0x5f   :  { %629 = vmatprep.mubr.msk.bf16.mxu0 %vm702_vm0, %v701_v1  ;;  %624 = vmatmul.mubr.msk.bf16.vlgmr.msra.gmra.mxu1 %vm43_vm1, %v201_v16 }
  0x60   :  { %635 = vmatprep.mubr.msk.bf16.mxu1 %vm702_vm0, %v701_v1 }
 0x11e   :  { %v194_v40 = vpop.f32.mrf.mxu0 }
 0x11f   :  { %v808_v44 = vadd.f32 %v805_v41, %v194_v40  ;;  %v239_v33 = vpop.f32.mrf.mxu1 }
 0x120   :  { %v617_v42 = vpop.f32.mrf.mxu0  ;;  %v838_v35 = vadd.f32 %v805_v41, %v239_v33 }
 0x121   :  { %v625_v34 = vpop.f32.mrf.mxu1 }
 0x122   :  { %v197_v43 = vpop.f32.mrf.mxu0 }
 0x123   :  { %v811_v45 = vadd.f32 %v805_v41, %v197_v43  ;;  %v242_v36 = vpop.f32.mrf.mxu1 }
 0x124   :  { %v618_v46 = vpop.f32.mrf.mxu0  ;;  %v841_v37 = vadd.f32 %v805_v41, %v242_v36 }
 0x125   :  { %v246_v47 = vpack.c.bf16 %v811_v45, %v808_v44  ;;  %v626_v38 = vpop.f32.mrf.mxu1 }
 0x126   :  { %v316_v39 = vpack.c.bf16 %v841_v37, %v838_v35 }
 0x127   :  { %v248_v48 = vsel %vm43_vm1, %v246_v47, 0 }
 0x128   :  { %628 = vmatpush3.bf16.xpose.msra.mxu0 %v248_v48  ;;  %v322_v40 = vsel %vm320_vm6, %v316_v39, 0 }
 0x129   :  { %639 = vmatprep.subr.bf16.mxu0 %v701_v1  ;;  %634 = vmatpush3.bf16.msra.mxu1 %v322_v40 }
 0x12a   :  { %647 = vmatprep.subr.bf16.mxu1 %v701_v1 }
 0x12f   :  { %630 = vmatmul.mubr.msk.bf16.vlgmr.msra.gmra.mxu0 %vm43_vm1, %v246_v47 }
 0x130   :  { %643 = vmatprep.mubr.msk.bf16.mxu0 %vm702_vm0, %v701_v1  ;;  %640 = vmatpush3.bf16.msra.mxu0 %v658_v3 }
 0x131   :  { %641 = vmatprep.subr.bf16.mxu0 %v701_v1 }
 0x134   :  { %642 = vmatpush3.bf16.msra.mxu0 %v659_v4 }
 0x1ef   :  { %v284_v17 = vpop.f32.mrf.mxu0 }
 0x1f0   :  { %v292_v18 = vsel %vm291_vm4, %v284_v17, -inf }
 0x1f1   :  { %293 = vmax.xlane.f32.xlu0 %v292_v18  ;;  %v631_v19 = vpop.f32.mrf.mxu0 }
 0x1f3   :  { %v287_v20 = vpop.f32.mrf.mxu0 }
 0x1f4   :  { %v296_v21 = vsel %vm295_vm5, %v287_v20, -inf }
 0x1f5   :  { %297 = vmax.xlane.f32.xlu0 %v296_v21  ;;  %v632_v22 = vpop.f32.mrf.mxu0 }
 0x27a   :  { %v294_v23 = vpop.xlane.xlu0 %293 }
 0x27b   :  { %v299_v24 = vsub.f32 %v284_v17, %v294_v23 }
 0x27d   :  { %v301_v25 = vmul.f32 1.442695, %v299_v24 }
 0x27e   :  { %v298_v26 = vpop.xlane.xlu0 %297 }
 0x27f   :  { %664 = vpow2.f32 %v301_v25  ;;  %v300_v27 = vsub.f32 %v287_v20, %v298_v26 }
 0x281   :  { %v303_v28 = vmul.f32 1.442695, %v300_v27 }
 0x283   :  { %666 = vpow2.f32 %v303_v28 }
 0x28c   :  { %v665_v29 = vpop.eup %664 }
 0x28d   :  { %v305_v30 = vsel %vm291_vm4, %v665_v29, 0.0 }
 0x28e   :  { %306 = vadd.xlane.f32.xlu1 %v305_v30 }
 0x290   :  { %v667_v31 = vpop.eup %666 }
 0x291   :  { %v308_v32 = vsel %vm295_vm5, %v667_v31, 0.0 }
 0x292   :  { %309 = vadd.xlane.f32.xlu1 %v308_v32 }
 0x317   :  { %v307_v42 = vpop.xlane.xlu1 %306 }
 0x318   :  { %668 = vrcp.f32 %v307_v42 }
 0x31b   :  { %v310_v43 = vpop.xlane.xlu1 %309 }
 0x31c   :  { %670 = vrcp.f32 %v310_v43 }
 0x325   :  { %v669_v46 = vpop.eup %668 }
 0x326   :  { %v313_v48 = vmul.f32 %v669_v46, %v665_v29 }
 0x329   :  { %v671_v47 = vpop.eup %670 }
 0x32a   :  { %v314_v49 = vmul.f32 %v671_v47, %v667_v31 }
 0x32c   :  { %v315_v41 = vpack.c.bf16 %v314_v49, %v313_v48 }
 0x32e   :  { %636 = vmatmul.mubr.msk.bf16.vlgmr.msra.gmra.mxu1 %vm291_vm4, %v315_v41 }
 0x32f   :  { %649 = vmatprep.mubr.msk.bf16.mxu1 %vm702_vm0, %v701_v1  ;;  %v501_v1 = vpack.c.bf16 %v869_v6, %v864_v5 }
 0x3ee   :  { %v358_v50 = vpop.f32.mrf.mxu1 }
 0x3ef   :  { %v365_v51 = vsel %vm43_vm1, %v358_v50, -inf }
 0x3f0   :  { %366 = vmax.xlane.f32.xlu0 %v365_v51  ;;  %v637_v52 = vpop.f32.mrf.mxu1 }
 0x3f2   :  { %v361_v53 = vpop.f32.mrf.mxu1 }
 0x3f3   :  { %v368_v54 = vsel %vm45_vm2, %v361_v53, -inf }
 0x3f4   :  { %369 = vmax.xlane.f32.xlu1 %v368_v54  ;;  %v638_v55 = vpop.f32.mrf.mxu1  ;;  %v591_v54 = vld [vmem:[%s911_s7] ss:$0 sm:$0xff] }
 0x479   :  { %v367_v56 = vpop.xlane.xlu0 %366 }
 0x47a   :  { %v371_v57 = vsub.f32 %v358_v50, %v367_v56 }
 0x47c   :  { %v373_v58 = vmul.f32 1.442695, %v371_v57 }
 0x47d   :  { %v370_v59 = vpop.xlane.xlu1 %369 }
 0x47e   :  { %672 = vpow2.f32 %v373_v58  ;;  %v372_v60 = vsub.f32 %v361_v53, %v370_v59 }
 0x480   :  { %v375_v61 = vmul.f32 1.442695, %v372_v60 }
 0x482   :  { %674 = vpow2.f32 %v375_v61 }
 0x48b   :  { %v673_v62 = vpop.eup %672 }
 0x48c   :  { %v377_v63 = vsel %vm43_vm1, %v673_v62, 0.0 }
 0x48d   :  { %378 = vadd.xlane.f32.xlu0 %v377_v63 }
 0x48f   :  { %v675_v0 = vpop.eup %674 }
 0x490   :  { %v380_v2 = vsel %vm45_vm2, %v675_v0, 0.0 }
 0x491   :  { %381 = vadd.xlane.f32.xlu1 %v380_v2  ;;  %492 = vadd.xlane.f32.xlu0 %v491_v7 }
 0x495   :  { %495 = vadd.xlane.f32.xlu1 %v494_v8 }
 0x516   :  { %v379_v9 = vpop.xlane.xlu0 %378 }
 0x517   :  { %676 = vrcp.f32 %v379_v9 }
 0x51a   :  { %v382_v10 = vpop.xlane.xlu1 %381  ;;  %v493_v50 = vpop.xlane.xlu0 %492 }
 0x51b   :  { %678 = vrcp.f32 %v382_v10  ;;  %v497_v52 = vadd.f32 1.0, %v493_v50 }
 0x51e   :  { %v496_v51 = vpop.xlane.xlu1 %495 }
 0x51f   :  { %v498_v53 = vadd.f32 1.0, %v496_v51 }
 0x524   :  { %v677_v11 = vpop.eup %676 }
 0x525   :  { %v385_v12 = vmul.f32 %v677_v11, %v673_v62 }
 0x527   :  { %v387_v13 = vmul.f32 %v385_v12, %v838_v35 }
 0x528   :  { %v679_v14 = vpop.eup %678 }
 0x529   :  { %v389_v15 = vadd.f32 %v387_v13, %v808_v44  ;;  %v386_v16 = vmul.f32 %v679_v14, %v675_v0 }
 0x52b   :  { %v388_v17 = vmul.f32 %v386_v16, %v841_v37  ;;  %v391_v19 = vadd.f32 %v389_v15, %v838_v35 }
 0x52d   :  { %v390_v18 = vadd.f32 %v388_v17, %v811_v45  ;;  %v400_v21 = vsel %vm43_vm1, %v391_v19, 0.0 }
 0x52f   :  { %v392_v20 = vadd.f32 %v390_v18, %v841_v37 }
 0x531   :  { %v401_v22 = vsel %vm45_vm2, %v392_v20, 0.0 }
 0x532   :  { %v402_v23 = vadd.f32 %v401_v22, %v400_v21 }
 0x534   :  { %v403_v24 = vrot.slane %v402_v23, 4 }
 0x536   :  { %v404_v25 = vadd.f32 %v403_v24, %v402_v23 }
 0x538   :  { %v405_v26 = vrot.slane %v404_v25, 2 }
 0x53a   :  { %v406_v27 = vadd.f32 %v405_v26, %v404_v25 }
 0x53c   :  { %v407_v28 = vrot.slane %v406_v27, 1 }
 0x53e   :  { %v408_v44 = vadd.f32 %v407_v28, %v406_v27 }
 0x540   :  { %v409_v29 = vmul.f32 0.083333336, %v408_v44 }
 0x542   :  { %v410_v30 = vsub.f32 %v391_v19, %v409_v29  ;;  %v411_v31 = vsub.f32 %v392_v20, %v409_v29 }
 0x544   :  { %v412_v32 = vmul.f32 %v410_v30, %v410_v30  ;;  %v413_v45 = vmul.f32 %v411_v31, %v411_v31 }
 0x546   :  { %v414_v33 = vsel %vm43_vm1, %v412_v32, 0.0  ;;  %v415_v34 = vsel %vm45_vm2, %v413_v45, 0.0 }
 0x547   :  { %v416_v35 = vadd.f32 %v415_v34, %v414_v33 }
 0x549   :  { %v417_v36 = vrot.slane %v416_v35, 4 }
 0x54b   :  { %v418_v37 = vadd.f32 %v417_v36, %v416_v35 }
 0x54d   :  { %v419_v38 = vrot.slane %v418_v37, 2 }
 0x54f   :  { %v420_v39 = vadd.f32 %v419_v38, %v418_v37 }
 0x551   :  { %v421_v40 = vrot.slane %v420_v39, 1 }
 0x553   :  { %v422_v42 = vadd.f32 %v421_v40, %v420_v39 }
 0x555   :  { %v423_v43 = vmul.f32 0.083333336, %v422_v42 }
 0x557   :  { %v424_v46 = vadd.f32 1e-05, %v423_v43 }
 0x559   :  { %680 = vrsqrt.f32 %v424_v46 }
 0x55a   :  { %682 = vrsqrt.f32 %v497_v52 }
 0x55b   :  { %684 = vrsqrt.f32 %v498_v53 }
 0x566   :  { %v681_v47 = vpop.eup %680 }
 0x567   :  { %v426_v48 = vmul.f32 %v681_v47, %v410_v30  ;;  %v427_v49 = vmul.f32 %v681_v47, %v411_v31  ;;  %v683_v59 = vpop.eup %682 }
 0x568   :  { %v685_v61 = vpop.eup %684  ;;  %v554_v4 = vmul.f32 %v683_v59, %v683_v59 }
 0x569   :  { %v428_v41 = vpack.c.bf16 %v427_v49, %v426_v48  ;;  %v555_v9 = vmul.f32 %v685_v61, %v685_v61 }
 0x56b   :  { %644 = vmatmul.mubr.msk.bf16.vlgmr.msra.gmra.mxu0 %vm43_vm1, %v428_v41 }
 0x62b   :  { %v484_v55 = vpop.f32.mrf.mxu0 }
 0x62c   :  { %v485_v57 = vadd.f32 %v591_v54, %v484_v55 }
 0x62d   :  { %v645_v56 = vpop.f32.mrf.mxu0 }
 0x62e   :  { %v502_v63 = vmul.f32 %v683_v59, %v485_v57  ;;  %v556_v8 = vmul.f32 %v554_v4, %v485_v57 }
 0x62f   :  { %v487_v58 = vpop.f32.mrf.mxu0 }
 0x630   :  { %v488_v60 = vadd.f32 %v591_v54, %v487_v58 }
 0x631   :  { %v646_v62 = vpop.f32.mrf.mxu0 }
 0x632   :  { %v503_v0 = vmul.f32 %v685_v61, %v488_v60  ;;  %v557_v14 = vmul.f32 %v555_v9, %v488_v60 }
 0x634   :  { %v504_v2 = vpack.c.bf16 %v503_v0, %v502_v63 }
 0x636   :  { %v509_v3 = vsel %vm320_vm6, %v504_v2, 0 }
 0x637   :  { %648 = vmatpush3.bf16.msra.mxu1 %v509_v3 }
 0x63a   :  { %650 = vmatmul.mubr.msk.bf16.vlgmr.msra.gmra.mxu1 %vm291_vm4, %v501_v1 }
 0x6fa   :  { %v545_v7 = vpop.f32.mrf.mxu1 }
 0x6fb   :  { %v552_v10 = vmul.f32 %v683_v59, %v545_v7 }
 0x6fc   :  { %v651_v11 = vpop.f32.mrf.mxu1 }
 0x6fd   :  { %v558_v12 = vadd.f32 %v556_v8, %v552_v10 }
 0x6fe   :  { %v548_v13 = vpop.f32.mrf.mxu1 }
 0x6ff   :  { %vm560_vm7 = vcmp.ge.f32.partialorder %v558_v12, 0.0  ;;  %v562_v15 = vmul.f32 0.01, %v558_v12  ;;  %v553_v16 = vmul.f32 %v685_v61, %v548_v13 }
 0x700   :  { %v652_v17 = vpop.f32.mrf.mxu1 }
 0x701   :  { %v564_v18 = vsel %vm560_vm7, %v558_v12, %v562_v15  ;;  %v559_v19 = vadd.f32 %v557_v14, %v553_v16 }
 0x702   :  { %566 = vst.msk [vmem:[%s912_s8] sm:$0xff] %vm43_vm1, %v564_v18 }
 0x703   :  { %vm561_vm8 = vcmp.ge.f32.partialorder %v559_v19, 0.0  ;;  %v563_v5 = vmul.f32 0.01, %v559_v19 }
 0x705   :  { %v565_v6 = vsel %vm561_vm8, %v559_v19, %v563_v5 }
 0x706   :  { %567 = vst.msk [vmem:[%s912_s8 + $0x8] sm:$0xf] %vm45_vm2, %v565_v6 }
 0x707   :  { %572 = vsyncpa [#allocation4], 1 }

// kernel: graph_unet_forward.9
= control target key start
LH: loop header
LB: loop body
LE: loop exit
PB: predicated region body
PF: predicated region fallthrough
CT: control target
= control target key end

     0   :  { %13 = vsyncpa [#allocation4], 0  ;;  %s953_s0 = inlined_call_operand.vmem [shape: s32[1,12], index: 0, kind: input, shape index: {}]   ;;  %s954_s1 = inlined_call_operand.vmem [shape: f32[16,16], index: 1, kind: input, shape index: {}]   ;;  %s955_s2 = inlined_call_operand.vmem [shape: f32[12,32], index: 2, kind: input, shape index: {}]   ;;  %s956_s3 = inlined_call_operand.vmem [shape: f32[16,32], index: 3, kind: input, shape index: {}]   ;;  %s957_s4 = inlined_call_operand.vmem [shape: bf16[32,32], index: 4, kind: input, shape index: {}]   ;;  %s958_s5 = inlined_call_operand.vmem [shape: f32[1,32], index: 5, kind: input, shape index: {}]   ;;  %s959_s6 = inlined_call_operand.vmem [shape: bf16[32,32], index: 6, kind: input, shape index: {}]   ;;  %s960_s7 = inlined_call_operand.vmem [shape: f32[1,32], index: 7, kind: input, shape index: {}]   ;;  %s961_s8 = inlined_call_operand.vmem [shape: f32[16,32], index: 8, kind: output, shape index: {}]  }
   0x1   :  { %s20_s29 = sshll.u32 %s953_s0, 4  ;;  %s21_s29 = int_to_ptr.vmem [resolvable:$true] %s20_s29 }
   0x2   :  { %s713_s30 = scalar_lea.vmem %s21_s29, 16  ;;  %p718_p1 = scmp.lt.s32.totalorder %s21_s29, %s21_s29 }
   0x3   :  { %p714_p0 = scmp.ne.s32.totalorder %s21_s29, %s713_s30  ;;  %p719_p2 = scmp.lt.s32.totalorder %s713_s30, %s713_s30 }
   0x5   :  { %p720_p3 = por %p719_p2, %p718_p1 }
   0x7   :  { %p721_p4 = pnand %p720_p3, %p714_p0 }
   0x9   :  { %724 = shalt.err (!%p721_p4)
}
   0xa   :  { %s727_s9 = smov [#allocation3]  }
   0xb   :  { %23 = dma.vmem_to_smem %s21_s29, 16, %s727_s9, [#allocation4]  }
   0xc   :  { %725 = dma.done.wait [#allocation4], 16  }
   0xd   :  { %726 = vsyncadd [#allocation4], 4294967280 }
   0xe   :  { %41 = sfence }
   0xf   :  { %v683_v0 = vld [vmem:[%s957_s4 + $0x8] sm:$0xff]   ;;  %v728_v1 = vmov 0.0   ;;  %v684_v2 = vld [vmem:[%s957_s4] sm:$0xff]   ;;  %vm729_vm0 = vmmov 0   ;;  %vm43_vm1 = vcmask 261120   ;;  %s47_s13 = sld [smem:[#allocation3]] }
  0x10   :  { %638 = vmatprep.subr.bf16.mxu0 %v728_v1  ;;  %646 = vmatprep.subr.bf16.mxu1 %v728_v1  ;;  %44 = vst.msk [vmem:[#allocation2] sm:$0xff] %vm43_vm1, %v728_v1  ;;  %45 = vst.msk [vmem:[#allocation2 + $0x8] sm:$0xff] %vm43_vm1, %v728_v1  ;;  %s600_s14 = sld [smem:[#allocation3 + $0x1]]  ;;  %v46_v3 = vld [vmem:[%s955_s2] sm:$0x1]  ;;  %vm49_vm2 = vcmask 253952  }
  0x11   :  { %639 = vmatpush3.bf16.msra.mxu0 %v683_v0  ;;  %642 = vmatprep.mubr.msk.bf16.mxu0 %vm729_vm0, %v728_v1  ;;  %s601_s15 = sld [smem:[#allocation3 + $0x2]]  ;;  %v51_v4 = vld [vmem:[%s955_s2 + $0x1] sm:$0x1]  ;;  %v55_v5 = vld [vmem:[%s955_s2 + $0x2] sm:$0x1]  ;;  %v127_v56 = vld [vmem:[%s956_s3 + $0x8] sm:$0xff] }
  0x12   :  { %640 = vmatprep.subr.bf16.mxu0 %v728_v1  ;;  %647 = vmatpush3.bf16.msra.mxu1 %v683_v0  ;;  %s602_s17 = sld [smem:[#allocation3 + $0x3]]  ;;  %v59_v6 = vld [vmem:[%s955_s2 + $0x3] sm:$0x1]  ;;  %v63_v7 = vld [vmem:[%s955_s2 + $0x4] sm:$0x1]  ;;  %v129_v58 = vsel %vm43_vm1, %v127_v56, 0.0 }
  0x13   :  { %648 = vmatprep.subr.bf16.mxu1 %v728_v1  ;;  %650 = vmatprep.mubr.msk.bf16.mxu1 %vm729_vm0, %v728_v1  ;;  %s603_s20 = sld [smem:[#allocation3 + $0x4]]  ;;  %v67_v8 = vld [vmem:[%s955_s2 + $0x5] sm:$0x1]  ;;  %v71_v9 = vld [vmem:[%s955_s2 + $0x6] sm:$0x1]  ;;  %vm314_vm3 = vcmask 130048  }
  0x14   :  { %s604_s25 = sld [smem:[#allocation3 + $0x5]]  ;;  %v75_v10 = vld [vmem:[%s955_s2 + $0x7] sm:$0x1]  ;;  %v79_v11 = vld [vmem:[%s955_s2 + $0x8] sm:$0x1] }
  0x15   :  { %641 = vmatpush3.bf16.msra.mxu0 %v684_v2  ;;  %s605_s28 = sld [smem:[#allocation3 + $0x6]]  ;;  %s48_s29 = scalar_lea.vmem [#allocation2], %s47_s13  ;;  %v83_v12 = vld [vmem:[%s955_s2 + $0x9] sm:$0x1]  ;;  %v87_v13 = vld [vmem:[%s955_s2 + $0xa] sm:$0x1] }
  0x16   :  { %654 = vmatprep.subr.bf16.mxu0 %v728_v1  ;;  %649 = vmatpush3.bf16.msra.mxu1 %v684_v2  ;;  %50 = vst.msk [vmem:[%s48_s29] sm:$0x1] %vm49_vm2, %v46_v3  ;;  %s606_s10 = sld [smem:[#allocation3 + $0x7]]  ;;  %s53_s11 = scalar_lea.vmem [#allocation2], %s600_s14  ;;  %v91_v14 = vld [vmem:[%s955_s2 + $0xb] sm:$0x1] }
  0x17   :  { %660 = vmatprep.subr.bf16.mxu1 %v728_v1  ;;  %54 = vst.msk [vmem:[%s53_s11] sm:$0x1] %vm49_vm2, %v51_v4  ;;  %s607_s4 = sld [smem:[#allocation3 + $0x8]]  ;;  %s57_s16 = scalar_lea.vmem [#allocation2], %s601_s15  ;;  %v856_v47 = vld [vmem:[%s958_s5] ss:$0 sm:$0xff] }
  0x18   :  { %58 = vst.msk [vmem:[%s57_s16] sm:$0x1] %vm49_vm2, %v55_v5  ;;  %s608_s19 = sld [smem:[#allocation3 + $0x9]]  ;;  %s61_s21 = scalar_lea.vmem [#allocation2], %s602_s17  ;;  %v126_v55 = vld [vmem:[%s956_s3] sm:$0xff] }
  0x19   :  { %62 = vst.msk [vmem:[%s61_s21] sm:$0x1] %vm49_vm2, %v59_v6  ;;  %s609_s22 = sld [smem:[#allocation3 + $0xa]]  ;;  %s65_s14 = scalar_lea.vmem [#allocation2], %s603_s20  ;;  %v128_v57 = vsel %vm43_vm1, %v126_v55, 0.0 }
  0x1a   :  { %66 = vst.msk [vmem:[%s65_s14] sm:$0x1] %vm49_vm2, %v63_v7  ;;  %s610_s23 = sld [smem:[#allocation3 + $0xb]]  ;;  %s69_s24 = scalar_lea.vmem [#allocation2], %s604_s25  ;;  %v130_v59 = vadd.f32 %v129_v58, %v128_v57 }
  0x1b   :  { %70 = vst.msk [vmem:[%s69_s24] sm:$0x1] %vm49_vm2, %v67_v8  ;;  %s73_s27 = scalar_lea.vmem [#allocation2], %s605_s28 }
  0x1c   :  { %74 = vst.msk [vmem:[%s73_s27] sm:$0x1] %vm49_vm2, %v71_v9  ;;  %s77_s17 = scalar_lea.vmem [#allocation2], %s606_s10  ;;  %v131_v60 = vrot.slane %v130_v59, 4 }
  0x1d   :  { %78 = vst.msk [vmem:[%s77_s17] sm:$0x1] %vm49_vm2, %v75_v10  ;;  %s81_s25 = scalar_lea.vmem [#allocation2], %s607_s4 }
  0x1e   :  { %82 = vst.msk [vmem:[%s81_s25] sm:$0x1] %vm49_vm2, %v79_v11  ;;  %s85_s28 = scalar_lea.vmem [#allocation2], %s608_s19  ;;  %v132_v61 = vadd.f32 %v131_v60, %v130_v59 }
  0x1f   :  { %86 = vst.msk [vmem:[%s85_s28] sm:$0x1] %vm49_vm2, %v83_v12  ;;  %s89_s12 = scalar_lea.vmem [#allocation2], %s609_s22 }
  0x20   :  { %90 = vst.msk [vmem:[%s89_s12] sm:$0x1] %vm49_vm2, %v87_v13  ;;  %s93_s10 = scalar_lea.vmem [#allocation2], %s610_s23  ;;  %v133_v62 = vrot.slane %v132_v61, 2 }
  0x21   :  { %94 = vst.msk [vmem:[%s93_s10] sm:$0x1] %vm49_vm2, %v91_v14 }
  0x22   :  { %v134_v63 = vadd.f32 %v133_v62, %v132_v61 }
  0x24   :  { %v135_v0 = vrot.slane %v134_v63, 1 }
  0x26   :  { %v136_v2 = vadd.f32 %v135_v0, %v134_v63 }
  0x28   :  { %v95_v15 = vld [vmem:[#allocation2] sm:$0xff]  ;;  %v96_v16 = vld [vmem:[#allocation2 + $0x8] sm:$0xff]  ;;  %v137_v3 = vmul.f32 0.0625, %v136_v2 }
  0x29   :  { %v97_v17 = vsel %vm43_vm1, %v95_v15, 0.0  ;;  %v98_v18 = vsel %vm43_vm1, %v96_v16, 0.0 }
  0x2a   :  { %v99_v19 = vadd.f32 %v98_v18, %v97_v17  ;;  %v138_v4 = vsub.f32 %v126_v55, %v137_v3  ;;  %v139_v5 = vsub.f32 %v127_v56, %v137_v3 }
  0x2c   :  { %v100_v20 = vrot.slane %v99_v19, 4  ;;  %v140_v6 = vmul.f32 %v138_v4, %v138_v4  ;;  %v141_v7 = vmul.f32 %v139_v5, %v139_v5 }
  0x2e   :  { %v101_v21 = vadd.f32 %v100_v20, %v99_v19  ;;  %v142_v8 = vsel %vm43_vm1, %v140_v6, 0.0  ;;  %v143_v9 = vsel %vm43_vm1, %v141_v7, 0.0 }
  0x2f   :  { %v144_v10 = vadd.f32 %v143_v9, %v142_v8  ;;  %v685_v8 = vld [vmem:[%s959_s6 + $0x8] sm:$0xff]   ;;  %v686_v9 = vld [vmem:[%s959_s6] sm:$0xff]  }
  0x30   :  { %v102_v22 = vrot.slane %v101_v21, 2 }
  0x31   :  { %v145_v11 = vrot.slane %v144_v10, 4 }
  0x32   :  { %v103_v23 = vadd.f32 %v102_v22, %v101_v21 }
  0x33   :  { %v146_v12 = vadd.f32 %v145_v11, %v144_v10  ;;  %v914_v10 = vld [vmem:[%s954_s1] sm:$0xff]  ;;  %v919_v11 = vld [vmem:[%s954_s1 + $0x8] sm:$0xff] }
  0x34   :  { %v104_v24 = vrot.slane %v103_v23, 1 }
  0x35   :  { %v147_v13 = vrot.slane %v146_v12, 2 }
  0x36   :  { %v105_v25 = vadd.f32 %v104_v24, %v103_v23 }
  0x37   :  { %v148_v14 = vadd.f32 %v147_v13, %v146_v12  ;;  %v509_v12 = vsel %vm314_vm3, %v914_v10, 0.0  ;;  %v512_v13 = vsel %vm314_vm3, %v919_v11, 0.0 }
  0x38   :  { %v107_v26 = vmul.f32 0.0625, %v105_v25 }
  0x3a   :  { %v108_v27 = vsub.f32 %v95_v15, %v107_v26  ;;  %v109_v28 = vsub.f32 %v96_v16, %v107_v26  ;;  %v149_v15 = vrot.slane %v148_v14, 1 }
  0x3c   :  { %v110_v29 = vmul.f32 %v108_v27, %v108_v27  ;;  %v111_v30 = vmul.f32 %v109_v28, %v109_v28  ;;  %v150_v16 = vadd.f32 %v149_v15, %v148_v14 }
  0x3e   :  { %v112_v31 = vsel %vm43_vm1, %v110_v29, 0.0  ;;  %v113_v32 = vsel %vm43_vm1, %v111_v30, 0.0  ;;  %v151_v17 = vmul.f32 0.0625, %v150_v16 }
  0x3f   :  { %v114_v33 = vadd.f32 %v113_v32, %v112_v31 }
  0x40   :  { %v152_v18 = vadd.f32 1e-05, %v151_v17 }
  0x41   :  { %v115_v34 = vrot.slane %v114_v33, 4 }
  0x43   :  { %v116_v35 = vadd.f32 %v115_v34, %v114_v33 }
  0x45   :  { %v117_v36 = vrot.slane %v116_v35, 2 }
  0x47   :  { %v118_v37 = vadd.f32 %v117_v36, %v116_v35 }
  0x49   :  { %v119_v38 = vrot.slane %v118_v37, 1 }
  0x4b   :  { %v120_v39 = vadd.f32 %v119_v38, %v118_v37 }
  0x4d   :  { %v121_v40 = vmul.f32 0.0625, %v120_v39 }
  0x4f   :  { %v122_v41 = vadd.f32 1e-05, %v121_v40 }
  0x51   :  { %687 = vrsqrt.f32 %v122_v41 }
  0x52   :  { %689 = vrsqrt.f32 %v152_v18 }
  0x5e   :  { %v688_v42 = vpop.eup %687 }
  0x5f   :  { %v124_v43 = vmul.f32 %v688_v42, %v108_v27  ;;  %v125_v44 = vmul.f32 %v688_v42, %v109_v28  ;;  %v690_v19 = vpop.eup %689 }
  0x60   :  { %v154_v20 = vmul.f32 %v690_v19, %v138_v4  ;;  %v155_v21 = vmul.f32 %v690_v19, %v139_v5 }
  0x61   :  { %v161_v45 = vpack.c.bf16 %v125_v44, %v124_v43 }
  0x62   :  { %v224_v22 = vpack.c.bf16 %v155_v21, %v154_v20 }
  0x63   :  { %643 = vmatmul.mubr.msk.bf16.vlgmr.msra.gmra.mxu0 %vm43_vm1, %v161_v45 }
  0x64   :  { %656 = vmatprep.mubr.msk.bf16.mxu0 %vm729_vm0, %v728_v1  ;;  %651 = vmatmul.mubr.msk.bf16.vlgmr.msra.gmra.mxu1 %vm43_vm1, %v224_v22 }
  0x65   :  { %662 = vmatprep.mubr.msk.bf16.mxu1 %vm729_vm0, %v728_v1 }
 0x123   :  { %v217_v46 = vpop.f32.mrf.mxu0 }
 0x124   :  { %v859_v50 = vadd.f32 %v856_v47, %v217_v46  ;;  %v262_v39 = vpop.f32.mrf.mxu1 }
 0x125   :  { %v644_v48 = vpop.f32.mrf.mxu0  ;;  %v889_v41 = vadd.f32 %v856_v47, %v262_v39 }
 0x126   :  { %v652_v40 = vpop.f32.mrf.mxu1 }
 0x127   :  { %v220_v49 = vpop.f32.mrf.mxu0 }
 0x128   :  { %v862_v51 = vadd.f32 %v856_v47, %v220_v49  ;;  %v265_v42 = vpop.f32.mrf.mxu1 }
 0x129   :  { %v645_v52 = vpop.f32.mrf.mxu0  ;;  %v892_v43 = vadd.f32 %v856_v47, %v265_v42 }
 0x12a   :  { %v269_v53 = vpack.c.bf16 %v862_v51, %v859_v50  ;;  %v653_v44 = vpop.f32.mrf.mxu1 }
 0x12b   :  { %v338_v45 = vpack.c.bf16 %v892_v43, %v889_v41 }
 0x12c   :  { %v271_v54 = vsel %vm43_vm1, %v269_v53, 0 }
 0x12d   :  { %655 = vmatpush3.bf16.xpose.msra.mxu0 %v271_v54  ;;  %661 = vmatpush3.bf16.msra.mxu1 %v338_v45 }
 0x12e   :  { %666 = vmatprep.subr.bf16.mxu0 %v728_v1  ;;  %674 = vmatprep.subr.bf16.mxu1 %v728_v1 }
 0x134   :  { %657 = vmatmul.mubr.msk.bf16.vlgmr.msra.gmra.mxu0 %vm43_vm1, %v269_v53 }
 0x135   :  { %670 = vmatprep.mubr.msk.bf16.mxu0 %vm729_vm0, %v728_v1  ;;  %667 = vmatpush3.bf16.msra.mxu0 %v685_v8 }
 0x136   :  { %668 = vmatprep.subr.bf16.mxu0 %v728_v1 }
 0x139   :  { %669 = vmatpush3.bf16.msra.mxu0 %v686_v9 }
 0x1f4   :  { %v307_v23 = vpop.f32.mrf.mxu0 }
 0x1f5   :  { %v315_v24 = vsel %vm314_vm3, %v307_v23, -inf }
 0x1f6   :  { %316 = vmax.xlane.f32.xlu0 %v315_v24  ;;  %v658_v25 = vpop.f32.mrf.mxu0 }
 0x1f8   :  { %v310_v26 = vpop.f32.mrf.mxu0 }
 0x1f9   :  { %v318_v27 = vsel %vm314_vm3, %v310_v26, -inf }
 0x1fa   :  { %319 = vmax.xlane.f32.xlu0 %v318_v27  ;;  %v659_v28 = vpop.f32.mrf.mxu0 }
 0x27f   :  { %v317_v29 = vpop.xlane.xlu0 %316 }
 0x280   :  { %v321_v30 = vsub.f32 %v307_v23, %v317_v29 }
 0x282   :  { %v323_v31 = vmul.f32 1.442695, %v321_v30 }
 0x283   :  { %v320_v32 = vpop.xlane.xlu0 %319 }
 0x284   :  { %691 = vpow2.f32 %v323_v31  ;;  %v322_v33 = vsub.f32 %v310_v26, %v320_v32 }
 0x286   :  { %v325_v34 = vmul.f32 1.442695, %v322_v33 }
 0x288   :  { %693 = vpow2.f32 %v325_v34 }
 0x291   :  { %v692_v35 = vpop.eup %691 }
 0x292   :  { %v327_v36 = vsel %vm314_vm3, %v692_v35, 0.0 }
 0x293   :  { %328 = vadd.xlane.f32.xlu1 %v327_v36 }
 0x295   :  { %v694_v37 = vpop.eup %693 }
 0x296   :  { %v330_v38 = vsel %vm314_vm3, %v694_v37, 0.0 }
 0x297   :  { %331 = vadd.xlane.f32.xlu1 %v330_v38 }
 0x31c   :  { %v329_v46 = vpop.xlane.xlu1 %328 }
 0x31d   :  { %695 = vrcp.f32 %v329_v46 }
 0x320   :  { %v332_v48 = vpop.xlane.xlu1 %331 }
 0x321   :  { %697 = vrcp.f32 %v332_v48 }
 0x32a   :  { %v696_v49 = vpop.eup %695 }
 0x32b   :  { %v335_v53 = vmul.f32 %v696_v49, %v692_v35 }
 0x32e   :  { %v698_v52 = vpop.eup %697 }
 0x32f   :  { %v336_v54 = vmul.f32 %v698_v52, %v694_v37 }
 0x331   :  { %v337_v55 = vpack.c.bf16 %v336_v54, %v335_v53 }
 0x333   :  { %663 = vmatmul.mubr.msk.bf16.vlgmr.msra.gmra.mxu1 %vm314_vm3, %v337_v55 }
 0x334   :  { %676 = vmatprep.mubr.msk.bf16.mxu1 %vm729_vm0, %v728_v1  ;;  %v519_v1 = vpack.c.bf16 %v919_v11, %v914_v10 }
 0x3f3   :  { %v376_v47 = vpop.f32.mrf.mxu1 }
 0x3f4   :  { %v383_v56 = vsel %vm43_vm1, %v376_v47, -inf }
 0x3f5   :  { %384 = vmax.xlane.f32.xlu0 %v383_v56  ;;  %v664_v57 = vpop.f32.mrf.mxu1 }
 0x3f7   :  { %v379_v58 = vpop.f32.mrf.mxu1 }
 0x3f8   :  { %v386_v59 = vsel %vm43_vm1, %v379_v58, -inf }
 0x3f9   :  { %387 = vmax.xlane.f32.xlu1 %v386_v59  ;;  %v665_v60 = vpop.f32.mrf.mxu1  ;;  %v618_v59 = vld [vmem:[%s960_s7] ss:$0 sm:$0xff] }
 0x47e   :  { %v385_v61 = vpop.xlane.xlu0 %384 }
 0x47f   :  { %v389_v62 = vsub.f32 %v376_v47, %v385_v61 }
 0x481   :  { %v391_v63 = vmul.f32 1.442695, %v389_v62 }
 0x482   :  { %v388_v0 = vpop.xlane.xlu1 %387 }
 0x483   :  { %699 = vpow2.f32 %v391_v63  ;;  %v390_v2 = vsub.f32 %v379_v58, %v388_v0 }
 0x485   :  { %v393_v3 = vmul.f32 1.442695, %v390_v2 }
 0x487   :  { %701 = vpow2.f32 %v393_v3 }
 0x490   :  { %v700_v4 = vpop.eup %699 }
 0x491   :  { %v395_v5 = vsel %vm43_vm1, %v700_v4, 0.0 }
 0x492   :  { %396 = vadd.xlane.f32.xlu0 %v395_v5 }
 0x494   :  { %v702_v6 = vpop.eup %701 }
 0x495   :  { %v398_v7 = vsel %vm43_vm1, %v702_v6, 0.0 }
 0x496   :  { %399 = vadd.xlane.f32.xlu1 %v398_v7  ;;  %510 = vadd.xlane.f32.xlu0 %v509_v12 }
 0x49a   :  { %513 = vadd.xlane.f32.xlu1 %v512_v13 }
 0x51b   :  { %v397_v14 = vpop.xlane.xlu0 %396 }
 0x51c   :  { %703 = vrcp.f32 %v397_v14 }
 0x51f   :  { %v400_v15 = vpop.xlane.xlu1 %399  ;;  %v511_v47 = vpop.xlane.xlu0 %510 }
 0x520   :  { %705 = vrcp.f32 %v400_v15  ;;  %v515_v57 = vadd.f32 1.0, %v511_v47 }
 0x523   :  { %v514_v56 = vpop.xlane.xlu1 %513 }
 0x524   :  { %v516_v58 = vadd.f32 1.0, %v514_v56 }
 0x529   :  { %v704_v16 = vpop.eup %703 }
 0x52a   :  { %v403_v17 = vmul.f32 %v704_v16, %v700_v4 }
 0x52c   :  { %v405_v18 = vmul.f32 %v403_v17, %v889_v41 }
 0x52d   :  { %v706_v19 = vpop.eup %705 }
 0x52e   :  { %v407_v20 = vadd.f32 %v405_v18, %v859_v50  ;;  %v404_v21 = vmul.f32 %v706_v19, %v702_v6 }
 0x530   :  { %v406_v22 = vmul.f32 %v404_v21, %v892_v43  ;;  %v409_v24 = vadd.f32 %v407_v20, %v889_v41 }
 0x532   :  { %v408_v23 = vadd.f32 %v406_v22, %v862_v51  ;;  %v418_v26 = vsel %vm43_vm1, %v409_v24, 0.0 }
 0x534   :  { %v410_v25 = vadd.f32 %v408_v23, %v892_v43 }
 0x536   :  { %v419_v27 = vsel %vm43_vm1, %v410_v25, 0.0 }
 0x537   :  { %v420_v28 = vadd.f32 %v419_v27, %v418_v26 }
 0x539   :  { %v421_v29 = vrot.slane %v420_v28, 4 }
 0x53b   :  { %v422_v30 = vadd.f32 %v421_v29, %v420_v28 }
 0x53d   :  { %v423_v31 = vrot.slane %v422_v30, 2 }
 0x53f   :  { %v424_v32 = vadd.f32 %v423_v31, %v422_v30 }
 0x541   :  { %v425_v33 = vrot.slane %v424_v32, 1 }
 0x543   :  { %v426_v50 = vadd.f32 %v425_v33, %v424_v32 }
 0x545   :  { %v427_v34 = vmul.f32 0.0625, %v426_v50 }
 0x547   :  { %v428_v35 = vsub.f32 %v409_v24, %v427_v34  ;;  %v429_v36 = vsub.f32 %v410_v25, %v427_v34 }
 0x549   :  { %v430_v37 = vmul.f32 %v428_v35, %v428_v35  ;;  %v431_v51 = vmul.f32 %v429_v36, %v429_v36 }
 0x54b   :  { %v432_v38 = vsel %vm43_vm1, %v430_v37, 0.0  ;;  %v433_v39 = vsel %vm43_vm1, %v431_v51, 0.0 }
 0x54c   :  { %v434_v40 = vadd.f32 %v433_v39, %v432_v38 }
 0x54e   :  { %v435_v41 = vrot.slane %v434_v40, 4 }
 0x550   :  { %v436_v42 = vadd.f32 %v435_v41, %v434_v40 }
 0x552   :  { %v437_v43 = vrot.slane %v436_v42, 2 }
 0x554   :  { %v438_v44 = vadd.f32 %v437_v43, %v436_v42 }
 0x556   :  { %v439_v45 = vrot.slane %v438_v44, 1 }
 0x558   :  { %v440_v46 = vadd.f32 %v439_v45, %v438_v44 }
 0x55a   :  { %v441_v48 = vmul.f32 0.0625, %v440_v46 }
 0x55c   :  { %v442_v49 = vadd.f32 1e-05, %v441_v48 }
 0x55e   :  { %707 = vrsqrt.f32 %v442_v49 }
 0x55f   :  { %709 = vrsqrt.f32 %v515_v57 }
 0x560   :  { %711 = vrsqrt.f32 %v516_v58 }
 0x56b   :  { %v708_v52 = vpop.eup %707 }
 0x56c   :  { %v444_v53 = vmul.f32 %v708_v52, %v428_v35  ;;  %v445_v54 = vmul.f32 %v708_v52, %v429_v36  ;;  %v710_v0 = vpop.eup %709 }
 0x56d   :  { %v712_v3 = vpop.eup %711  ;;  %v569_v8 = vmul.f32 %v710_v0, %v710_v0 }
 0x56e   :  { %v446_v55 = vpack.c.bf16 %v445_v54, %v444_v53  ;;  %v570_v13 = vmul.f32 %v712_v3, %v712_v3 }
 0x570   :  { %671 = vmatmul.mubr.msk.bf16.vlgmr.msra.gmra.mxu0 %vm43_vm1, %v446_v55 }
 0x630   :  { %v502_v60 = vpop.f32.mrf.mxu0 }
 0x631   :  { %v503_v62 = vadd.f32 %v618_v59, %v502_v60 }
 0x632   :  { %v672_v61 = vpop.f32.mrf.mxu0 }
 0x633   :  { %v520_v5 = vmul.f32 %v710_v0, %v503_v62  ;;  %v571_v12 = vmul.f32 %v569_v8, %v503_v62 }
 0x634   :  { %v505_v63 = vpop.f32.mrf.mxu0 }
 0x635   :  { %v506_v2 = vadd.f32 %v618_v59, %v505_v63 }
 0x636   :  { %v673_v4 = vpop.f32.mrf.mxu0 }
 0x637   :  { %v521_v6 = vmul.f32 %v712_v3, %v506_v2  ;;  %v572_v18 = vmul.f32 %v570_v13, %v506_v2 }
 0x639   :  { %v522_v7 = vpack.c.bf16 %v521_v6, %v520_v5 }
 0x63b   :  { %675 = vmatpush3.bf16.msra.mxu1 %v522_v7 }
 0x63e   :  { %677 = vmatmul.mubr.msk.bf16.vlgmr.msra.gmra.mxu1 %vm314_vm3, %v519_v1 }
 0x6fe   :  { %v560_v9 = vpop.f32.mrf.mxu1 }
 0x6ff   :  { %v567_v14 = vmul.f32 %v710_v0, %v560_v9 }
 0x700   :  { %v678_v15 = vpop.f32.mrf.mxu1 }
 0x701   :  { %v573_v16 = vadd.f32 %v571_v12, %v567_v14 }
 0x702   :  { %v563_v17 = vpop.f32.mrf.mxu1 }
 0x703   :  { %vm575_vm4 = vcmp.ge.f32.partialorder %v573_v16, 0.0  ;;  %v577_v19 = vmul.f32 0.01, %v573_v16  ;;  %v568_v20 = vmul.f32 %v712_v3, %v563_v17 }
 0x704   :  { %v679_v21 = vpop.f32.mrf.mxu1 }
 0x705   :  { %v579_v22 = vsel %vm575_vm4, %v573_v16, %v577_v19  ;;  %v574_v23 = vadd.f32 %v572_v18, %v568_v20 }
 0x706   :  { %581 = vst.msk [vmem:[%s961_s8] sm:$0xff] %vm43_vm1, %v579_v22 }
 0x707   :  { %vm576_vm5 = vcmp.ge.f32.partialorder %v574_v23, 0.0  ;;  %v578_v10 = vmul.f32 0.01, %v574_v23 }
 0x709   :  { %v580_v11 = vsel %vm576_vm5, %v574_v23, %v578_v10 }
 0x70a   :  { %582 = vst.msk [vmem:[%s961_s8 + $0x8] sm:$0xff] %vm43_vm1, %v580_v11 }
 0x70b   :  { %587 = vsyncpa [#allocation4], 1 }

</bundles_post_ra>
